<compile_context>
chip_gen: v7x
topology: tpu7x:2x2x1
jax: 0.10.0
libtpu: 0.0.40
codegen_flags: <defaults>
</compile_context>

<pallas_src>
import functools
import jax
import jax.numpy as jnp
from jax.experimental import pallas as pl
from jax.experimental.pallas import tpu as pltpu


# ---------------------------------------------------------------------------
# Fused per-graph kernel:
#   norm_scale(Xs), norm_scale(Ys)
#   H  = relu(pos-terms (VPU FMAs) + task_bias)           (task bias precomputed in glue)
#   F  = [Hx; Hy] @ W2 + b2                                (one bf16 MXU matmul)
#   S  = Fx Fy^T / sqrt(D); P = softmax(S); Ycorr = P Ys
#   Hcov = (Xs - xm)^T (Ycorr - ym)
# Outputs: Fx, Fy, Hcov, xm, ym   (ycorr is never materialized in HBM)
# ---------------------------------------------------------------------------
def _fused_kernel(xs_ref, ys_ref, tb_ref, w1a_ref, w2_ref, b2_ref,
                  fx_ref, fy_ref, hcov_ref, xm_ref, ym_ref):
    xs = xs_ref[0]                                   # (N, 3) raw action points
    ys = ys_ref[0]                                   # (M, 3) raw anchor points
    tb = tb_ref[0]                                   # (1, H) task bias (= task @ W1b + b1)
    w1a = w1a_ref[...]                               # (3, H)
    N = xs.shape[0]

    # --- Model.norm_scale (per cloud), pure VPU, never leaves VMEM ---
    def _norm(p):
        mean = jnp.mean(p, axis=0, keepdims=True)    # (1, 3)   torch: mean(dim=1)
        c = p - mean
        scale = jnp.max(jnp.abs(c))                  # scalar   max over dim2 then dim1
        return c / (scale + 1e-8)

    xn = _norm(xs)                                   # (N, 3)
    yn = _norm(ys)                                   # (M, 3)

    # --- layer 1: K=3 contraction as 3 broadcast-FMAs (keep the MXU free) ---
    def _layer1(p):
        h = (p[:, 0:1] * w1a[0:1, :]
             + p[:, 1:2] * w1a[1:2, :]
             + p[:, 2:3] * w1a[2:3, :]
             + tb)
        return jnp.maximum(h, 0.0)

    hx = _layer1(xn)                                 # (N, H)
    hy = _layer1(yn)                                 # (M, H)

    # --- layer 2: one concatenated matmul, bf16 operands, f32 accumulation ---
    h_all = jnp.concatenate([hx, hy], axis=0).astype(jnp.bfloat16)      # (N+M, H)
    emb = jnp.dot(h_all, w2_ref[...],
                  preferred_element_type=jnp.float32) + b2_ref[...]      # (N+M, D) f32
    fx = emb[:N]                                     # (N, D)
    fy = emb[N:]                                     # (M, D)
    fx_ref[0] = fx
    fy_ref[0] = fy

    # --- soft correspondence + cross-covariance ---
    d = fx.shape[-1]
    scores = jax.lax.dot_general(
        fx.astype(jnp.bfloat16), fy.astype(jnp.bfloat16),
        (((1,), (1,)), ((), ())), preferred_element_type=jnp.float32
    ) * (1.0 / (d ** 0.5))                           # (N, M)
    m = jnp.max(scores, axis=-1, keepdims=True)
    e = jnp.exp(scores - m)
    p = e / jnp.sum(e, axis=-1, keepdims=True)       # softmax over anchor points
    ycorr = jnp.dot(p, ys, preferred_element_type=jnp.float32)           # (N, 3)
    xm = jnp.mean(xs, axis=0, keepdims=True)         # (1, 3)
    ym = jnp.mean(ycorr, axis=0, keepdims=True)      # (1, 3)
    xc = xs - xm
    yc = ycorr - ym
    hcov = jax.lax.dot_general(
        xc, yc, (((0,), (0,)), ((), ())), preferred_element_type=jnp.float32
    )                                                # (3, 3)
    hcov_ref[0] = hcov
    xm_ref[0] = xm
    ym_ref[0] = ym


def fused_forward_pallas(xs, ys, task_bias, w1a, w2_bf16, b2):
    B, N, _ = xs.shape
    M = ys.shape[1]
    H = w1a.shape[1]
    D = w2_bf16.shape[1]
    return pl.pallas_call(
        _fused_kernel,
        out_shape=(
            jax.ShapeDtypeStruct((B, N, D), jnp.float32),   # Fx
            jax.ShapeDtypeStruct((B, M, D), jnp.float32),   # Fy
            jax.ShapeDtypeStruct((B, 3, 3), jnp.float32),   # Hcov
            jax.ShapeDtypeStruct((B, 1, 3), jnp.float32),   # xm
            jax.ShapeDtypeStruct((B, 1, 3), jnp.float32),   # ym
        ),
        grid=(B,),
        in_specs=[
            pl.BlockSpec((1, N, 3), lambda b: (b, 0, 0)),
            pl.BlockSpec((1, M, 3), lambda b: (b, 0, 0)),
            pl.BlockSpec((1, 1, H), lambda b: (b, 0, 0)),
            pl.BlockSpec((3, H), lambda b: (0, 0)),
            pl.BlockSpec((H, D), lambda b: (0, 0)),
            pl.BlockSpec((1, D), lambda b: (0, 0)),
        ],
        out_specs=[
            pl.BlockSpec((1, N, D), lambda b: (b, 0, 0)),
            pl.BlockSpec((1, M, D), lambda b: (b, 0, 0)),
            pl.BlockSpec((1, 3, 3), lambda b: (b, 0, 0)),
            pl.BlockSpec((1, 1, 3), lambda b: (b, 0, 0)),
            pl.BlockSpec((1, 1, 3), lambda b: (b, 0, 0)),
        ],
        compiler_params=pltpu.CompilerParams(dimension_semantics=("parallel",)),
    )(xs, ys, task_bias, w1a, w2_bf16, b2)


# ---------------------------------------------------------------------------
# Parameter init (deterministic, synthetic -- no checkpoint)
# ---------------------------------------------------------------------------
def init_params(key, hidden=128, emb_dim=512):
    k1, k2, k3 = jax.random.split(key, 3)
    return {
        "w1a": 0.02 * jax.random.normal(k1, (3, hidden), jnp.float32),
        "w1b": 0.02 * jax.random.normal(k2, (2, hidden), jnp.float32),
        "b1": jnp.zeros((1, hidden), jnp.float32),
        "w2": 0.02 * jax.random.normal(k3, (hidden, emb_dim), jnp.float32),
        "b2": jnp.zeros((1, emb_dim), jnp.float32),
    }


# ---------------------------------------------------------------------------
# Model.forward equivalent
# ---------------------------------------------------------------------------
@functools.partial(jax.jit, static_argnames=("num_graphs",))
def model_forward(params, action_pos, action_loc, anchor_pos, num_graphs):
    B = num_graphs
    Xs = action_pos.reshape(B, -1, 3)
    Ys = anchor_pos.reshape(B, -1, 3)

    # task_sps: [0, sp] if |sp| < 1 else [1, sp]  (plain-JAX glue, mirrors the python loop)
    sp = action_loc.astype(jnp.float32).reshape(-1)
    task_sps = jnp.stack([jnp.where(jnp.abs(sp) < 1.0, 0.0, 1.0), sp], axis=-1)   # (B, 2)

    # hoist the K=2 contraction off the MXU: per-graph bias = task @ W1b + b1   (B, 1, H)
    task_bias = (task_sps @ params["w1b"] + params["b1"]).reshape(B, 1, -1)
    w2_bf16 = params["w2"].astype(jnp.bfloat16)

    # --- single fused Pallas hot path ---
    Fx, Fy, Hcov, xm, ym = fused_forward_pallas(
        Xs, Ys, task_bias, params["w1a"], w2_bf16, params["b2"]
    )

    # --- SVD head (plain JAX; 3x3 SVD has no Pallas equivalent) ---
    U, _S, Vt = jnp.linalg.svd(Hcov)
    V = jnp.swapaxes(Vt, -1, -2)
    Ut = jnp.swapaxes(U, -1, -2)
    det = jnp.linalg.det(jnp.matmul(V, Ut))                                # (B,)
    diag = jnp.stack([jnp.ones_like(det), jnp.ones_like(det), det], axis=-1)   # (B, 3)
    R_pred = jnp.matmul(V * diag[:, None, :], Ut)                          # (B, 3, 3)
    xm = xm[:, 0, :]
    ym = ym[:, 0, :]
    t_pred = ym - jnp.einsum("bij,bj->bi", R_pred, xm)                     # (B, 3)

    pred_T_action = (
        jnp.zeros((B, 4, 4), jnp.float32)
        .at[:, :3, :3].set(R_pred)
        .at[:, :3, 3].set(t_pred)
        .at[:, 3, 3].set(1.0)
    )
    # matches torch return: (R_pred, t_pred, None, pred_T_action, Fx, Fy)
    return R_pred, t_pred, None, pred_T_action, Fx, Fy


if __name__ == "__main__":
    key = jax.random.PRNGKey(0)
    kp, ka, kb, kl = jax.random.split(key, 4)

    B = 2          # num_graphs
    N = 64         # action points per graph
    M = 64         # anchor points per graph
    EMB = 512      # embedding_dim (module default)

    params = init_params(kp, hidden=128, emb_dim=EMB)
    action_pos = jax.random.normal(ka, (B * N, 3), jnp.float32)   # flattened graph-batch pos
    anchor_pos = jax.random.normal(kb, (B * M, 3), jnp.float32)
    action_loc = jax.random.uniform(kl, (B,), jnp.float32, -2.0, 2.0)

    R_pred, t_pred, _none, pred_T_action, Fx, Fy = model_forward(
        params, action_pos, action_loc, anchor_pos, B
    )
    jax.block_until_ready((R_pred, t_pred, pred_T_action, Fx, Fy))

    assert R_pred.shape == (B, 3, 3)
    assert t_pred.shape == (B, 3)
    assert pred_T_action.shape == (B, 4, 4)
    assert Fx.shape == (B, N, EMB) and Fy.shape == (B, M, EMB)
    assert Fx.dtype == jnp.float32 and Fy.dtype == jnp.float32
    print("KERNEL_OK")
</pallas_src>

<mosaic_0001>
module attributes {stable_mosaic.version = 11 : i64} {
  func.func @_fused_kernel(%arg0: i32, %arg1: memref<1x64x3xf32, #tpu.memory_space<vmem>>, %arg2: memref<1x64x3xf32, #tpu.memory_space<vmem>>, %arg3: memref<1x1x128xf32, #tpu.memory_space<vmem>>, %arg4: memref<3x128xf32, #tpu.memory_space<vmem>>, %arg5: memref<128x512xbf16, #tpu.memory_space<vmem>>, %arg6: memref<1x512xf32, #tpu.memory_space<vmem>>, %arg7: memref<1x64x512xf32, #tpu.memory_space<vmem>>, %arg8: memref<1x64x512xf32, #tpu.memory_space<vmem>>, %arg9: memref<1x3x3xf32, #tpu.memory_space<vmem>>, %arg10: memref<1x1x3xf32, #tpu.memory_space<vmem>>, %arg11: memref<1x1x3xf32, #tpu.memory_space<vmem>>) attributes {dimension_semantics = [#tpu.dimension_semantics<parallel>], iteration_bounds = array<i64: 2>, scalar_prefetch = 0 : i64, scratch_operands = 0 : i64, tpu.core_type = #tpu.core_type<tc>, window_params = [{transform_indices = @transform_0, window_bounds = array<i64: 1, 64, 3>}, {transform_indices = @transform_1, window_bounds = array<i64: 1, 64, 3>}, {transform_indices = @transform_2, window_bounds = array<i64: 1, 1, 128>}, {pipeline_mode = #tpu.pipeline_mode<synchronous>, transform_indices = @transform_3, window_bounds = array<i64: 3, 128>}, {pipeline_mode = #tpu.pipeline_mode<synchronous>, transform_indices = @transform_4, window_bounds = array<i64: 128, 512>}, {pipeline_mode = #tpu.pipeline_mode<synchronous>, transform_indices = @transform_5, window_bounds = array<i64: 1, 512>}, {transform_indices = @transform_6, window_bounds = array<i64: 1, 64, 512>}, {transform_indices = @transform_7, window_bounds = array<i64: 1, 64, 512>}, {transform_indices = @transform_8, window_bounds = array<i64: 1, 3, 3>}, {transform_indices = @transform_9, window_bounds = array<i64: 1, 1, 3>}, {transform_indices = @transform_10, window_bounds = array<i64: 1, 1, 3>}]} {
    %c0 = arith.constant 0 : index
    %c0_0 = arith.constant 0 : index
    %c0_1 = arith.constant 0 : index
    %0 = vector.load %arg1[%c0, %c0_0, %c0_1] : memref<1x64x3xf32, #tpu.memory_space<vmem>>, vector<1x64x3xf32>
    %1 = vector.shape_cast %0 : vector<1x64x3xf32> to vector<64x3xf32>
    %c0_2 = arith.constant 0 : index
    %c0_3 = arith.constant 0 : index
    %c0_4 = arith.constant 0 : index
    %2 = vector.load %arg2[%c0_2, %c0_3, %c0_4] : memref<1x64x3xf32, #tpu.memory_space<vmem>>, vector<1x64x3xf32>
    %3 = vector.shape_cast %2 : vector<1x64x3xf32> to vector<64x3xf32>
    %c0_5 = arith.constant 0 : index
    %c0_6 = arith.constant 0 : index
    %c0_7 = arith.constant 0 : index
    %4 = vector.load %arg3[%c0_5, %c0_6, %c0_7] : memref<1x1x128xf32, #tpu.memory_space<vmem>>, vector<1x1x128xf32>
    %5 = vector.shape_cast %4 : vector<1x1x128xf32> to vector<1x128xf32>
    %c0_8 = arith.constant 0 : index
    %c0_9 = arith.constant 0 : index
    %6 = vector.load %arg4[%c0_8, %c0_9] : memref<3x128xf32, #tpu.memory_space<vmem>>, vector<3x128xf32>
    %cst = arith.constant dense<0.000000e+00> : vector<3xf32>
    %7 = vector.multi_reduction <add>, %1, %cst [0] : vector<64x3xf32> to vector<3xf32>
    %8 = vector.shape_cast %7 : vector<3xf32> to vector<1x3xf32>
    %cst_10 = arith.constant 6.400000e+01 : f32
    %9 = vector.broadcast %cst_10 : f32 to vector<1x3xf32>
    %10 = arith.divf %8, %9 : vector<1x3xf32>
    %11 = vector.broadcast %10 : vector<1x3xf32> to vector<64x3xf32>
    %12 = arith.subf %1, %11 : vector<64x3xf32>
    %13 = math.absf %12 : vector<64x3xf32>
    %14 = vector.shape_cast %13 : vector<64x3xf32> to vector<1x64x3xf32>
    %cst_11 = arith.constant dense<0xFF800000> : vector<1xf32>
    %15 = vector.multi_reduction <maximumf>, %14, %cst_11 [1, 2] : vector<1x64x3xf32> to vector<1xf32>
    %16 = vector.shape_cast %15 : vector<1xf32> to vector<1x1x1xf32>
    %17 = vector.extract %16[0, 0, 0] : f32 from vector<1x1x1xf32>
    %cst_12 = arith.constant 9.99999993E-9 : f32
    %18 = arith.addf %17, %cst_12 : f32
    %19 = vector.broadcast %18 : f32 to vector<64x3xf32>
    %20 = arith.divf %12, %19 : vector<64x3xf32>
    %cst_13 = arith.constant dense<0.000000e+00> : vector<3xf32>
    %21 = vector.multi_reduction <add>, %3, %cst_13 [0] : vector<64x3xf32> to vector<3xf32>
    %22 = vector.shape_cast %21 : vector<3xf32> to vector<1x3xf32>
    %cst_14 = arith.constant 6.400000e+01 : f32
    %23 = vector.broadcast %cst_14 : f32 to vector<1x3xf32>
    %24 = arith.divf %22, %23 : vector<1x3xf32>
    %25 = vector.broadcast %24 : vector<1x3xf32> to vector<64x3xf32>
    %26 = arith.subf %3, %25 : vector<64x3xf32>
    %27 = math.absf %26 : vector<64x3xf32>
    %28 = vector.shape_cast %27 : vector<64x3xf32> to vector<1x64x3xf32>
    %cst_15 = arith.constant dense<0xFF800000> : vector<1xf32>
    %29 = vector.multi_reduction <maximumf>, %28, %cst_15 [1, 2] : vector<1x64x3xf32> to vector<1xf32>
    %30 = vector.shape_cast %29 : vector<1xf32> to vector<1x1x1xf32>
    %31 = vector.extract %30[0, 0, 0] : f32 from vector<1x1x1xf32>
    %cst_16 = arith.constant 9.99999993E-9 : f32
    %32 = arith.addf %31, %cst_16 : f32
    %33 = vector.broadcast %32 : f32 to vector<64x3xf32>
    %34 = arith.divf %26, %33 : vector<64x3xf32>
    %35 = vector.extract_strided_slice %20 {offsets = [0, 0], sizes = [64, 1], strides = [1, 1]} : vector<64x3xf32> to vector<64x1xf32>
    %36 = vector.extract_strided_slice %6 {offsets = [0, 0], sizes = [1, 128], strides = [1, 1]} : vector<3x128xf32> to vector<1x128xf32>
    %37 = vector.broadcast %35 : vector<64x1xf32> to vector<64x128xf32>
    %38 = vector.broadcast %36 : vector<1x128xf32> to vector<64x128xf32>
    %39 = arith.mulf %37, %38 : vector<64x128xf32>
    %40 = vector.extract_strided_slice %20 {offsets = [0, 1], sizes = [64, 1], strides = [1, 1]} : vector<64x3xf32> to vector<64x1xf32>
    %41 = vector.extract_strided_slice %6 {offsets = [1, 0], sizes = [1, 128], strides = [1, 1]} : vector<3x128xf32> to vector<1x128xf32>
    %42 = vector.broadcast %40 : vector<64x1xf32> to vector<64x128xf32>
    %43 = vector.broadcast %41 : vector<1x128xf32> to vector<64x128xf32>
    %44 = arith.mulf %42, %43 : vector<64x128xf32>
    %45 = arith.addf %39, %44 : vector<64x128xf32>
    %46 = vector.extract_strided_slice %20 {offsets = [0, 2], sizes = [64, 1], strides = [1, 1]} : vector<64x3xf32> to vector<64x1xf32>
    %47 = vector.extract_strided_slice %6 {offsets = [2, 0], sizes = [1, 128], strides = [1, 1]} : vector<3x128xf32> to vector<1x128xf32>
    %48 = vector.broadcast %46 : vector<64x1xf32> to vector<64x128xf32>
    %49 = vector.broadcast %47 : vector<1x128xf32> to vector<64x128xf32>
    %50 = arith.mulf %48, %49 : vector<64x128xf32>
    %51 = arith.addf %45, %50 : vector<64x128xf32>
    %52 = vector.broadcast %5 : vector<1x128xf32> to vector<64x128xf32>
    %53 = arith.addf %51, %52 : vector<64x128xf32>
    %cst_17 = arith.constant 0.000000e+00 : f32
    %54 = vector.broadcast %cst_17 : f32 to vector<64x128xf32>
    %55 = arith.maximumf %53, %54 : vector<64x128xf32>
    %56 = vector.extract_strided_slice %34 {offsets = [0, 0], sizes = [64, 1], strides = [1, 1]} : vector<64x3xf32> to vector<64x1xf32>
    %57 = vector.extract_strided_slice %6 {offsets = [0, 0], sizes = [1, 128], strides = [1, 1]} : vector<3x128xf32> to vector<1x128xf32>
    %58 = vector.broadcast %56 : vector<64x1xf32> to vector<64x128xf32>
    %59 = vector.broadcast %57 : vector<1x128xf32> to vector<64x128xf32>
    %60 = arith.mulf %58, %59 : vector<64x128xf32>
    %61 = vector.extract_strided_slice %34 {offsets = [0, 1], sizes = [64, 1], strides = [1, 1]} : vector<64x3xf32> to vector<64x1xf32>
    %62 = vector.extract_strided_slice %6 {offsets = [1, 0], sizes = [1, 128], strides = [1, 1]} : vector<3x128xf32> to vector<1x128xf32>
    %63 = vector.broadcast %61 : vector<64x1xf32> to vector<64x128xf32>
    %64 = vector.broadcast %62 : vector<1x128xf32> to vector<64x128xf32>
    %65 = arith.mulf %63, %64 : vector<64x128xf32>
    %66 = arith.addf %60, %65 : vector<64x128xf32>
    %67 = vector.extract_strided_slice %34 {offsets = [0, 2], sizes = [64, 1], strides = [1, 1]} : vector<64x3xf32> to vector<64x1xf32>
    %68 = vector.extract_strided_slice %6 {offsets = [2, 0], sizes = [1, 128], strides = [1, 1]} : vector<3x128xf32> to vector<1x128xf32>
    %69 = vector.broadcast %67 : vector<64x1xf32> to vector<64x128xf32>
    %70 = vector.broadcast %68 : vector<1x128xf32> to vector<64x128xf32>
    %71 = arith.mulf %69, %70 : vector<64x128xf32>
    %72 = arith.addf %66, %71 : vector<64x128xf32>
    %73 = vector.broadcast %5 : vector<1x128xf32> to vector<64x128xf32>
    %74 = arith.addf %72, %73 : vector<64x128xf32>
    %cst_18 = arith.constant 0.000000e+00 : f32
    %75 = vector.broadcast %cst_18 : f32 to vector<64x128xf32>
    %76 = arith.maximumf %74, %75 : vector<64x128xf32>
    %77 = tpu.concatenate %55, %76 in 0 : vector<64x128xf32>, vector<64x128xf32> -> vector<128x128xf32>
    %78 = arith.truncf %77 : vector<128x128xf32> to vector<128x128xbf16>
    %c0_19 = arith.constant 0 : index
    %c0_20 = arith.constant 0 : index
    %79 = vector.load %arg5[%c0_19, %c0_20] : memref<128x512xbf16, #tpu.memory_space<vmem>>, vector<128x512xbf16>
    %cst_21 = arith.constant dense<0.000000e+00> : vector<128x512xf32>
    %80 = tpu.matmul %78, %79, %cst_21 {dimension_numbers = #tpu.dot_dimension_numbers<[1], [0], [0], [1], [0, 0, 1, 1], [], []>} : vector<128x128xbf16>, vector<128x512xbf16>, vector<128x512xf32> -> vector<128x512xf32>
    %c0_22 = arith.constant 0 : index
    %c0_23 = arith.constant 0 : index
    %81 = vector.load %arg6[%c0_22, %c0_23] : memref<1x512xf32, #tpu.memory_space<vmem>>, vector<1x512xf32>
    %82 = vector.broadcast %81 : vector<1x512xf32> to vector<128x512xf32>
    %83 = arith.addf %80, %82 : vector<128x512xf32>
    %84 = vector.extract_strided_slice %83 {offsets = [0, 0], sizes = [64, 512], strides = [1, 1]} : vector<128x512xf32> to vector<64x512xf32>
    %85 = vector.extract_strided_slice %83 {offsets = [64, 0], sizes = [64, 512], strides = [1, 1]} : vector<128x512xf32> to vector<64x512xf32>
    %c0_24 = arith.constant 0 : index
    %c0_25 = arith.constant 0 : index
    %c0_26 = arith.constant 0 : index
    %86 = vector.load %arg7[%c0_24, %c0_25, %c0_26] : memref<1x64x512xf32, #tpu.memory_space<vmem>>, vector<1x64x512xf32>
    %87 = vector.shape_cast %86 : vector<1x64x512xf32> to vector<64x512xf32>
    %88 = vector.shape_cast %84 : vector<64x512xf32> to vector<1x64x512xf32>
    tpu.vector_store %arg7[%c0_24, %c0_25, %c0_26], %88 {strides = array<i32>} : memref<1x64x512xf32, #tpu.memory_space<vmem>>, vector<1x64x512xf32>,
    %c0_27 = arith.constant 0 : index
    %c0_28 = arith.constant 0 : index
    %c0_29 = arith.constant 0 : index
    %89 = vector.load %arg8[%c0_27, %c0_28, %c0_29] : memref<1x64x512xf32, #tpu.memory_space<vmem>>, vector<1x64x512xf32>
    %90 = vector.shape_cast %89 : vector<1x64x512xf32> to vector<64x512xf32>
    %91 = vector.shape_cast %85 : vector<64x512xf32> to vector<1x64x512xf32>
    tpu.vector_store %arg8[%c0_27, %c0_28, %c0_29], %91 {strides = array<i32>} : memref<1x64x512xf32, #tpu.memory_space<vmem>>, vector<1x64x512xf32>,
    %92 = arith.truncf %84 : vector<64x512xf32> to vector<64x512xbf16>
    %93 = arith.truncf %85 : vector<64x512xf32> to vector<64x512xbf16>
    %cst_30 = arith.constant dense<0.000000e+00> : vector<64x64xf32>
    %94 = tpu.matmul %92, %93, %cst_30 {dimension_numbers = #tpu.dot_dimension_numbers<[1], [1], [0], [0], [0, 0, 1, 0], [], []>} : vector<64x512xbf16>, vector<64x512xbf16>, vector<64x64xf32> -> vector<64x64xf32>
    %cst_31 = arith.constant 0.0441941731 : f32
    %95 = vector.broadcast %cst_31 : f32 to vector<64x64xf32>
    %96 = arith.mulf %94, %95 : vector<64x64xf32>
    %cst_32 = arith.constant dense<0xFF800000> : vector<64xf32>
    %97 = vector.multi_reduction <maximumf>, %96, %cst_32 [1] : vector<64x64xf32> to vector<64xf32>
    %98 = vector.shape_cast %97 : vector<64xf32> to vector<64x1xf32>
    %99 = vector.broadcast %98 : vector<64x1xf32> to vector<64x64xf32>
    %100 = arith.subf %96, %99 : vector<64x64xf32>
    %101 = math.exp %100 : vector<64x64xf32>
    %cst_33 = arith.constant dense<0.000000e+00> : vector<64xf32>
    %102 = vector.multi_reduction <add>, %101, %cst_33 [1] : vector<64x64xf32> to vector<64xf32>
    %103 = vector.shape_cast %102 : vector<64xf32> to vector<64x1xf32>
    %104 = vector.broadcast %103 : vector<64x1xf32> to vector<64x64xf32>
    %105 = arith.divf %101, %104 : vector<64x64xf32>
    %cst_34 = arith.constant dense<0.000000e+00> : vector<64x3xf32>
    %106 = tpu.matmul %105, %3, %cst_34 {dimension_numbers = #tpu.dot_dimension_numbers<[1], [0], [0], [1], [0, 0, 1, 1], [], []>} : vector<64x64xf32>, vector<64x3xf32>, vector<64x3xf32> -> vector<64x3xf32>
    %cst_35 = arith.constant dense<0.000000e+00> : vector<3xf32>
    %107 = vector.multi_reduction <add>, %1, %cst_35 [0] : vector<64x3xf32> to vector<3xf32>
    %108 = vector.shape_cast %107 : vector<3xf32> to vector<1x3xf32>
    %cst_36 = arith.constant 6.400000e+01 : f32
    %109 = vector.broadcast %cst_36 : f32 to vector<1x3xf32>
    %110 = arith.divf %108, %109 : vector<1x3xf32>
    %cst_37 = arith.constant dense<0.000000e+00> : vector<3xf32>
    %111 = vector.multi_reduction <add>, %106, %cst_37 [0] : vector<64x3xf32> to vector<3xf32>
    %112 = vector.shape_cast %111 : vector<3xf32> to vector<1x3xf32>
    %cst_38 = arith.constant 6.400000e+01 : f32
    %113 = vector.broadcast %cst_38 : f32 to vector<1x3xf32>
    %114 = arith.divf %112, %113 : vector<1x3xf32>
    %115 = vector.broadcast %110 : vector<1x3xf32> to vector<64x3xf32>
    %116 = arith.subf %1, %115 : vector<64x3xf32>
    %117 = vector.broadcast %114 : vector<1x3xf32> to vector<64x3xf32>
    %118 = arith.subf %106, %117 : vector<64x3xf32>
    %cst_39 = arith.constant dense<0.000000e+00> : vector<3x3xf32>
    %119 = tpu.matmul %116, %118, %cst_39 {dimension_numbers = #tpu.dot_dimension_numbers<[0], [0], [1], [1], [0, 1, 1, 1], [], []>} : vector<64x3xf32>, vector<64x3xf32>, vector<3x3xf32> -> vector<3x3xf32>
    %c0_40 = arith.constant 0 : index
    %c0_41 = arith.constant 0 : index
    %c0_42 = arith.constant 0 : index
    %120 = vector.load %arg9[%c0_40, %c0_41, %c0_42] : memref<1x3x3xf32, #tpu.memory_space<vmem>>, vector<1x3x3xf32>
    %121 = vector.shape_cast %120 : vector<1x3x3xf32> to vector<3x3xf32>
    %122 = vector.shape_cast %119 : vector<3x3xf32> to vector<1x3x3xf32>
    tpu.vector_store %arg9[%c0_40, %c0_41, %c0_42], %122 {strides = array<i32>} : memref<1x3x3xf32, #tpu.memory_space<vmem>>, vector<1x3x3xf32>,
    %c0_43 = arith.constant 0 : index
    %c0_44 = arith.constant 0 : index
    %c0_45 = arith.constant 0 : index
    %123 = vector.load %arg10[%c0_43, %c0_44, %c0_45] : memref<1x1x3xf32, #tpu.memory_space<vmem>>, vector<1x1x3xf32>
    %124 = vector.shape_cast %123 : vector<1x1x3xf32> to vector<1x3xf32>
    %125 = vector.shape_cast %110 : vector<1x3xf32> to vector<1x1x3xf32>
    tpu.vector_store %arg10[%c0_43, %c0_44, %c0_45], %125 {strides = array<i32>} : memref<1x1x3xf32, #tpu.memory_space<vmem>>, vector<1x1x3xf32>,
    %c0_46 = arith.constant 0 : index
    %c0_47 = arith.constant 0 : index
    %c0_48 = arith.constant 0 : index
    %126 = vector.load %arg11[%c0_46, %c0_47, %c0_48] : memref<1x1x3xf32, #tpu.memory_space<vmem>>, vector<1x1x3xf32>
    %127 = vector.shape_cast %126 : vector<1x1x3xf32> to vector<1x3xf32>
    %128 = vector.shape_cast %114 : vector<1x3xf32> to vector<1x1x3xf32>
    tpu.vector_store %arg11[%c0_46, %c0_47, %c0_48], %128 {strides = array<i32>} : memref<1x1x3xf32, #tpu.memory_space<vmem>>, vector<1x1x3xf32>,
    return
  }
  func.func @transform_0(%arg0: i32) -> (i32, i32, i32) {
    %c0_i32 = arith.constant 0 : i32
    %c0_i32_0 = arith.constant 0 : i32
    %c0_i32_1 = arith.constant 0 : i32
    return %arg0, %c0_i32, %c0_i32_0 : i32, i32, i32
  }
  func.func @transform_1(%arg0: i32) -> (i32, i32, i32) {
    %c0_i32 = arith.constant 0 : i32
    %c0_i32_0 = arith.constant 0 : i32
    %c0_i32_1 = arith.constant 0 : i32
    return %arg0, %c0_i32, %c0_i32_0 : i32, i32, i32
  }
  func.func @transform_2(%arg0: i32) -> (i32, i32, i32) {
    %c0_i32 = arith.constant 0 : i32
    %c0_i32_0 = arith.constant 0 : i32
    %c0_i32_1 = arith.constant 0 : i32
    return %arg0, %c0_i32, %c0_i32_0 : i32, i32, i32
  }
  func.func @transform_3(%arg0: i32) -> (i32, i32) {
    %c0_i32 = arith.constant 0 : i32
    %c0_i32_0 = arith.constant 0 : i32
    %c0_i32_1 = arith.constant 0 : i32
    return %c0_i32, %c0_i32_0 : i32, i32
  }
  func.func @transform_4(%arg0: i32) -> (i32, i32) {
    %c0_i32 = arith.constant 0 : i32
    %c0_i32_0 = arith.constant 0 : i32
    %c0_i32_1 = arith.constant 0 : i32
    return %c0_i32, %c0_i32_0 : i32, i32
  }
  func.func @transform_5(%arg0: i32) -> (i32, i32) {
    %c0_i32 = arith.constant 0 : i32
    %c0_i32_0 = arith.constant 0 : i32
    %c0_i32_1 = arith.constant 0 : i32
    return %c0_i32, %c0_i32_0 : i32, i32
  }
  func.func @transform_6(%arg0: i32) -> (i32, i32, i32) {
    %c0_i32 = arith.constant 0 : i32
    %c0_i32_0 = arith.constant 0 : i32
    %c0_i32_1 = arith.constant 0 : i32
    return %arg0, %c0_i32, %c0_i32_0 : i32, i32, i32
  }
  func.func @transform_7(%arg0: i32) -> (i32, i32, i32) {
    %c0_i32 = arith.constant 0 : i32
    %c0_i32_0 = arith.constant 0 : i32
    %c0_i32_1 = arith.constant 0 : i32
    return %arg0, %c0_i32, %c0_i32_0 : i32, i32, i32
  }
  func.func @transform_8(%arg0: i32) -> (i32, i32, i32) {
    %c0_i32 = arith.constant 0 : i32
    %c0_i32_0 = arith.constant 0 : i32
    %c0_i32_1 = arith.constant 0 : i32
    return %arg0, %c0_i32, %c0_i32_0 : i32, i32, i32
  }
  func.func @transform_9(%arg0: i32) -> (i32, i32, i32) {
    %c0_i32 = arith.constant 0 : i32
    %c0_i32_0 = arith.constant 0 : i32
    %c0_i32_1 = arith.constant 0 : i32
    return %arg0, %c0_i32, %c0_i32_0 : i32, i32, i32
  }
  func.func @transform_10(%arg0: i32) -> (i32, i32, i32) {
    %c0_i32 = arith.constant 0 : i32
    %c0_i32_0 = arith.constant 0 : i32
    %c0_i32_1 = arith.constant 0 : i32
    return %arg0, %c0_i32, %c0_i32_0 : i32, i32, i32
  }
}

</mosaic_0001>

<bundles_post_ra>
// kernel: custom-call.57
= control target key start
LH: loop header
LB: loop body
LE: loop exit
PB: predicated region body
PF: predicated region fallthrough
CT: control target
= control target key end

     0   :  { %s645_s9 = smov 0   ;;  %s647_s10 = smov 0   ;;  %s795_s0 = inlined_call_operand.vmem [shape: f32[2,6,3], index: 0, kind: input, shape index: {}]   ;;  %s796_s1 = inlined_call_operand.vmem [shape: f32[2,6,3], index: 1, kind: output, shape index: {0}]   ;;  %s797_s2 = inlined_call_operand.vmem [shape: f32[2,3], index: 2, kind: output, shape index: {1}]  }
   0x1   :  { %s649_s11 = smov 0   ;;  %s651_s12 = smov 0  }
   0x2   :  { %s653_s13 = smov 0  }
   0x3 LB: > { %s28_s14 = sadd.s32 1, %s618_s12  ;;  %s500_s15 = sadd.s32 4294967295, %s622_s13   ;;  %s622_s13 = sphi %s653_s13, %s9_s13   ;;  %s618_s12 = sphi %s651_s12, %s804_s12   ;;  %s614_s11 = sphi %s649_s11, %s803_s11   ;;  %s610_s10 = sphi %s647_s10, %s802_s10   ;;  %s606_s9 = sphi %s645_s9, %s801_s9  }
   0x4   : > { %p30_p0 = scmp.ge.s32.totalorder %s28_s14, 2  ;;  %s33_s16 = ssub.s32 0, %s618_s12 }
   0x5   : > { %s502_s17 = smin.u32 %s618_s12, %s33_s16  ;;  %p57_p1 = scmp.ne.s32.totalorder %s610_s10, %s606_s9 }
   0x6   : > { %s806_s14 = smov (%p30_p0, %s28_s14), 0  ;;  %s35_s18 = sshrl.u32 %s502_s17, 3 }
   0x7   : > { %s39_s19 = ssub.s32 0, %s806_s14  ;;  %p58_p2 = scmp.eq.s32.totalorder %s500_s15, 1 }
   0x8   : > { %s503_s20 = smin.u32 %s39_s19, %s806_s14  ;;  %s47_s24 = sadd.s32 1, %s610_s10 }
   0x9   : > { %s41_s21 = sshrl.u32 %s503_s20, 3  ;;  %p680_p3 = por %p58_p2, %p57_p1 }
   0xa   : > { %s44_s23 = ssub.s32 %s35_s18, %s41_s21  ;;  %p505_p5 = scmp.ge.s32.totalorder %s622_s13, 2 }
   0xb   : > { %p45_p4 = scmp.eq.s32.totalorder %s44_s23, 0  ;;  %s82_s26 = sand.u32 (!%p505_p5), 1, %s622_s13  }
   0xc   : > { %80 = sbr.rel (%p505_p5) target bundleno = 19 (0x13), region = 16  ;;  %s507_s27 = sshll.u32 (!%p505_p5), %s618_s12, 3 }
   0xd   : > { %s686_s25 = scalar_select %p45_p4, %s610_s10, %s47_s24  }
   0xe   : > { %s506_s28 = sshll.u32 (!%p505_p5), %s82_s26, 3  ;;  %s88_s3 = scalar_lea.vmem (!%p505_p5), %s795_s0, %s507_s27 }
   0xf   : > { %v116_v0 = vld [vmem:[%s88_s3] sm:$0xff] (!%p505_p5)  ;;  %s84_s4 = scalar_lea.vmem (!%p505_p5), [#allocation0], %s506_s28 }
  0x10   : > { %117 = vst [vmem:[%s84_s4] sm:$0xff] (!%p505_p5), %v116_v0 }
  0x13 PF: > { %p508_p6 = scmp.ge.s32.totalorder %s622_s13, 1  ;;  %p122_p7 = scmp.lt.s32.totalorder %s622_s13, 3 }
  0x15   : > { %p123_p8 = pnand %p508_p6, %p122_p7 }
  0x17   : > { %126 = sbr.rel (%p123_p8) target bundleno = 330 (0x14a), region = 54 }
  0x1e   : > { %s129_s5 = sand.u32 1, %s500_s15   ;;  %s143_s6 = sand.u32 1, %s606_s9   ;;  %v628_v2 = vmov 0.0  }
  0x1f   : > { %s509_s7 = sshll.u32 %s129_s5, 3  ;;  %s697_s8 = sshll.u32 %s143_s6, 1 }
  0x20   : > { %s152_s16 = sand.u32 7, %s614_s11   ;;  %s131_s17 = scalar_lea.vmem [#allocation0], %s509_s7 }
  0x21   : > { %v154_v1 = vld [vmem:[%s131_s17] sm:$0xff]  ;;  %s700_s18 = scalar_lea.vmem [#allocation1], %s509_s7  ;;  %s703_s19 = scalar_lea.vmem [#allocation2], %s152_s16 }
  0x22   : > { %155 = vst [vmem:[%s700_s18] sm:$0xff] %v154_v1  ;;  %156 = vst [vmem:[%s703_s19] sm:$0x1] %v628_v2  ;;  %s145_s15 = scalar_lea.vmem [#allocation3], %s697_s8  ;;  %s707_s20 = smov 0  }
  0x23 LB: >> { %v164_v3 = vlaneseq  ;;  %v716_v5 = vstv %s626_s20  ;;  %s191_s9 = scalar_lea.vmem %s700_s18, %s626_s20 [#allocation1]  ;;  %s249_s21 = scalar_lea.vmem [#allocation4], %s626_s20  ;;  %v629_v59 = vmov 1.0   ;;  %s626_s20 = sphi %s707_s20, %s162_s20  }
  0x24   : >> { %s266_s23 = smov [#allocation4] }
  0x25   : >> { %v713_v4 = vshrl.u32 %v164_v3, 7  ;;  %v243_v48 = vand.u32 127, %v164_v3 }
  0x27   : >> { %vm168_vm0 = vcmp.gt.s32.totalorder %v713_v4, %v716_v5  ;;  %vm169_vm1 = vcmp.lt.s32.totalorder %v713_v4, 6  ;;  %v230_v4 = vmov %v713_v4  ;;  %vm734_vm12 = vcmp.eq.s32.totalorder %v243_v48, %v716_v5 }
  0x28   : >> { %vm170_vm2 = vmand %vm168_vm0, %vm169_vm1  ;;  %vm234_vm9 = vcmp.gt.s32.totalorder %v230_v4, %v716_v5  ;;  %vm235_vm10 = vcmp.lt.s32.totalorder %v230_v4, 6  ;;  %v269_v4 = vmov %v713_v4  ;;  %vm295_vm15 = vcmp.gt.s32.totalorder %v243_v48, %v716_v5 }
  0x29   : >> { %v163_v6 = vld [vmem:[%s700_s18] sm:$0xff]  ;;  %v192_v15 = vld [vmem:[%s191_s9] ss:$0 sm:$0xff]  ;;  %s227_s18 = smov %s700_s18  ;;  %vm236_vm11 = vmand %vm234_vm9, %vm235_vm10  ;;  %vm274_vm13 = vcmp.lt.s32.totalorder %v269_v4, 6  ;;  %v286_v4 = vmov %v713_v4 }
  0x2a   : >> { %v171_v7 = vsel %vm170_vm2, %v163_v6, 0.0  ;;  %v193_v16 = vand.u32 2147483647, %v192_v15  ;;  %vm218_vm8 = vcmp.lt.f32.partialorder %v192_v15, 0.0  ;;  %v231_v45 = vld [vmem:[%s227_s18] sm:$0xff]  ;;  %s265_s18 = smov %s700_s18  ;;  %vm303_vm14 = vcmp.ge.s32.totalorder %v286_v4, %v716_v5 }
  0x2b   : >> { %v172_v8 = vmul.f32 %v171_v7, %v171_v7  ;;  %v237_v49 = vsel %vm236_vm11, %v231_v45, 0.0  ;;  %v262_v60 = vld [vmem:[%s703_s19] ss:$0 sm:$0xff]  ;;  %vm304_vm0 = vmand %vm734_vm12, %vm303_vm14 }
  0x2c   : >> { %v194_v21 = vmax.f32 %v193_v16, 0.0  ;;  %v272_v63 = vld [vmem:[%s265_s18] sm:$0xff]  ;;  %s282_s18 = smov %s265_s18 }
  0x2d   : >> { %v173_v9 = vrot.slane %v172_v8, 4  ;;  %s307_s24 = scalar_lea.vmem %s282_s18, %s626_s20  ;;  %s162_s20 = sadd.s32 1, %s626_s20  }
  0x2e   : >> { %p159_p9 = scmp.ge.s32.totalorder %s162_s20, 3  }
  0x2f   : >> { %v174_v10 = vadd.f32 %v173_v9, %v172_v8  ;;  %s515_s26 = sshll.u32 (%p159_p9), %s614_s11, 3 }
  0x30   : > { %s332_s29 = scalar_lea.vmem (%p159_p9), %s796_s1, %s515_s26 }
  0x31   : >> { %v175_v11 = vrot.slane %v174_v10, 2 }
  0x33   : >> { %v176_v12 = vadd.f32 %v175_v11, %v174_v10 }
  0x35   : >> { %v177_v13 = vrot.slane %v176_v12, 1 }
  0x37   : >> { %v178_v14 = vadd.f32 %v177_v13, %v176_v12  ;;  %v293_v13 = vld [vmem:[%s282_s18] sm:$0xff] }
  0x39   : >> { %570 = vrsqrt.f32 %v178_v14  ;;  %vm181_vm3 = vcmp.eq.f32.partialorder %v178_v14, inf  ;;  %v184_v18 = vand.u32 2147483648, %v178_v14  ;;  %vm183_vm4 = vcmp.eq.f32.partialorder %v178_v14, 0.0 }
  0x43   : >> { %v571_v17 = vpop.eup %570 }
  0x44   : >> { %v180_v19 = vmul.f32 %v571_v17, %v178_v14 }
  0x46   : >> { %v182_v20 = vsel %vm181_vm3, %v178_v14, %v180_v19 }
  0x47   : >> { %v185_v22 = vsel %vm183_vm4, %v184_v18, %v182_v20 }
  0x48   : >> { %v195_v23 = vand.u32 2147483647, %v185_v22 }
  0x4a   : >> { %v196_v24 = vmax.f32 %v194_v21, %v195_v23 }
  0x4c   : >> { %572 = vrcp.f32 %v196_v24  ;;  %vm208_vm7 = vcmp.eq.f32.partialorder %v196_v24, 0.0 }
  0x56   : >> { %v573_v25 = vpop.eup %572 }
  0x57   : >> { %v198_v26 = vmul.f32 %v573_v25, %v193_v16  ;;  %v201_v27 = vmul.f32 0.0, %v573_v25  ;;  %v205_v28 = vmul.f32 %v573_v25, %v195_v23 }
  0x59   : >> { %v199_v29 = vmul.f32 %v198_v26, %v198_v26  ;;  %v202_v30 = vmul.f32 %v201_v27, %v201_v27  ;;  %v206_v31 = vmul.f32 %v205_v28, %v205_v28 }
  0x5b   : >> { %v203_v32 = vadd.f32 %v202_v30, %v199_v29 }
  0x5d   : >> { %v207_v33 = vadd.f32 %v206_v31, %v203_v32 }
  0x5f   : >> { %574 = vrsqrt.f32 %v207_v33  ;;  %vm211_vm5 = vcmp.eq.f32.partialorder %v207_v33, inf  ;;  %v214_v35 = vand.u32 2147483648, %v207_v33  ;;  %vm213_vm6 = vcmp.eq.f32.partialorder %v207_v33, 0.0 }
  0x69   : >> { %v575_v34 = vpop.eup %574 }
  0x6a   : >> { %v210_v36 = vmul.f32 %v575_v34, %v207_v33 }
  0x6c   : >> { %v212_v37 = vsel %vm211_vm5, %v207_v33, %v210_v36 }
  0x6d   : >> { %v215_v38 = vsel %vm213_vm6, %v214_v35, %v212_v37 }
  0x6e   : >> { %v216_v39 = vmul.f32 %v215_v38, %v196_v24 }
  0x70   : >> { %v217_v40 = vsel %vm208_vm7, 0.0, %v216_v39 }
  0x71   : >> { %v219_v41 = vxor.u32 2147483648, %v217_v40 }
  0x73   : >> { %v220_v42 = vsel %vm218_vm8, %v217_v40, %v219_v41 }
  0x74   : >> { %v726_v43 = vsel %vm183_vm4, %v192_v15, %v220_v42  ;;  %576 = vrcp.f32 %v220_v42  ;;  %v221_v46 = vsub.f32 %v220_v42, %v192_v15 }
  0x75   : >> { %v226_v44 = vsub.f32 %v192_v15, %v726_v43 }
  0x77   : >> { %578 = vrcp.f32 %v226_v44 }
  0x7e   : >> { %v577_v47 = vpop.eup %576 }
  0x7f   : >> { %v223_v50 = vmul.f32 %v577_v47, %v221_v46 }
  0x81   : >> { %v579_v51 = vpop.eup %578  ;;  %v225_v55 = vsel %vm183_vm4, 0.0, %v223_v50 }
  0x82   : >> { %v239_v52 = vmul.f32 %v579_v51, %v237_v49  ;;  %v255_v57 = vsel %vm734_vm12, %v225_v55, 0.0 }
  0x84   : >> { %v240_v54 = vsel %vm183_vm4, 0.0, %v239_v52 }
  0x85   : >> { %v245_v56 = vsel %vm734_vm12, %v240_v54, 0.0 }
  0x86   : >> { %246 = vadd.xlane.f32.xlu0 %v245_v56 }
  0x8a   : >> { %256 = vadd.xlane.f32.xlu0 %v255_v57 }
 0x113   : >> { %v247_v58 = vpop.xlane.xlu0 %246 }
 0x114   : >> { %248 = vst [vmem:[#allocation4] sm:$0xff] %v247_v58 }
 0x115   : >> { %250 = vst [vmem:[%s249_s21] sm:$0x1] %v629_v59 }
 0x117   : >> { %v257_v61 = vpop.xlane.xlu0 %256 }
 0x118   : >> { %v263_v62 = vsel %vm734_vm12, %v257_v61, %v262_v60 }
 0x119   : >> { %264 = vst [vmem:[%s703_s19] sm:$0x1] %v263_v62 }
 0x11c   : >> { %v271_v0 = vld [vmem:[%s266_s23] sm:$0xff]  ;;  %s283_s23 = smov %s266_s23 }
 0x11d   : >> { %v273_v1 = vmul.f32 %v272_v63, %v271_v0  ;;  %v291_v12 = vld [vmem:[%s283_s23] sm:$0xff] }
 0x11f   : >> { %v275_v2 = vsel %vm274_vm13, %v273_v1, 0.0 }
 0x120   : >> { %v276_v3 = vrot.slane %v275_v2, 4  ;;  %v318_v4 = vld [vmem:[#allocation2] sm:$0x3] (%p159_p9) }
 0x121   : > { %320 = vst [vmem:[%s145_s15] sm:$0x3] (%p159_p9), %v318_v4 }
 0x122   : >> { %v277_v6 = vadd.f32 %v276_v3, %v275_v2 }
 0x124   : >> { %v278_v7 = vrot.slane %v277_v6, 2 }
 0x126   : >> { %v279_v8 = vadd.f32 %v278_v7, %v277_v6 }
 0x128   : >> { %v280_v9 = vrot.slane %v279_v8, 1 }
 0x12a   : >> { %v281_v10 = vadd.f32 %v280_v9, %v279_v8 }
 0x12c   : >> { %v287_v11 = vmul.f32 %v281_v10, %v257_v61 }
 0x12e   : >> { %v292_v14 = vmul.f32 %v291_v12, %v287_v11 }
 0x130   : >> { %v296_v15 = vsub.f32 %v293_v13, %v292_v14 }
 0x132   : >> { %v297_v16 = vsel %vm295_vm15, %v296_v15, %v293_v13 }
 0x133   : >> { %v305_v17 = vsel %vm304_vm0, %v291_v12, %v297_v16 }
 0x134   : >> { %306 = vst [vmem:[%s282_s18] sm:$0xff] %v305_v17 }
 0x137   : > { %161 = sbr.rel (!%p159_p9) target bundleno = 35 (0x23), region = 175 }
 0x13b   : >> { %v308_v18 = vld [vmem:[%s307_s24] ss:$0 sm:$0xff] }
 0x13c   : >> { %v313_v19 = vsel %vm734_vm12, %v726_v43, %v308_v18 }
 0x13d   : >> { %314 = vst [vmem:[%s307_s24] sm:$0x1] %v313_v19 }
 0x13e   : > { %p368_p10 = scmp.lt.s32.totalorder (%p680_p3), %s614_s11, 0  ;;  %s369_s30 = ssub.s32 (%p680_p3), 0, %s614_s11  ;;  %v391_v20 = vld [vmem:[%s145_s15] sm:$0x3] (%p680_p3) }
 0x13f   : > { %367 = sbr.rel (!%p680_p3) target bundleno = 330 (0x14a), region = 99  ;;  %s516_s3 = smin.u32 (%p680_p3), %s614_s11, %s369_s30 }
 0x140   : > { %s371_s4 = sshrl.u32 (%p680_p3), %s516_s3, 3 }
 0x141   : > { %s372_s5 = ssub.s32 (%p680_p3), 0, %s371_s4 }
 0x144   : > { %v360_v5 = vld [vmem:[%s700_s18] sm:$0xff] }
 0x145   : > { %361 = vst [vmem:[%s332_s29] sm:$0xff] %v360_v5 }
 0x146   : > { %s808_s5 = smov (!%p368_p10, %s372_s5), %s371_s4 }
 0x147   : > { %s517_s6 = sshll.u32 %s808_s5, 1 }
 0x148   : > { %s375_s17 = scalar_lea.vmem %s797_s2, %s517_s6 }
 0x149   : > { %392 = vst [vmem:[%s375_s17] sm:$0x3] %v391_v20 }
 0x14a PF: > { %s9_s13 = sadd.s32 1, %s622_s13   ;;  %s801_s9 = smov %s610_s10 }
 0x14b   : > { %p6_p11 = scmp.ge.s32.totalorder %s9_s13, 4   ;;  %s802_s10 = smov %s686_s25 }
 0x14c   : > { %s803_s11 = smov %s618_s12  ;;  %s804_s12 = smov %s806_s14 }
 0x14d   :  { %8 = sbr.rel (!%p6_p11) target bundleno = 3 (0x3), region = 186 }

// kernel: custom-call.58
= control target key start
LH: loop header
LB: loop body
LE: loop exit
PB: predicated region body
PF: predicated region fallthrough
CT: control target
= control target key end

     0   :  { %s236_s6 = smov 0   ;;  %s263_s0 = inlined_call_operand.vmem [shape: f32[2,3,3], index: 0, kind: input, shape index: {}]   ;;  %s264_s1 = inlined_call_operand.vmem [shape: f32[2,3,3], index: 1, kind: output, shape index: {}]  }
   0x1 LB: > { %s198_s7 = sadd.s32 4294967295, %s224_s6   ;;  %p200_p0 = scmp.ge.s32.totalorder %s224_s6, 2  ;;  %s224_s6 = sphi %s236_s6, %s7_s6  }
   0x2   : > { %s23_s8 = sand.u32 (!%p200_p0), 1, %s224_s6   ;;  %s202_s9 = sshll.u32 (!%p200_p0), %s224_s6, 2 }
   0x3   : > { %21 = sbr.rel (%p200_p0) target bundleno = 10 (0xa), region = 16  ;;  %s201_s10 = sshll.u32 (!%p200_p0), %s23_s8, 2 }
   0x4   : > { %s27_s13 = scalar_lea.vmem (!%p200_p0), %s263_s0, %s202_s9  ;;  %s25_s14 = scalar_lea.vmem (!%p200_p0), [#allocation1], %s201_s10 }
   0x5   : > { %v43_v0 = vld [vmem:[%s27_s13] sm:$0xf] (!%p200_p0) }
   0x6   : > { %44 = vst [vmem:[%s25_s14] sm:$0xf] (!%p200_p0), %v43_v0 }
   0xa PF: > { %p203_p1 = scmp.ge.s32.totalorder %s224_s6, 1  ;;  %p60_p2 = scmp.lt.s32.totalorder %s224_s6, 3 }
   0xc   : > { %p61_p3 = pnand %p203_p1, %p60_p2 }
   0xd   : > { %s252_s15 = sand.u32 (!%p61_p3), 1, %s198_s7   ;;  %v82_v1 = vlaneseq (!%p61_p3)  ;;  %vm96_vm1 = vcmask (!%p61_p3), 23552   ;;  %s207_s19 = sshll.u32 (!%p61_p3), %s198_s7, 2 }
   0xe   : > { %64 = sbr.rel (%p61_p3) target bundleno = 334 (0x14e), region = 50  ;;  %s204_s16 = sshll.u32 (!%p61_p3), %s252_s15, 2 }
   0xf   : > { %s73_s17 = scalar_lea.vmem (!%p61_p3), [#allocation1], %s204_s16  ;;  %v83_v3 = vand.u32 (!%p61_p3), 127, %v82_v1  ;;  %v85_v4 = vshrl.u32 (!%p61_p3), %v82_v1, 7  ;;  %s77_s18 = scalar_lea.vmem (!%p61_p3), [#allocation3], %s204_s16 }
  0x10   : > { %v80_v2 = vld [vmem:[%s73_s17] sm:$0xf] (!%p61_p3)  ;;  %s128_s22 = scalar_lea.vmem (!%p61_p3), %s264_s1, %s207_s19 }
  0x11   : > { %81 = vst [vmem:[#allocation0] sm:$0xf] (!%p61_p3), %v80_v2  ;;  %vm91_vm0 = vcmp.eq.s32.totalorder (!%p61_p3), %v83_v3, 0  ;;  %vm87_vm2 = vcmp.eq.s32.totalorder (!%p61_p3), %v83_v3, %v85_v4  ;;  %vm100_vm3 = vcmp.eq.s32.totalorder (!%p61_p3), %v83_v3, 1  ;;  %vm111_vm4 = vcmp.eq.s32.totalorder (!%p61_p3), %v83_v3, 2 }
  0x18   : > { %v88_v5 = vld [vmem:[#allocation0] sm:$0xff] }
  0x19   : > { %v95_v6 = vld [vmem:[#allocation0 + $0x1] ss:$0 sm:$0xff]  ;;  %v92_v7 = vsel %vm91_vm0, %v88_v5, 1.0  ;;  %v106_v11 = vld [vmem:[#allocation0 + $0x2] ss:$0 sm:$0xff] }
  0x1a   : > { %v97_v8 = vsel %vm96_vm1, %v95_v6, 0.0  ;;  %v93_v9 = vsel %vm87_vm2, %v92_v7, 0.0  ;;  %v108_v12 = vsel %vm96_vm1, %v106_v11, 0.0 }
  0x1b   : > { %v101_v10 = vmul.f32 %v97_v8, %v93_v9 }
  0x1d   : > { %102 = vadd.xlane.f32.xlu0 %v101_v10 }
  0xaa   : > { %v103_v13 = vpop.xlane.xlu0 %102 }
  0xab   : > { %v104_v14 = vsel %vm100_vm3, %v103_v13, %v93_v9 }
  0xac   : > { %v112_v15 = vmul.f32 %v108_v12, %v104_v14 }
  0xae   : > { %113 = vadd.xlane.f32.xlu0 %v112_v15 }
 0x13b   : > { %v114_v16 = vpop.xlane.xlu0 %113 }
 0x13c   : > { %v115_v17 = vsel %vm111_vm4, %v114_v16, %v104_v14 }
 0x13d   : > { %116 = vst [vmem:[#allocation2] sm:$0xff] %v115_v17 }
 0x144   : > { %v120_v18 = vld [vmem:[#allocation2] sm:$0xf] }
 0x145   : > { %122 = vst [vmem:[%s77_s18] sm:$0xf] %v120_v18 }
 0x14c   : > { %v144_v19 = vld [vmem:[%s77_s18] sm:$0xf] }
 0x14d   : > { %145 = vst [vmem:[%s128_s22] sm:$0xf] %v144_v19 }
 0x14e PF: > { %s7_s6 = sadd.s32 1, %s224_s6  }
 0x14f   : > { %p4_p4 = scmp.ge.s32.totalorder %s7_s6, 4  }
 0x151   :  { %6 = sbr.rel (!%p4_p4) target bundleno = 1 (0x1), region = 112 }

// kernel: custom-call.50
= control target key start
LH: loop header
LB: loop body
LE: loop exit
PB: predicated region body
PF: predicated region fallthrough
CT: control target
= control target key end

     0   :  { %s6_s0 = inlined_call_operand.hbm [shape: pred[2], index: 0, kind: output, shape index: {}]  }

// kernel: custom-call.55
= control target key start
LH: loop header
LB: loop body
LE: loop exit
PB: predicated region body
PF: predicated region fallthrough
CT: control target
= control target key end

     0   :  { %s343_s6 = smov 0   ;;  %s345_s7 = smov 0   ;;  %s390_s0 = inlined_call_operand.vmem [shape: f32[2,3,3], index: 0, kind: input, shape index: {}]   ;;  %s391_s1 = inlined_call_operand.vmem [shape: f32[2,3,3], index: 1, kind: output, shape index: {}]  }
   0x1   :  { %s347_s8 = smov 0  }
   0x2 LB: > { %s265_s9 = sadd.s32 4294967295, %s330_s8   ;;  %s26_s10 = sadd.s32 1, %s326_s7  ;;  %s330_s8 = sphi %s347_s8, %s7_s8   ;;  %s326_s7 = sphi %s345_s7, %s393_s7   ;;  %s322_s6 = sphi %s343_s6, %s392_s6  }
   0x3   : > { %p28_p0 = scmp.ge.s32.totalorder %s26_s10, 2  ;;  %p267_p1 = scmp.ge.s32.totalorder %s330_s8, 2 }
   0x4   : > { %s42_s11 = sand.u32 (!%p267_p1), 1, %s330_s8   ;;  %s269_s12 = sshll.u32 (!%p267_p1), %s326_s7, 2 }
   0x5   : > { %s395_s10 = smov (%p28_p0, %s26_s10), 0  ;;  %40 = sbr.rel (%p267_p1) target bundleno = 12 (0xc), region = 16 }
   0x6   : > { %s268_s13 = sshll.u32 (!%p267_p1), %s42_s11, 2  ;;  %s48_s16 = scalar_lea.vmem (!%p267_p1), %s390_s0, %s269_s12 }
   0x7   : > { %v64_v0 = vld [vmem:[%s48_s16] sm:$0xf] (!%p267_p1)  ;;  %s44_s17 = scalar_lea.vmem (!%p267_p1), [#allocation1], %s268_s13 }
   0x8   : > { %65 = vst [vmem:[%s44_s17] sm:$0xf] (!%p267_p1), %v64_v0 }
   0xc PF: > { %p270_p2 = scmp.ge.s32.totalorder %s330_s8, 1  ;;  %p81_p3 = scmp.lt.s32.totalorder %s330_s8, 3 }
   0xe   : > { %p82_p4 = pnand %p270_p2, %p81_p3 }
   0xf   : > { %v332_v1 = vmov (!%p82_p4), 0.0   ;;  %s370_s18 = sand.u32 (!%p82_p4), 1, %s265_s9   ;;  %vm104_vm0 = vcmask (!%p82_p4), 7168   ;;  %vm122_vm1 = vcmask (!%p82_p4), 15368   ;;  %vm139_vm2 = vcmask (!%p82_p4), 1047553   ;;  %s274_s22 = sshll.u32 (!%p82_p4), %s322_s6, 2 }
  0x10   : > { %85 = sbr.rel (%p82_p4) target bundleno = 541 (0x21d), region = 50  ;;  %103 = vst [vmem:[#allocation2] sm:$0xff] (!%p82_p4), %v332_v1  ;;  %s271_s19 = sshll.u32 (!%p82_p4), %s370_s18, 2  ;;  %vm140_vm3 = vmand (!%p82_p4), %vm122_vm1, %vm139_vm2  ;;  %vm144_vm4 = vcmask (!%p82_p4), 23568   ;;  %vm161_vm5 = vcmask (!%p82_p4), 1047554  }
  0x11   : > { %s94_s20 = scalar_lea.vmem (!%p82_p4), [#allocation1], %s271_s19  ;;  %vm162_vm6 = vmand (!%p82_p4), %vm144_vm4, %vm161_vm5  ;;  %s98_s21 = scalar_lea.vmem (!%p82_p4), [#allocation3], %s271_s19 }
  0x12   : > { %v101_v5 = vld [vmem:[%s94_s20] sm:$0xf] (!%p82_p4)  ;;  %s179_s25 = scalar_lea.vmem (!%p82_p4), %s391_s1, %s274_s22 }
  0x13   : > { %102 = vst [vmem:[#allocation0] sm:$0xf] (!%p82_p4), %v101_v5 }
  0x17   : > { %v105_v2 = vld [vmem:[#allocation2] ss:$0 sm:$0xff] }
  0x18   : > { %v107_v3 = vmul.f32 %v105_v2, %v105_v2  ;;  %v114_v4 = vmul.f32 0.0, %v105_v2 }
  0x1a   : > { %108 = vadd.xlane.f32.xlu0 %v107_v3  ;;  %v106_v6 = vld [vmem:[#allocation0] ss:$0 sm:$0xff]  ;;  %v126_v18 = vld [vmem:[#allocation0 + $0x1] ss:$0 sm:$0xff]  ;;  %v148_v30 = vld [vmem:[#allocation0 + $0x2] ss:$0 sm:$0xff] }
  0x1b   : > { %v112_v10 = vld [vmem:[#allocation0] sm:$0xff] }
  0x1e   : > { %115 = vadd.xlane.f32.xlu0 %v114_v4 }
  0xa7   : > { %v109_v7 = vpop.xlane.xlu0 %108 }
  0xa8   : > { %v110_v8 = vsub.f32 %v106_v6, %v109_v7 }
  0xaa   : > { %302 = vrsqrt.f32 %v110_v8 }
  0xab   : > { %v116_v9 = vpop.xlane.xlu0 %115 }
  0xac   : > { %v117_v11 = vsub.f32 %v112_v10, %v116_v9 }
  0xb4   : > { %v303_v12 = vpop.eup %302 }
  0xb5   : > { %v118_v13 = vmul.f32 %v303_v12, %v117_v11 }
  0xb7   : > { %v119_v14 = vsel %vm104_vm0, %v118_v13, 0.0 }
  0xb8   : > { %121 = vst [vmem:[#allocation2] sm:$0xff] %v119_v14 }
  0xbf   : > { %v124_v15 = vld [vmem:[#allocation2 + $0x1] ss:$0 sm:$0xff] }
  0xc0   : > { %v127_v16 = vmul.f32 %v124_v15, %v124_v15  ;;  %v134_v17 = vmul.f32 %v124_v15, %v119_v14 }
  0xc2   : > { %128 = vadd.xlane.f32.xlu1 %v127_v16 }
  0xc6   : > { %135 = vadd.xlane.f32.xlu1 %v134_v17 }
 0x14f   : > { %v129_v19 = vpop.xlane.xlu1 %128 }
 0x150   : > { %v130_v20 = vsub.f32 %v126_v18, %v129_v19 }
 0x152   : > { %304 = vrsqrt.f32 %v130_v20 }
 0x153   : > { %v136_v21 = vpop.xlane.xlu1 %135 }
 0x154   : > { %v137_v22 = vsub.f32 %v112_v10, %v136_v21 }
 0x15c   : > { %v305_v23 = vpop.eup %304 }
 0x15d   : > { %v138_v24 = vmul.f32 %v305_v23, %v137_v22 }
 0x15f   : > { %v141_v25 = vsel %vm140_vm3, %v138_v24, 0.0 }
 0x160   : > { %v142_v26 = vadd.f32 %v141_v25, %v119_v14 }
 0x162   : > { %143 = vst [vmem:[#allocation2] sm:$0xff] %v142_v26 }
 0x169   : > { %v146_v27 = vld [vmem:[#allocation2 + $0x2] ss:$0 sm:$0xff] }
 0x16a   : > { %v156_v28 = vmul.f32 %v146_v27, %v142_v26  ;;  %v149_v29 = vmul.f32 %v146_v27, %v146_v27 }
 0x16c   : > { %157 = vadd.xlane.f32.xlu1 %v156_v28  ;;  %150 = vadd.xlane.f32.xlu0 %v149_v29 }
 0x1f9   : > { %v151_v31 = vpop.xlane.xlu0 %150  ;;  %v158_v33 = vpop.xlane.xlu1 %157 }
 0x1fa   : > { %v152_v32 = vsub.f32 %v148_v30, %v151_v31  ;;  %v159_v34 = vsub.f32 %v112_v10, %v158_v33 }
 0x1fc   : > { %306 = vrsqrt.f32 %v152_v32 }
 0x206   : > { %v307_v35 = vpop.eup %306 }
 0x207   : > { %v160_v36 = vmul.f32 %v307_v35, %v159_v34 }
 0x209   : > { %v163_v37 = vsel %vm162_vm6, %v160_v36, 0.0 }
 0x20a   : > { %v164_v38 = vadd.f32 %v163_v37, %v142_v26 }
 0x20c   : > { %165 = vst [vmem:[#allocation2] sm:$0xff] %v164_v38 }
 0x213   : > { %v169_v39 = vld [vmem:[#allocation2] sm:$0xf] }
 0x214   : > { %171 = vst [vmem:[%s98_s21] sm:$0xf] %v169_v39 }
 0x21b   : > { %v195_v40 = vld [vmem:[%s98_s21] sm:$0xf] }
 0x21c   : > { %196 = vst [vmem:[%s179_s25] sm:$0xf] %v195_v40 }
 0x21d PF: > { %s7_s8 = sadd.s32 1, %s330_s8   ;;  %s392_s6 = smov %s326_s7 }
 0x21e   : > { %p4_p5 = scmp.ge.s32.totalorder %s7_s8, 4   ;;  %s393_s7 = smov %s395_s10 }
 0x220   :  { %6 = sbr.rel (!%p4_p5) target bundleno = 2 (0x2), region = 114 }

// kernel: custom-call.56
= control target key start
LH: loop header
LB: loop body
LE: loop exit
PB: predicated region body
PF: predicated region fallthrough
CT: control target
= control target key end

     0   :  { %s343_s6 = smov 0   ;;  %s345_s7 = smov 0   ;;  %s390_s0 = inlined_call_operand.vmem [shape: f32[2,1,3,3], index: 0, kind: input, shape index: {}]   ;;  %s391_s1 = inlined_call_operand.vmem [shape: f32[2,1,3,3], index: 1, kind: output, shape index: {}]  }
   0x1   :  { %s347_s8 = smov 0  }
   0x2 LB: > { %s269_s9 = sadd.s32 4294967295, %s330_s8   ;;  %s33_s10 = sadd.s32 1, %s326_s7  ;;  %s330_s8 = sphi %s347_s8, %s7_s8   ;;  %s326_s7 = sphi %s345_s7, %s393_s7   ;;  %s322_s6 = sphi %s343_s6, %s392_s6  }
   0x3   : > { %p35_p0 = scmp.ge.s32.totalorder %s33_s10, 2  ;;  %p271_p1 = scmp.ge.s32.totalorder %s330_s8, 2 }
   0x4   : > { %s49_s11 = sand.u32 (!%p271_p1), 1, %s330_s8   ;;  %s273_s12 = sshll.u32 (!%p271_p1), %s326_s7, 2 }
   0x5   : > { %s395_s10 = smov (%p35_p0, %s33_s10), 0  ;;  %47 = sbr.rel (%p271_p1) target bundleno = 12 (0xc), region = 16 }
   0x6   : > { %s272_s13 = sshll.u32 (!%p271_p1), %s49_s11, 2  ;;  %s56_s16 = scalar_lea.vmem (!%p271_p1), %s390_s0, %s273_s12 }
   0x7   : > { %v72_v0 = vld [vmem:[%s56_s16] sm:$0xf] (!%p271_p1)  ;;  %s51_s17 = scalar_lea.vmem (!%p271_p1), [#allocation1], %s272_s13 }
   0x8   : > { %73 = vst [vmem:[%s51_s17] sm:$0xf] (!%p271_p1), %v72_v0 }
   0xc PF: > { %p274_p2 = scmp.ge.s32.totalorder %s330_s8, 1  ;;  %p89_p3 = scmp.lt.s32.totalorder %s330_s8, 3 }
   0xe   : > { %p90_p4 = pnand %p274_p2, %p89_p3 }
  0x10   : > { %93 = sbr.rel (%p90_p4) target bundleno = 511 (0x1ff), region = 50 }
  0x17   : > { %s370_s18 = sand.u32 1, %s269_s9   ;;  %v111_v1 = vlaneseq  ;;  %v332_v11 = vmov -1.0   ;;  %s278_s22 = sshll.u32 %s322_s6, 2 }
  0x18   : > { %s275_s19 = sshll.u32 %s370_s18, 2  ;;  %s178_s25 = scalar_lea.vmem %s391_s1, %s278_s22 }
  0x19   : > { %s102_s20 = scalar_lea.vmem [#allocation1], %s275_s19  ;;  %v112_v3 = vand.u32 127, %v111_v1  ;;  %v115_v4 = vshrl.u32 %v111_v1, 7  ;;  %s106_s21 = scalar_lea.vmem [#allocation3], %s275_s19 }
  0x1a   : > { %v109_v2 = vld [vmem:[%s102_s20] sm:$0xf] }
  0x1b   : > { %110 = vst [vmem:[#allocation0] sm:$0xf] %v109_v2  ;;  %vm113_vm0 = vcmp.lt.s32.totalorder %v112_v3, 3  ;;  %vm122_vm1 = vcmp.ge.s32.totalorder %v115_v4, %v112_v3  ;;  %vm117_vm2 = vcmp.eq.s32.totalorder %v115_v4, %v112_v3  ;;  %vm136_vm4 = vcmp.eq.s32.totalorder %v112_v3, 0 }
  0x1c   : > { %vm123_vm3 = vmand %vm122_vm1, %vm113_vm0  ;;  %vm133_vm5 = vcmp.eq.s32.totalorder %v112_v3, %v115_v4  ;;  %v137_v12 = vsel %vm136_vm4, 1.0, %v332_v11  ;;  %vm144_vm6 = vcmp.eq.s32.totalorder %v112_v3, 1  ;;  %vm154_vm7 = vcmp.eq.s32.totalorder %v112_v3, 2 }
  0x1d   : > { %v138_v13 = vsel %vm133_vm5, %v137_v12, 0.0 }
  0x22   : > { %v118_v5 = vld [vmem:[#allocation0] sm:$0xff] }
  0x23   : > { %v119_v6 = vsel %vm117_vm2, %v118_v5, 0.0  ;;  %v124_v7 = vsel %vm123_vm3, %v118_v5, 0.0 }
  0x24   : > { %120 = vadd.xlane.f32.xlu0 %v119_v6 }
  0xb1   : > { %v121_v8 = vpop.xlane.xlu0 %120 }
  0xb2   : > { %306 = vrcp.f32 %v121_v8  ;;  %vm161_vm8 = vweird.f32 %v121_v8 }
  0xbc   : > { %v307_v9 = vpop.eup %306 }
  0xbd   : > { %v126_v10 = vmul.f32 %v307_v9, %v124_v7 }
  0xbf   : > { %127 = vst [vmem:[#allocation4] sm:$0xff] %v126_v10 }
  0xc6   : > { %v140_v14 = vld [vmem:[#allocation4 + $0x1] ss:$0 sm:$0xff]  ;;  %v150_v17 = vld [vmem:[#allocation4 + $0x2] ss:$0 sm:$0xff] }
  0xc7   : > { %v141_v15 = vxor.u32 2147483648, %v140_v14  ;;  %v151_v19 = vxor.u32 2147483648, %v150_v17 }
  0xc9   : > { %v145_v16 = vmul.f32 %v141_v15, %v138_v13 }
  0xcb   : > { %146 = vadd.xlane.f32.xlu0 %v145_v16 }
 0x158   : > { %v147_v18 = vpop.xlane.xlu0 %146 }
 0x159   : > { %v148_v20 = vsel %vm144_vm6, %v147_v18, %v138_v13 }
 0x15a   : > { %v155_v21 = vmul.f32 %v151_v19, %v148_v20 }
 0x15c   : > { %156 = vadd.xlane.f32.xlu1 %v155_v21 }
 0x1e9   : > { %v157_v22 = vpop.xlane.xlu1 %156 }
 0x1ea   : > { %v158_v23 = vsel %vm154_vm7, %v157_v22, %v148_v20 }
 0x1eb   : > { %v160_v24 = vmul.f32 %v307_v9, %v158_v23 }
 0x1ed   : > { %v162_v25 = vsel %vm161_vm8, %v158_v23, %v160_v24 }
 0x1ee   : > { %163 = vst [vmem:[#allocation2] sm:$0xff] %v162_v25 }
 0x1f5   : > { %v167_v26 = vld [vmem:[#allocation2] sm:$0xf] }
 0x1f6   : > { %169 = vst [vmem:[%s106_s21] sm:$0xf] %v167_v26 }
 0x1fd   : > { %v194_v27 = vld [vmem:[%s106_s21] sm:$0xf] }
 0x1fe   : > { %195 = vst [vmem:[%s178_s25] sm:$0xf] %v194_v27 }
 0x1ff PF: > { %s7_s8 = sadd.s32 1, %s330_s8   ;;  %s392_s6 = smov %s326_s7 }
 0x200   : > { %p4_p5 = scmp.ge.s32.totalorder %s7_s8, 4   ;;  %s393_s7 = smov %s395_s10 }
 0x202   :  { %6 = sbr.rel (!%p4_p5) target bundleno = 2 (0x2), region = 112 }

// kernel: custom-call.22
= control target key start
LH: loop header
LB: loop body
LE: loop exit
PB: predicated region body
PF: predicated region fallthrough
CT: control target
= control target key end

     0   :  { %s1704_s30 = smov 0   ;;  %s1706_s10 = smov 0   ;;  %s2030_s0 = inlined_call_operand.vmem [shape: f32[2,2,2], index: 0, kind: input, shape index: {}]   ;;  %s2031_s1 = inlined_call_operand.vmem [shape: f32[2,2,2], index: 1, kind: input, shape index: {}]   ;;  %s2032_s2 = inlined_call_operand.vmem [shape: f32[2,2,2], index: 2, kind: input, shape index: {}]   ;;  %s2033_s3 = inlined_call_operand.vmem [shape: f32[2,2,2], index: 3, kind: input, shape index: {}]   ;;  %s2034_s4 = inlined_call_operand.vmem [shape: f32[2,2], index: 4, kind: output, shape index: {0}]   ;;  %s2035_s5 = inlined_call_operand.vmem [shape: f32[2,2], index: 5, kind: output, shape index: {1}]   ;;  %s2036_s6 = inlined_call_operand.vmem [shape: f32[2,2,2], index: 6, kind: output, shape index: {2}]   ;;  %s2037_s7 = inlined_call_operand.vmem [shape: f32[2,2,2], index: 7, kind: output, shape index: {3}]   ;;  %s2038_s8 = inlined_call_operand.vmem [shape: f32[2,2,2], index: 8, kind: output, shape index: {4}]   ;;  %s2039_s9 = inlined_call_operand.vmem [shape: f32[2,2,2], index: 9, kind: output, shape index: {5}]  }
   0x1   :  { %s1708_s11 = smov 0  }
   0x2 LB: > { %s1720_s12 = sadd.s32 4294967295, %s1641_s11   ;;  %s1723_s13 = sadd.s32 1, %s1641_s11   ;;  %s1641_s11 = sphi %s1708_s11, %s2058_s11   ;;  %s1637_s10 = sphi %s1706_s10, %s2057_s10   ;;  %s1633_s30 = sphi %s1704_s30, %s2056_s30  }
   0x3   : > { %s20_s14 = sshrl.u32 %s1641_s11, 3  ;;  %s21_s15 = sshrl.u32 %s1723_s13, 3 }
   0x4   : > { %s22_s16 = ssub.s32 %s20_s14, %s21_s15  ;;  %s25_s17 = sadd.s32 1, %s1637_s10 }
   0x5   : > { %p23_p0 = scmp.eq.s32.totalorder %s22_s16, 0  ;;  %p35_p1 = scmp.ne.s32.totalorder %s1637_s10, %s1633_s30 }
   0x6   : > { %p36_p2 = scmp.eq.s32.totalorder %s1720_s12, 1  ;;  %p1502_p4 = scmp.ge.s32.totalorder %s1641_s11, 2 }
   0x7   : > { %s1732_s18 = scalar_select %p23_p0, %s1637_s10, %s25_s17  }
   0x8   : > { %p1734_p3 = por %p36_p2, %p35_p1  ;;  %86 = sbr.rel (%p1502_p4) target bundleno = 17 (0x11), region = 16 }
   0x9   : > { %2040 = sst [smem:[#allocation33_spill]] %s1732_s18  ;;  %s88_s20 = sand.u32 (!%p1502_p4), 1, %s1641_s11  }
   0xa   : > { %s1504_s21 = sshll.u32 (!%p1502_p4), %s1641_s11, 1  ;;  %s1503_s22 = sshll.u32 (!%p1502_p4), %s88_s20, 1 }
   0xb   : > { %s92_s25 = scalar_lea.vmem (!%p1502_p4), %s2030_s0, %s1504_s21  ;;  %s90_s26 = scalar_lea.vmem (!%p1502_p4), [#allocation1], %s1503_s22 }
   0xc   : > { %v108_v0 = vld [vmem:[%s92_s25] sm:$0x3] (!%p1502_p4)  ;;  %s129_s29 = scalar_lea.vmem (!%p1502_p4), %s2031_s1, %s1504_s21  ;;  %s166_s16 = scalar_lea.vmem (!%p1502_p4), %s2032_s2, %s1504_s21 }
   0xd   : > { %109 = vst [vmem:[%s90_s26] sm:$0x3] (!%p1502_p4), %v108_v0  ;;  %v145_v1 = vld [vmem:[%s129_s29] sm:$0x3] (!%p1502_p4)  ;;  %s127_s17 = scalar_lea.vmem (!%p1502_p4), [#allocation3], %s1503_s22  ;;  %s203_s23 = scalar_lea.vmem (!%p1502_p4), %s2033_s3, %s1504_s21 }
   0xe   : > { %146 = vst [vmem:[%s127_s17] sm:$0x3] (!%p1502_p4), %v145_v1  ;;  %v182_v2 = vld [vmem:[%s166_s16] sm:$0x3] (!%p1502_p4)  ;;  %s164_s24 = scalar_lea.vmem (!%p1502_p4), [#allocation5], %s1503_s22  ;;  %s201_s25 = scalar_lea.vmem (!%p1502_p4), [#allocation7], %s1503_s22 }
   0xf   : > { %183 = vst [vmem:[%s164_s24] sm:$0x3] %v182_v2  ;;  %v219_v3 = vld [vmem:[%s203_s23] sm:$0x3] }
  0x10   : > { %220 = vst [vmem:[%s201_s25] sm:$0x3] %v219_v3 }
  0x11 PF: > { %p1511_p5 = scmp.ge.s32.totalorder %s1641_s11, 1  ;;  %p236_p6 = scmp.lt.s32.totalorder %s1641_s11, 3 }
  0x13   : > { %p237_p7 = pnand %p1511_p5, %p236_p6 }
  0x15   : > { %240 = sbr.rel (%p237_p7) target bundleno = 999 (0x3e7), region = 140 }
  0x1c   : > { %s259_s26 = sand.u32 1, %s1720_s12   ;;  %s277_s27 = sand.u32 1, %s1633_s30   ;;  %v337_v4 = vlaneseq  ;;  %v1651_v5 = vmov 0.0  }
  0x1d   : > { %s1757_s28 = sshll.u32 %s259_s26, 1  ;;  %s1759_s18 = sshll.u32 %s277_s27, 1  ;;  %332 = vst [vmem:[#allocation12] sm:$0xff] %v1651_v5  ;;  %333 = vst [vmem:[#allocation14] sm:$0xff] %v1651_v5 }
  0x1e   : > { %334 = vst [vmem:[#allocation16] sm:$0xff] %v1651_v5  ;;  %335 = vst [vmem:[#allocation18] sm:$0xff] %v1651_v5  ;;  %v1761_v6 = vand.u32 127, %v337_v4  ;;  %v1763_v7 = vshrl.u32 %v337_v4, 7  ;;  %s261_s11 = scalar_lea.vmem [#allocation1], %s1757_s28  ;;  %s265_s30 = scalar_lea.vmem [#allocation3], %s1757_s28 }
  0x1f   : > { %v304_v8 = vld [vmem:[%s261_s11] sm:$0x3]  ;;  %v308_v9 = vld [vmem:[%s265_s30] sm:$0x3]  ;;  %s269_s21 = scalar_lea.vmem [#allocation5], %s1757_s28  ;;  %s273_s22 = scalar_lea.vmem [#allocation7], %s1757_s28 }
  0x20   : > { %305 = vst [vmem:[#allocation0] sm:$0x3] %v304_v8  ;;  %309 = vst [vmem:[#allocation2] sm:$0x3] %v308_v9  ;;  %v312_v10 = vld [vmem:[%s269_s21] sm:$0x3]  ;;  %v339_v6 = vmov %v1761_v6  ;;  %v342_v7 = vmov %v1763_v7 }
  0x21   : > { %v316_v11 = vld [vmem:[%s273_s22] sm:$0x3]  ;;  %313 = vst [vmem:[#allocation4] sm:$0x3] %v312_v10  ;;  %v352_v6 = vmov %v1761_v6  ;;  %v355_v7 = vmov %v1763_v7  ;;  %s320_s29 = smov [#allocation20]  ;;  %s323_s14 = smov [#allocation21]  ;;  %vm346_vm0 = vcmp.eq.s32.totalorder %v342_v7, %v339_v6 }
  0x22   : > { %317 = vst [vmem:[#allocation6] sm:$0x3] %v316_v11  ;;  %vm359_vm1 = vcmp.eq.s32.totalorder %v355_v7, %v352_v6  ;;  %s336_s15 = smov [#allocation12]  ;;  %s349_s16 = smov [#allocation18]  ;;  %vm1391_vm2 = vcmp.lt.s32.totalorder %v1761_v6, 2  ;;  %v1383_v6 = vmov %v1761_v6  ;;  %v1386_v7 = vmov %v1763_v7 }
  0x23   : > { %s326_s17 = smov [#allocation22]  ;;  %s329_s20 = smov [#allocation23]  ;;  %vm1396_vm3 = vcmp.eq.s32.totalorder %v1386_v7, %v1383_v6  ;;  %v1434_v6 = vmov %v1761_v6  ;;  %v1403_v7 = vmov %v1763_v7 }
  0x24   : > { %v343_v12 = vld [vmem:[%s336_s15] sm:$0x3]  ;;  %s1387_s30 = smov [#allocation20]  ;;  %s1404_s21 = smov [#allocation21]  ;;  %v1400_v6 = vmov %v1761_v6  ;;  %v1437_v7 = vmov %v1763_v7 }
  0x25   : > { %v356_v13 = vld [vmem:[%s349_s16] sm:$0x3]  ;;  %v347_v16 = vsel %vm346_vm0, 1.0, %v343_v12  ;;  %s1421_s22 = smov [#allocation22]  ;;  %v1417_v6 = vmov %v1761_v6  ;;  %v1420_v7 = vmov %v1763_v7  ;;  %vm1447_vm4 = vcmp.eq.s32.totalorder %v1437_v7, %v1434_v6 }
  0x26   : > { %v360_v17 = vsel %vm359_vm1, 1.0, %v356_v13  ;;  %348 = vst [vmem:[%s336_s15] sm:$0x3] %v347_v16 }
  0x27   : > { %v321_v14 = vld [vmem:[#allocation0] sm:$0xff]  ;;  %v324_v15 = vld [vmem:[#allocation2] sm:$0xff]  ;;  %361 = vst [vmem:[%s349_s16] sm:$0x3] %v360_v17 }
  0x28   : > { %322 = vst [vmem:[%s320_s29] sm:$0xff] %v321_v14  ;;  %325 = vst [vmem:[%s323_s14] sm:$0xff] %v324_v15  ;;  %v327_v18 = vld [vmem:[#allocation4] sm:$0xff]  ;;  %s1438_s29 = smov [#allocation23] }
  0x29   : > { %v330_v19 = vld [vmem:[#allocation6] sm:$0xff]  ;;  %328 = vst [vmem:[%s326_s17] sm:$0xff] %v327_v18 }
  0x2a   : > { %331 = vst [vmem:[%s329_s20] sm:$0xff] %v330_v19 }
  0x2f   : > { %v1393_v20 = vld [vmem:[%s1387_s30] sm:$0x3] }
  0x30   : > { %v1410_v21 = vld [vmem:[%s1404_s21] sm:$0x3]  ;;  %v1394_v22 = vsel %vm1391_vm2, %v1393_v20, 0.0 }
  0x31   : > { %v1411_v23 = vsel %vm1391_vm2, %v1410_v21, 0.0  ;;  %v1427_v24 = vld [vmem:[%s1421_s22] sm:$0x3]  ;;  %v1395_v26 = vmul.f32 %v1394_v22, %v1394_v22 }
  0x32   : > { %v1444_v25 = vld [vmem:[%s1438_s29] sm:$0x3]  ;;  %v1412_v27 = vmul.f32 %v1411_v23, %v1411_v23  ;;  %v1428_v28 = vsel %vm1391_vm2, %v1427_v24, 0.0 }
  0x33   : > { %v1445_v29 = vsel %vm1391_vm2, %v1444_v25, 0.0  ;;  %v1429_v30 = vmul.f32 %v1428_v28, %v1428_v28  ;;  %v1397_v33 = vsel %vm1396_vm3, 0.0, %v1395_v26 }
  0x34   : > { %v1414_v31 = vadd.f32 %v1412_v27, %v1395_v26  ;;  %v1446_v32 = vmul.f32 %v1445_v29, %v1445_v29  ;;  %v1413_v34 = vadd.f32 %v1412_v27, %v1397_v33 }
  0x36   : > { %v1431_v35 = vadd.f32 %v1429_v30, %v1414_v31  ;;  %v1430_v36 = vadd.f32 %v1429_v30, %v1413_v34  ;;  %v1448_v37 = vsel %vm1447_vm4, 0.0, %v1446_v32 }
  0x38   : > { %v1450_v38 = vadd.f32 %v1446_v32, %v1431_v35  ;;  %v1449_v39 = vadd.f32 %v1448_v37, %v1430_v36 }
  0x3a   : > { %1451 = vadd.xlane.f32.xlu0 %v1450_v38 }
  0x3e   : > { %1459 = vadd.xlane.f32.xlu0 %v1449_v39 }
  0xc7   : > { %v1452_v40 = vpop.xlane.xlu0 %1451 }
  0xc8   : > { %v1453_v41 = vrot.slane %v1452_v40, 4 }
  0xca   : > { %v1454_v42 = vadd.f32 %v1453_v41, %v1452_v40 }
  0xcb   : > { %v1460_v43 = vpop.xlane.xlu0 %1459 }
  0xcc   : > { %v1455_v44 = vrot.slane %v1454_v42, 2  ;;  %v1461_v45 = vrot.slane %v1460_v43, 4 }
  0xce   : > { %v1462_v46 = vadd.f32 %v1461_v45, %v1460_v43  ;;  %v1456_v47 = vadd.f32 %v1455_v44, %v1454_v42 }
  0xd0   : > { %v1463_v48 = vrot.slane %v1462_v46, 2  ;;  %v1457_v50 = vrot.slane %v1456_v47, 1 }
  0xd2   : > { %v1464_v49 = vadd.f32 %v1463_v48, %v1462_v46  ;;  %v1458_v53 = vadd.f32 %v1457_v50, %v1456_v47 }
  0xd4   : > { %v1465_v51 = vrot.slane %v1464_v49, 1 }
  0xd6   : > { %v1466_v52 = vadd.f32 %v1465_v51, %v1464_v49 }
  0xd8   : > { %1552 = vpush %v1466_v52 }
  0xd9   : > { %1554 = vpush %v1458_v53 }
 0x109   : > { %s1553_s14 = spop %1552 }
 0x10a   : > { %s1555_s15 = spop %1554 }
 0x10b   : > { %s1469_s16 = smul.f32 1e-10, %s1555_s15 }
 0x10d   : > { %p1470_p8 = scmp.le.f32.partialorder %s1553_s14, %s1469_s16 }
 0x10e   : > { %s1797_s17 = smov (!%p1470_p8), 0  }
 0x10f   : > { %1473 = sbr.rel (%p1470_p8) target bundleno = 953 (0x3b9), region = 467 }
 0x116 LB: >> { %s1802_s20 = smov 0   ;;  %s1645_s17 = sphi %s1797_s17, %s2042_s17  }
 0x117 LB: >>> { %s466_s30 = smov [#allocation20]  ;;  %v470_v6 = vmov %v1761_v6  ;;  %v473_v7 = vmov %v1763_v7  ;;  %s486_s21 = smov [#allocation21]  ;;  %vm789_vm14 = vcmp.eq.s32.totalorder %v1763_v7, 0  ;;  %vm801_vm15 = vcmp.eq.s32.totalorder %v1763_v7, 1  ;;  %s1649_s20 = sphi %s1802_s20, %s465_s20  }
 0x118   : >>> { %v490_v6 = vmov %v1761_v6  ;;  %v493_v7 = vmov %v1763_v7  ;;  %v474_v54 = vld [vmem:[%s466_s30] sm:$0x3]  ;;  %vm477_vm5 = vcmp.eq.s32.totalorder %v473_v7, %v470_v6  ;;  %s506_s22 = smov [#allocation23]  ;;  %s467_s29 = smov [#allocation24] }
 0x119   : >>> { %vm497_vm6 = vcmp.eq.s32.totalorder %v493_v7, %v490_v6  ;;  %v510_v6 = vmov %v1761_v6  ;;  %v513_v7 = vmov %v1763_v7  ;;  %v478_v55 = vsel %vm477_vm5, %v474_v54, 0.0  ;;  %v494_v56 = vld [vmem:[%s486_s21] sm:$0x3]  ;;  %s487_s14 = smov [#allocation25]  ;;  %s507_s15 = smov [#allocation26] }
 0x11a   : >>> { %vm517_vm7 = vcmp.eq.s32.totalorder %v513_v7, %v510_v6  ;;  %v479_v57 = vrot.slane %v478_v55, 4  ;;  %v498_v58 = vsel %vm497_vm6, %v494_v56, 0.0  ;;  %v514_v59 = vld [vmem:[%s506_s22] sm:$0x3]  ;;  %s530_s16 = smov [#allocation25]  ;;  %s528_s30 = smov [#allocation24]  ;;  %v579_v6 = vmov %v1761_v6 }
 0x11b   : >>> { %v499_v60 = vrot.slane %v498_v58, 4  ;;  %v518_v61 = vsel %vm517_vm7, %v514_v59, 0.0  ;;  %s532_s21 = smov [#allocation26]  ;;  %s567_s22 = smov [#allocation27]  ;;  %v582_v7 = vmov %v1763_v7  ;;  %v594_v6 = vmov %v1761_v6 }
 0x11c   : >>> { %v480_v62 = vadd.f32 %v479_v57, %v478_v55  ;;  %v519_v63 = vrot.slane %v518_v61, 4  ;;  %v597_v7 = vmov %v1763_v7  ;;  %vm584_vm12 = vcmp.eq.s32.totalorder %v582_v7, %v579_v6  ;;  %s1821_s24 = smov [#allocation22]  ;;  %s1827_s23 = smov [#allocation14] }
 0x11d   : >>> { %v500_v0 = vadd.f32 %v499_v60, %v498_v58  ;;  %vm599_vm13 = vcmp.eq.s32.totalorder %v597_v7, %v594_v6  ;;  %s829_s11 = smov [#allocation31]  ;;  %s1833_s27 = smov [#allocation18]  ;;  %v615_v55 = vld [vmem:[%s1821_s24] sm:$0x3]  ;;  %v692_v6 = vmov %v1761_v6  ;;  %v695_v7 = vmov %v1763_v7 }
 0x11e   : >>> { %v481_v1 = vrot.slane %v480_v62, 2  ;;  %v520_v2 = vadd.f32 %v519_v63, %v518_v61  ;;  %v838_v58 = vld [vmem:[%s1827_s23] sm:$0x3]  ;;  %s607_s26 = smov [#allocation32]  ;;  %s831_s25 = smov [#allocation32]  ;;  %v706_v6 = vmov %v1761_v6  ;;  %v709_v7 = vmov %v1763_v7 }
 0x11f   : >>> { %v501_v3 = vrot.slane %v500_v0, 2  ;;  %v840_v61 = vld [vmem:[%s1833_s27] sm:$0x3]  ;;  %vm699_vm0 = vcmp.eq.s32.totalorder %v695_v7, %v692_v6  ;;  %v665_v6 = vmov %v1761_v6  ;;  %v668_v7 = vmov %v1763_v7  ;;  %s465_s20 = sadd.s32 1, %s1649_s20  }
 0x120   : >>> { %v482_v4 = vadd.f32 %v481_v1, %v480_v62  ;;  %v521_v5 = vrot.slane %v520_v2, 2  ;;  %v679_v6 = vmov %v1761_v6  ;;  %v682_v7 = vmov %v1763_v7  ;;  %p462_p9 = scmp.ge.s32.totalorder %s465_s20, 3  }
 0x121   : >>> { %v502_v8 = vadd.f32 %v501_v3, %v500_v0  ;;  %vm714_vm1 = vcmp.eq.s32.totalorder %v709_v7, %v706_v6  ;;  %vm673_vm3 = vcmp.eq.s32.totalorder %v668_v7, %v665_v6  ;;  %vm686_vm4 = vcmp.eq.s32.totalorder %v682_v7, %v679_v6 }
 0x122   : >>> { %v483_v9 = vrot.slane %v482_v4, 1  ;;  %v522_v10 = vadd.f32 %v521_v5, %v520_v2  ;;  %vm728_vm5 = vcmp.eq.s32.totalorder %v1761_v6, 0  ;;  %vm732_vm6 = vcmp.eq.s32.totalorder %v1761_v6, 1 }
 0x123   : >>> { %v503_v11 = vrot.slane %v502_v8, 1  ;;  %v366_v6 = vmov (%p462_p9), %v1761_v6  ;;  %v369_v7 = vmov (%p462_p9), %v1763_v7 }
 0x124   : >>> { %v484_v12 = vadd.f32 %v483_v9, %v482_v4  ;;  %v523_v13 = vrot.slane %v522_v10, 1  ;;  %v419_v6 = vmov (%p462_p9), %v1761_v6  ;;  %vm381_vm7 = vcmp.eq.s32.totalorder (%p462_p9), %v369_v7, %v366_v6 }
 0x125   : >>> { %v504_v14 = vadd.f32 %v503_v11, %v502_v8  ;;  %v422_v7 = vmov (%p462_p9), %v1763_v7  ;;  %v385_v6 = vmov (%p462_p9), %v1761_v6 }
 0x126   : >>> { %485 = vst [vmem:[%s467_s29] sm:$0x1] %v484_v12  ;;  %v524_v15 = vadd.f32 %v523_v13, %v522_v10  ;;  %s569_s29 = smov [#allocation28]  ;;  %v388_v7 = vmov (%p462_p9), %v1763_v7  ;;  %v402_v6 = vmov (%p462_p9), %v1761_v6 }
 0x127   : >>> { %505 = vst [vmem:[%s487_s14] sm:$0x1] %v504_v14  ;;  %s526_s14 = smov [#allocation29]  ;;  %v405_v7 = vmov (%p462_p9), %v1763_v7 }
 0x128   : >>> { %525 = vst [vmem:[%s507_s15] sm:$0x1] %v524_v15  ;;  %s527_s15 = smov [#allocation30]  ;;  %s571_s14 = smov %s526_s14 }
 0x129   : >>> { %s573_s15 = smov %s527_s15 }
 0x12d   : >>> { %v529_v18 = vld [vmem:[%s528_s30] sm:$0xff]  ;;  %s590_s30 = smov [#allocation30] }
 0x12e   : >>> { %v531_v16 = vld [vmem:[%s530_s16] sm:$0xff]  ;;  %v552_v31 = vand.u32 2147483647, %v529_v18  ;;  %s575_s16 = smov [#allocation29] }
 0x12f   : >>> { %v535_v17 = vmul.f32 2.0, %v531_v16  ;;  %v533_v19 = vld [vmem:[%s532_s21] sm:$0xff]  ;;  %v553_v36 = vand.u32 2147483647, %v531_v16  ;;  %s588_s21 = smov [#allocation31] }
 0x130   : >>> { %v534_v20 = vsub.f32 %v533_v19, %v529_v18  ;;  %v554_v32 = vand.u32 2147483647, %v533_v19 }
 0x131   : >>> { %1603 = vrcp.f32 %v535_v17 }
 0x132   : >>> { %v555_v35 = vmin.f32 %v552_v31, %v554_v32 }
 0x134   : >>> { %v556_v37 = vmul.f32 1.1920929e-08, %v555_v35 }
 0x136   : >>> { %vm557_vm11 = vcmp.le.f32.partialorder %v553_v36, %v556_v37 }
 0x13b   : >>> { %v1604_v21 = vpop.eup %1603 }
 0x13c   : >>> { %v537_v22 = vmul.f32 %v1604_v21, %v534_v20 }
 0x13e   : >>> { %v539_v23 = vmul.f32 %v537_v22, %v537_v22  ;;  %vm538_vm10 = vcmp.ge.f32.partialorder %v537_v22, 0.0 }
 0x140   : >>> { %v540_v24 = vadd.f32 1.0, %v539_v23 }
 0x142   : >>> { %1605 = vrsqrt.f32 %v540_v24  ;;  %vm543_vm8 = vcmp.eq.f32.partialorder %v540_v24, inf  ;;  %v546_v26 = vand.u32 2147483648, %v540_v24  ;;  %vm545_vm9 = vcmp.eq.f32.partialorder %v540_v24, 0.0 }
 0x14c   : >>> { %v1606_v25 = vpop.eup %1605 }
 0x14d   : >>> { %v542_v27 = vmul.f32 %v1606_v25, %v540_v24 }
 0x14f   : >>> { %v544_v28 = vsel %vm543_vm8, %v540_v24, %v542_v27  ;;  %vm434_vm8 = vcmp.eq.s32.totalorder (%p462_p9), %v422_v7, %v419_v6 }
 0x150   : >>> { %v547_v29 = vsel %vm545_vm9, %v546_v26, %v544_v28 }
 0x151   : >>> { %v548_v30 = vxor.u32 2147483648, %v547_v29 }
 0x153   : >>> { %v549_v33 = vsel %vm538_vm10, %v547_v29, %v548_v30 }
 0x154   : >>> { %v550_v34 = vadd.f32 %v549_v33, %v537_v22 }
 0x156   : >>> { %1607 = vrcp.f32 %v550_v34 }
 0x160   : >>> { %v1608_v38 = vpop.eup %1607 }
 0x161   : >>> { %v558_v39 = vsel %vm557_vm11, 0.0, %v1608_v38 }
 0x162   : >>> { %v559_v40 = vmul.f32 %v558_v39, %v558_v39  ;;  %v563_v41 = vmul.f32 %v558_v39, %v531_v16 }
 0x164   : >>> { %v560_v42 = vadd.f32 1.0, %v559_v40  ;;  %v564_v43 = vsub.f32 %v529_v18, %v563_v41  ;;  %v566_v44 = vadd.f32 %v563_v41, %v533_v19 }
 0x166   : >>> { %1609 = vrsqrt.f32 %v560_v42  ;;  %568 = vst [vmem:[%s567_s22] sm:$0xff] %v564_v43  ;;  %570 = vst [vmem:[%s569_s29] sm:$0xff] %v566_v44  ;;  %s605_s22 = smov [#allocation31]  ;;  %s1817_s29 = smov [#allocation20] }
 0x167   : >>> { %v613_v53 = vld [vmem:[%s1817_s29] sm:$0x3] }
 0x170   : >>> { %v1610_v45 = vpop.eup %1609 }
 0x171   : >>> { %572 = vst [vmem:[%s571_s14] sm:$0xff] %v1610_v45  ;;  %v562_v46 = vmul.f32 %v1610_v45, %v558_v39  ;;  %s603_s14 = smov [#allocation32] }
 0x173   : >>> { %574 = vst [vmem:[%s573_s15] sm:$0xff] %v562_v46  ;;  %s1819_s15 = smov [#allocation21] }
 0x174   : >>> { %v614_v54 = vld [vmem:[%s1819_s15] sm:$0x3] }
 0x178   : >>> { %v576_v47 = vld [vmem:[%s575_s16] ss:$0 sm:$0xff]  ;;  %s1823_s16 = smov [#allocation23] }
 0x179   : >>> { %v585_v48 = vsel %vm584_vm12, %v576_v47, 0.0  ;;  %v616_v56 = vld [vmem:[%s1823_s16] sm:$0x3] }
 0x17a   : >>> { %586 = vadd.xlane.f32.xlu0 %v585_v48  ;;  %v591_v49 = vld [vmem:[%s590_s30] ss:$0 sm:$0xff]  ;;  %s1825_s30 = smov [#allocation12] }
 0x17b   : >>> { %v600_v50 = vsel %vm599_vm13, %v591_v49, 0.0  ;;  %v837_v57 = vld [vmem:[%s1825_s30] sm:$0x3] }
 0x17e   : >>> { %601 = vadd.xlane.f32.xlu0 %v600_v50 }
 0x207   : >>> { %v587_v51 = vpop.xlane.xlu0 %586 }
 0x208   : >>> { %589 = vst [vmem:[%s588_s21] sm:$0xff] %v587_v51  ;;  %s1829_s21 = smov [#allocation16] }
 0x209   : >>> { %v839_v59 = vld [vmem:[%s1829_s21] sm:$0x3] }
 0x20b   : >>> { %v602_v52 = vpop.xlane.xlu0 %601 }
 0x20c   : >>> { %604 = vst [vmem:[%s603_s14] sm:$0xff] %v602_v52  ;;  %s1853_s14 = smov [#allocation23] }
 0x20f   : >>> { %v606_v60 = vld [vmem:[%s605_s22] sm:$0xff]  ;;  %s1851_s22 = smov [#allocation22] }
 0x210   : >>> { %v830_v62 = vld [vmem:[%s829_s11] sm:$0xff]  ;;  %v617_v63 = vmul.f32 %v613_v53, %v606_v60  ;;  %v620_v0 = vmul.f32 %v614_v54, %v606_v60  ;;  %v624_v1 = vmul.f32 %v615_v55, %v606_v60  ;;  %v627_v2 = vmul.f32 %v616_v56, %v606_v60  ;;  %s1849_s11 = smov [#allocation12] }
 0x211   : >>> { %v841_v3 = vmul.f32 %v837_v57, %v830_v62  ;;  %v844_v4 = vmul.f32 %v838_v58, %v830_v62  ;;  %v848_v5 = vmul.f32 %v839_v59, %v830_v62  ;;  %v851_v8 = vmul.f32 %v840_v61, %v830_v62 }
 0x213   : >>> { %v608_v9 = vld [vmem:[%s607_s26] sm:$0xff]  ;;  %s635_s26 = smov [#allocation30] }
 0x214   : >>> { %v832_v10 = vld [vmem:[%s831_s25] sm:$0xff]  ;;  %v618_v11 = vmul.f32 %v615_v55, %v608_v9  ;;  %v621_v12 = vmul.f32 %v616_v56, %v608_v9  ;;  %v623_v13 = vmul.f32 %v613_v53, %v608_v9  ;;  %v626_v14 = vmul.f32 %v614_v54, %v608_v9  ;;  %s633_s25 = smov [#allocation29] }
 0x215   : >>> { %v842_v15 = vmul.f32 %v839_v59, %v832_v10  ;;  %v845_v16 = vmul.f32 %v840_v61, %v832_v10  ;;  %v847_v17 = vmul.f32 %v837_v57, %v832_v10  ;;  %v850_v18 = vmul.f32 %v838_v58, %v832_v10  ;;  %v634_v27 = vld [vmem:[%s633_s25] ss:$0 sm:$0xff]  ;;  %s662_s25 = smov [#allocation27] }
 0x216   : >>> { %v619_v19 = vsub.f32 %v617_v63, %v618_v11  ;;  %v622_v20 = vsub.f32 %v620_v0, %v621_v12  ;;  %v625_v21 = vadd.f32 %v624_v1, %v623_v13  ;;  %v628_v22 = vadd.f32 %v627_v2, %v626_v14  ;;  %v636_v28 = vld [vmem:[%s635_s26] ss:$0 sm:$0xff]  ;;  %s661_s26 = smov [#allocation20] }
 0x217   : >>> { %v843_v23 = vsub.f32 %v841_v3, %v842_v15  ;;  %v846_v24 = vsub.f32 %v844_v4, %v845_v16  ;;  %v849_v25 = vadd.f32 %v848_v5, %v847_v17  ;;  %v852_v26 = vadd.f32 %v851_v8, %v850_v18  ;;  %v669_v63 = vld [vmem:[%s662_s25] ss:$0 sm:$0xff]  ;;  %s905_s25 = sadd.s32 (%p462_p9), 1, %s1645_s17  }
 0x218   : >>> { %630 = vst [vmem:[%s1819_s15] sm:$0x3] %v622_v20  ;;  %632 = vst [vmem:[%s1823_s16] sm:$0x3] %v628_v22  ;;  %s1855_s15 = smov [#allocation20]  ;;  %s703_s16 = smov [#allocation28] }
 0x219   : >>> { %629 = vst [vmem:[%s1817_s29] sm:$0x3] %v619_v19  ;;  %631 = vst [vmem:[%s1821_s24] sm:$0x3] %v625_v21  ;;  %s1857_s24 = smov [#allocation16]  ;;  %s1865_s29 = smov [#allocation21]  ;;  %v710_v59 = vld [vmem:[%s703_s16] ss:$0 sm:$0xff] }
 0x21a   : >>> { %853 = vst [vmem:[%s1825_s30] sm:$0x3] %v843_v23  ;;  %854 = vst [vmem:[%s1827_s23] sm:$0x3] %v846_v24  ;;  %s1859_s23 = smov [#allocation14]  ;;  %s689_s30 = smov [#allocation22] }
 0x21b   : >>> { %855 = vst [vmem:[%s1829_s21] sm:$0x3] %v849_v25  ;;  %856 = vst [vmem:[%s1833_s27] sm:$0x3] %v852_v26  ;;  %s1863_s27 = smov [#allocation18]  ;;  %s702_s21 = smov [#allocation23] }
 0x21c   : >>> { %s805_s16 = smov [#allocation21]  ;;  %p458_p10 = scmp.ge.s32.totalorder (%p462_p9), %s905_s25, 15 }
 0x21d   : >> { %s2042_s17 = smov (%p462_p9), %s905_s25 }
 0x21f   : >>> { %v644_v30 = vld [vmem:[%s1853_s14] sm:$0x3] }
 0x220   : >>> { %v643_v29 = vld [vmem:[%s1851_s22] sm:$0x3]  ;;  %v652_v36 = vmul.f32 %v644_v30, %v636_v28  ;;  %v655_v42 = vmul.f32 %v644_v30, %v634_v27 }
 0x221   : >>> { %v641_v31 = vld [vmem:[%s1855_s15] sm:$0x3]  ;;  %v651_v35 = vmul.f32 %v643_v29, %v634_v27  ;;  %v654_v37 = vmul.f32 %v643_v29, %v636_v28 }
 0x222   : >>> { %v859_v32 = vld [vmem:[%s1849_s11] ss:$0 sm:$0xff]  ;;  %v1531_v34 = vld [vmem:[%s1849_s11 + $0x1] ss:$0 sm:$0xff]  ;;  %v645_v48 = vmul.f32 %v641_v31, %v634_v27  ;;  %v648_v49 = vmul.f32 %v641_v31, %v636_v28 }
 0x223   : >>> { %v1530_v33 = vld [vmem:[%s1849_s11 - $0x1] sm:$0x2]  ;;  %v1533_v40 = vld [vmem:[%s1857_s24 + $0x1] sm:$0x1]  ;;  %v653_v47 = vsub.f32 %v651_v35, %v652_v36  ;;  %v656_v53 = vadd.f32 %v655_v42, %v654_v37 }
 0x224   : >>> { %v866_v38 = vsel %vm789_vm14, %v859_v32, %v1530_v33  ;;  %v870_v39 = vld [vmem:[%s1857_s24] ss:$0 sm:$0xff]  ;;  %v878_v43 = vsel %vm801_vm15, %v1531_v34, %v1533_v40  ;;  %v1535_v45 = vld [vmem:[%s1859_s23 + $0x1] ss:$0 sm:$0xff] }
 0x225   : >>> { %v883_v41 = vld [vmem:[%s1859_s23] ss:$0 sm:$0xff]  ;;  %869 = vst [vmem:[%s1849_s11] sm:$0x3] %v866_v38  ;;  %880 = vst [vmem:[%s1857_s24] sm:$0x3] %v878_v43  ;;  %v1537_v51 = vld [vmem:[%s1863_s27 + $0x1] sm:$0x1] }
 0x226   : >>> { %v1534_v44 = vld [vmem:[%s1859_s23 - $0x1] sm:$0x2]  ;;  %1532 = vst [vmem:[%s1849_s11 + $0x1] sm:$0x1] %v870_v39  ;;  %v902_v54 = vsel %vm801_vm15, %v1535_v45, %v1537_v51  ;;  %659 = vst [vmem:[%s1851_s22] sm:$0x3] %v653_v47  ;;  %s676_s11 = smov [#allocation21] }
 0x227   : >>> { %v894_v46 = vld [vmem:[%s1863_s27] ss:$0 sm:$0xff]  ;;  %v890_v50 = vsel %vm789_vm14, %v883_v41, %v1534_v44  ;;  %660 = vst [vmem:[%s1853_s14] sm:$0x3] %v656_v53  ;;  %s1907_s22 = smov [#allocation22]  ;;  %s1652_s14 = smov 1  }
 0x228   : >>> { %v642_v52 = vld [vmem:[%s1865_s29] sm:$0x3]  ;;  %893 = vst [vmem:[%s1859_s23] sm:$0x3] %v890_v50  ;;  %904 = vst [vmem:[%s1863_s27] sm:$0x3] %v902_v54  ;;  %s718_s24 = smov [#allocation21]  ;;  %s1910_s27 = smov [#allocation23] }
 0x229   : >>> { %v646_v55 = vmul.f32 %v642_v52, %v636_v28  ;;  %v649_v56 = vmul.f32 %v642_v52, %v634_v27  ;;  %1536 = vst [vmem:[%s1859_s23 + $0x1] sm:$0x1] %v894_v46  ;;  %s1653_s23 = smov 127  }
 0x22b   : >>> { %v647_v57 = vsub.f32 %v645_v48, %v646_v55  ;;  %v650_v58 = vadd.f32 %v649_v56, %v648_v49 }
 0x22d   : >>> { %657 = vst [vmem:[%s1855_s15] sm:$0x3] %v647_v57  ;;  %658 = vst [vmem:[%s1865_s29] sm:$0x3] %v650_v58  ;;  %v696_v60 = vld [vmem:[%s689_s30] sm:$0x3]  ;;  %s717_s15 = smov [#allocation20]  ;;  %s781_s29 = smov [#allocation20] }
 0x22e   : >>> { %v700_v61 = vsel %vm699_vm0, 0.0, %v696_v60  ;;  %v711_v62 = vld [vmem:[%s702_s21] sm:$0x3] }
 0x22f   : >>> { %701 = vst [vmem:[%s689_s30] sm:$0x3] %v700_v61  ;;  %v715_v0 = vsel %vm714_vm1, %v710_v59, %v711_v62  ;;  %s782_s30 = smov [#allocation22] }
 0x230   : >>> { %716 = vst [vmem:[%s702_s21] sm:$0x3] %v715_v0  ;;  %s806_s21 = smov [#allocation23] }
 0x234   : >>> { %v670_v1 = vld [vmem:[%s661_s26] sm:$0x3] }
 0x235   : >>> { %v683_v2 = vld [vmem:[%s676_s11] sm:$0x3]  ;;  %v674_v3 = vsel %vm673_vm3, %v669_v63, %v670_v1 }
 0x236   : >>> { %v687_v4 = vsel %vm686_vm4, 0.0, %v683_v2  ;;  %675 = vst [vmem:[%s661_s26] sm:$0x3] %v674_v3  ;;  %v755_v5 = vld [vmem:[%s1907_s22] sm:$0x3]  ;;  %s370_s26 = smov (%p462_p9), [#allocation20] }
 0x237   : >>> { %688 = vst [vmem:[%s676_s11] sm:$0x3] %v687_v4  ;;  %756 = vrot.lane.b32.xlu0 %v755_v5, %s1652_s14  ;;  %v751_v11 = vld [vmem:[%s1910_s27] sm:$0x3]  ;;  %s389_s11 = smov (%p462_p9), [#allocation21] }
 0x238   : >>> { %v772_v12 = vld [vmem:[%s1910_s27] sm:$0x3] }
 0x239   : >>> { %v754_v30 = vld [vmem:[%s1907_s22] sm:$0x3] }
 0x23d   : >>> { %v723_v8 = vld [vmem:[%s717_s15] sm:$0x3] }
 0x23e   : >>> { %724 = vrot.lane.b32.xlu1 %v723_v8, %s1652_s14  ;;  %v719_v9 = vld [vmem:[%s718_s24] sm:$0x3] }
 0x23f   : >>> { %v740_v10 = vld [vmem:[%s718_s24] sm:$0x3] }
 0x240   : >>> { %v722_v18 = vld [vmem:[%s717_s15] sm:$0x3] }
 0x242   : >>> { %720 = vrot.lane.b32.xlu1 %v719_v9, %s1652_s14 }
 0x246   : >>> { %741 = vrot.lane.b32.xlu1 %v740_v10, %s1653_s23 }
 0x24a   : >>> { %752 = vrot.lane.b32.xlu1 %v751_v11, %s1652_s14  ;;  %s423_s14 = smov (%p462_p9), [#allocation23] }
 0x24e   : >>> { %773 = vrot.lane.b32.xlu1 %v772_v12, %s1653_s23 }
 0x2a9   : >>> { %v757_v20 = vpop.permute.xlu0 %756 }
 0x2aa   : >>> { %v761_v22 = vsel %vm728_vm5, %v755_v5, %v757_v20 }
 0x2b0   : >>> { %v725_v13 = vpop.permute.xlu1 %724 }
 0x2b1   : >>> { %v729_v14 = vsel %vm728_vm5, %v723_v8, %v725_v13 }
 0x2b4   : >>> { %v721_v15 = vpop.permute.xlu1 %720 }
 0x2b5   : >>> { %v733_v16 = vsel %vm732_vm6, %v721_v15, %v729_v14 }
 0x2b6   : >>> { %v739_v17 = vsel %vm1391_vm2, %v733_v16, 0.0 }
 0x2b7   : >>> { %747 = vst [vmem:[%s717_s15] sm:$0x3] %v739_v17 }
 0x2b8   : >>> { %v742_v19 = vpop.permute.xlu1 %741 }
 0x2b9   : >>> { %v746_v21 = vsel %vm732_vm6, %v722_v18, %v742_v19 }
 0x2ba   : >>> { %748 = vst [vmem:[%s718_s24] sm:$0x3] %v746_v21 }
 0x2bc   : >>> { %v753_v23 = vpop.permute.xlu1 %752 }
 0x2bd   : >>> { %v765_v24 = vsel %vm732_vm6, %v753_v23, %v761_v22 }
 0x2be   : >>> { %v783_v25 = vld [vmem:[%s781_s29] ss:$0 sm:$0xff]  ;;  %v1523_v27 = vld [vmem:[%s781_s29 + $0x1] ss:$0 sm:$0xff]  ;;  %v771_v29 = vsel %vm1391_vm2, %v765_v24, 0.0 }
 0x2bf   : >>> { %v1522_v26 = vld [vmem:[%s781_s29 - $0x1] sm:$0x2]  ;;  %779 = vst [vmem:[%s1907_s22] sm:$0x3] %v771_v29  ;;  %s406_s22 = smov (%p462_p9), [#allocation22] }
 0x2c0   : >>> { %v790_v28 = vsel %vm789_vm14, %v783_v25, %v1522_v26  ;;  %v774_v31 = vpop.permute.xlu1 %773 }
 0x2c1   : >>> { %793 = vst [vmem:[%s781_s29] sm:$0x3] %v790_v28  ;;  %v807_v32 = vld [vmem:[%s805_s16] ss:$0 sm:$0xff]  ;;  %v1527_v34 = vld [vmem:[%s805_s16 + $0x1] ss:$0 sm:$0xff]  ;;  %v778_v35 = vsel %vm732_vm6, %v754_v30, %v774_v31 }
 0x2c2   : >>> { %v1526_v33 = vld [vmem:[%s805_s16 - $0x1] sm:$0x2]  ;;  %780 = vst [vmem:[%s1910_s27] sm:$0x3] %v778_v35 }
 0x2c3   : >>> { %v814_v36 = vsel %vm789_vm14, %v807_v32, %v1526_v33 }
 0x2c4   : >>> { %817 = vst [vmem:[%s805_s16] sm:$0x3] %v814_v36 }
 0x2c6   : >>> { %v794_v37 = vld [vmem:[%s782_s30] ss:$0 sm:$0xff]  ;;  %v1525_v38 = vld [vmem:[%s782_s30 + $0x1] sm:$0x1] }
 0x2c7   : >>> { %1524 = vst [vmem:[%s781_s29 + $0x1] sm:$0x1] %v794_v37  ;;  %v802_v39 = vsel %vm801_vm15, %v1523_v27, %v1525_v38  ;;  %464 = sbr.rel (!%p462_p9) target bundleno = 279 (0x117), region = 462 }
 0x2c8   : >>> { %804 = vst [vmem:[%s782_s30] sm:$0x3] %v802_v39 }
 0x2c9   : >>> { %v818_v40 = vld [vmem:[%s806_s21] ss:$0 sm:$0xff]  ;;  %v1529_v41 = vld [vmem:[%s806_s21 + $0x1] sm:$0x1] }
 0x2ca   : >>> { %1528 = vst [vmem:[%s805_s16 + $0x1] sm:$0x1] %v818_v40  ;;  %v826_v42 = vsel %vm801_vm15, %v1527_v34, %v1529_v41 }
 0x2cb   : >>> { %828 = vst [vmem:[%s806_s21] sm:$0x3] %v826_v42 }
 0x2ce   : >> { %v376_v43 = vld [vmem:[%s370_s26] sm:$0x3] }
 0x2cf   : >> { %v377_v45 = vsel %vm1391_vm2, %v376_v43, 0.0  ;;  %v412_v47 = vld [vmem:[%s406_s22] sm:$0x3] }
 0x2d0   : >> { %v378_v49 = vmul.f32 %v377_v45, %v377_v45  ;;  %v413_v51 = vsel %vm1391_vm2, %v412_v47, 0.0 }
 0x2d1   : >> { %v395_v44 = vld [vmem:[%s389_s11] sm:$0x3]  ;;  %v414_v53 = vmul.f32 %v413_v51, %v413_v51 }
 0x2d2   : >> { %v396_v46 = vsel %vm1391_vm2, %v395_v44, 0.0  ;;  %v429_v48 = vld [vmem:[%s423_s14] sm:$0x3]  ;;  %v382_v56 = vsel %vm381_vm7, 0.0, %v378_v49 }
 0x2d3   : >> { %v397_v50 = vmul.f32 %v396_v46, %v396_v46  ;;  %v430_v52 = vsel %vm1391_vm2, %v429_v48, 0.0 }
 0x2d4   : >> { %v431_v55 = vmul.f32 %v430_v52, %v430_v52 }
 0x2d5   : >> { %v399_v54 = vadd.f32 %v397_v50, %v378_v49  ;;  %v398_v57 = vadd.f32 %v397_v50, %v382_v56 }
 0x2d6   : >> { %v435_v60 = vsel %vm434_vm8, 0.0, %v431_v55 }
 0x2d7   : >> { %v416_v58 = vadd.f32 %v414_v53, %v399_v54  ;;  %v415_v59 = vadd.f32 %v414_v53, %v398_v57 }
 0x2d9   : >> { %v437_v61 = vadd.f32 %v431_v55, %v416_v58  ;;  %v436_v62 = vadd.f32 %v435_v60, %v415_v59 }
 0x2db   : >> { %438 = vadd.xlane.f32.xlu0 %v437_v61 }
 0x2df   : >> { %446 = vadd.xlane.f32.xlu0 %v436_v62 }
 0x368   : >> { %v439_v63 = vpop.xlane.xlu0 %438 }
 0x369   : >> { %v440_v0 = vrot.slane %v439_v63, 4 }
 0x36b   : >> { %v441_v1 = vadd.f32 %v440_v0, %v439_v63 }
 0x36c   : >> { %v447_v2 = vpop.xlane.xlu0 %446 }
 0x36d   : >> { %v442_v3 = vrot.slane %v441_v1, 2  ;;  %v448_v4 = vrot.slane %v447_v2, 4 }
 0x36f   : >> { %v449_v5 = vadd.f32 %v448_v4, %v447_v2  ;;  %v443_v8 = vadd.f32 %v442_v3, %v441_v1 }
 0x371   : >> { %v450_v9 = vrot.slane %v449_v5, 2  ;;  %v444_v11 = vrot.slane %v443_v8, 1 }
 0x373   : >> { %v451_v10 = vadd.f32 %v450_v9, %v449_v5  ;;  %v445_v14 = vadd.f32 %v444_v11, %v443_v8 }
 0x375   : >> { %v452_v12 = vrot.slane %v451_v10, 1 }
 0x377   : >> { %v453_v13 = vadd.f32 %v452_v12, %v451_v10 }
 0x379   : >> { %1556 = vpush %v453_v13 }
 0x37a   : >> { %1558 = vpush %v445_v14 }
 0x3aa   : >> { %s1557_s20 = spop %1556 }
 0x3ab   : >> { %s1559_s15 = spop %1558 }
 0x3ac   : >> { %s456_s24 = smul.f32 1e-10, %s1559_s15 }
 0x3ae   : >> { %p457_p11 = scmp.le.f32.partialorder %s1557_s20, %s456_s24 }
 0x3b0   : >> { %p459_p12 = por %p458_p10, %p457_p11 }
 0x3b2   : > { %907 = sbr.rel (!%p459_p12) target bundleno = 278 (0x116), region = 473 }
 0x3b9 PF: > { %s912_s23 = smov [#allocation20]  ;;  %v916_v6 = vmov %v1761_v6  ;;  %v919_v7 = vmov %v1763_v7  ;;  %v967_v15 = vld [vmem:[#allocation12] sm:$0x3]  ;;  %v973_v16 = vld [vmem:[#allocation14] sm:$0x3]  ;;  %s2043_s17 = scalar_lea.vmem [#allocation13], %s1757_s28 }
 0x3ba   : > { %v936_v6 = vmov %v1761_v6  ;;  %v939_v7 = vmov %v1763_v7  ;;  %v920_v17 = vld [vmem:[%s912_s23] sm:$0x3]  ;;  %vm923_vm9 = vcmp.eq.s32.totalorder %v919_v7, %v916_v6  ;;  %969 = vst [vmem:[%s2043_s17] sm:$0x3] %v967_v15  ;;  %s2044_s27 = scalar_lea.vmem [#allocation15], %s1757_s28  ;;  %s932_s29 = smov [#allocation23] }
 0x3bb   : > { %vm943_vm10 = vcmp.eq.s32.totalorder %v939_v7, %v936_v6  ;;  %975 = vst [vmem:[%s2044_s27] sm:$0x3] %v973_v16  ;;  %v979_v18 = vld [vmem:[#allocation16] sm:$0x3]  ;;  %v924_v19 = vsel %vm923_vm9, %v920_v17, 0.0  ;;  %s2045_s16 = scalar_lea.vmem [#allocation17], %s1757_s28  ;;  %s2046_s30 = scalar_lea.vmem [#allocation19], %s1757_s28 }
 0x3bc   : > { %981 = vst [vmem:[%s2045_s16] sm:$0x3] %v979_v18  ;;  %v985_v20 = vld [vmem:[#allocation18] sm:$0x3]  ;;  %v925_v21 = vrot.slane %v924_v19, 4  ;;  %v940_v22 = vld [vmem:[%s932_s29] sm:$0x3] }
 0x3bd   : > { %987 = vst [vmem:[%s2046_s30] sm:$0x3] %v985_v20  ;;  %v944_v23 = vsel %vm943_vm10, %v940_v22, 0.0  ;;  %s908_s21 = sand.u32 7, %s1720_s12   ;;  %s2047_s11 = scalar_lea.vmem [#allocation9], %s1759_s18 }
 0x3be   : > { %v926_v24 = vadd.f32 %v925_v21, %v924_v19  ;;  %v945_v25 = vrot.slane %v944_v23, 4  ;;  %s909_s25 = scalar_lea.vmem [#allocation8], %s908_s21  ;;  %s911_s26 = scalar_lea.vmem [#allocation10], %s908_s21 }
 0x3bf   : > { %s913_s25 = smov %s909_s25  ;;  %s933_s26 = smov %s911_s26 }
 0x3c0   : > { %v927_v26 = vrot.slane %v926_v24, 2  ;;  %v946_v6 = vadd.f32 %v945_v25, %v944_v23  ;;  %s2048_s22 = scalar_lea.vmem [#allocation11], %s1759_s18  ;;  %s1015_s14 = sshrl.u32 (%p1734_p3), %s1720_s12, 3 }
 0x3c1   : > { %s2049_s20 = scalar_lea.vmem (%p1734_p3), [#allocation9], %s1759_s18  ;;  %s1544_s15 = sshll.u32 (%p1734_p3), %s1015_s14, 1 }
 0x3c2   : > { %v928_v7 = vadd.f32 %v927_v26, %v926_v24  ;;  %v947_v27 = vrot.slane %v946_v6, 2  ;;  %s1017_s17 = scalar_lea.vmem (%p1734_p3), %s2034_s4, %s1544_s15 }
 0x3c4   : > { %v929_v28 = vrot.slane %v928_v7, 1  ;;  %v948_v29 = vadd.f32 %v947_v27, %v946_v6 }
 0x3c6   : > { %v930_v30 = vadd.f32 %v929_v28, %v928_v7  ;;  %v949_v31 = vrot.slane %v948_v29, 1 }
 0x3c8   : > { %931 = vst [vmem:[%s913_s25] sm:$0x1] %v930_v30  ;;  %v950_v32 = vadd.f32 %v949_v31, %v948_v29 }
 0x3ca   : > { %951 = vst [vmem:[%s933_s26] sm:$0x1] %v950_v32 }
 0x3cc   : > { %1014 = sbr.rel (!%p1734_p3) target bundleno = 985 (0x3d9), region = 158 }
 0x3cf   : > { %v955_v33 = vld [vmem:[#allocation8] sm:$0x3] }
 0x3d0   : > { %957 = vst [vmem:[%s2047_s11] sm:$0x3] %v955_v33 }
 0x3d1   : > { %v961_v34 = vld [vmem:[#allocation10] sm:$0x3] }
 0x3d2   : > { %963 = vst [vmem:[%s2048_s22] sm:$0x3] %v961_v34 }
 0x3d7   : > { %v1033_v35 = vld [vmem:[%s2049_s20] sm:$0x3] }
 0x3d8   : > { %1034 = vst [vmem:[%s1017_s17] sm:$0x3] %v1033_v35 }
 0x3d9 PF: > { %1051 = sbr.rel (!%p1734_p3) target bundleno = 993 (0x3e1), region = 192  ;;  %s1052_s27 = sshrl.u32 (%p1734_p3), %s1720_s12, 3 }
 0x3da   : > { %s2050_s29 = scalar_lea.vmem (%p1734_p3), [#allocation11], %s1759_s18  ;;  %s1545_s16 = sshll.u32 (%p1734_p3), %s1052_s27, 1 }
 0x3db   : > { %s1054_s25 = scalar_lea.vmem (%p1734_p3), %s2035_s5, %s1545_s16 }
 0x3df   : > { %v1070_v36 = vld [vmem:[%s2050_s29] sm:$0x3] (%p1734_p3) }
 0x3e0   : > { %1071 = vst [vmem:[%s1054_s25] sm:$0x3] %v1070_v36 }
 0x3e1 PF: > { %s1546_s26 = sshll.u32 %s1720_s12, 1  ;;  %s2051_s19 = scalar_lea.vmem [#allocation13], %s1757_s28 }
 0x3e2   : > { %v1103_v37 = vld [vmem:[%s2051_s19] sm:$0x3]  ;;  %s2052_s11 = scalar_lea.vmem [#allocation15], %s1757_s28  ;;  %s1087_s14 = scalar_lea.vmem %s2036_s6, %s1546_s26 }
 0x3e3   : > { %v1136_v38 = vld [vmem:[%s2052_s11] sm:$0x3]  ;;  %s1120_s24 = scalar_lea.vmem %s2037_s7, %s1546_s26  ;;  %s2053_s23 = scalar_lea.vmem [#allocation17], %s1757_s28  ;;  %1104 = vst [vmem:[%s1087_s14] sm:$0x3] %v1103_v37 }
 0x3e4   : > { %v1169_v39 = vld [vmem:[%s2053_s23] sm:$0x3]  ;;  %s2054_s17 = scalar_lea.vmem [#allocation19], %s1757_s28  ;;  %1137 = vst [vmem:[%s1120_s24] sm:$0x3] %v1136_v38  ;;  %s1153_s29 = scalar_lea.vmem %s2038_s8, %s1546_s26 }
 0x3e5   : > { %v1202_v40 = vld [vmem:[%s2054_s17] sm:$0x3]  ;;  %s1186_s21 = scalar_lea.vmem %s2039_s9, %s1546_s26  ;;  %1170 = vst [vmem:[%s1153_s29] sm:$0x3] %v1169_v39 }
 0x3e6   : > { %1203 = vst [vmem:[%s1186_s21] sm:$0x3] %v1202_v40 }
 0x3e7 PF: > { %s2055_s25 = sld [smem:[#allocation33_spill]]  ;;  %p13_p13 = scmp.ge.s32.totalorder %s1723_s13, 4  }
 0x3e8   : > { %s2056_s30 = smov %s1637_s10  ;;  %s2058_s11 = smov %s1723_s13 }
 0x3e9   :  { %15 = sbr.rel (!%p13_p13) target bundleno = 2 (0x2), region = 484 }
 0x3ed   : > { %s2057_s10 = smov %s2055_s25 }

// kernel: reverse
= control target key start
LH: loop header
LB: loop body
LE: loop exit
PB: predicated region body
PF: predicated region fallthrough
CT: control target
= control target key end

     0   :  { %v2_v0 = vlaneseq  ;;  %s105_s0 = inlined_call_operand.vmem [shape: f32[2,3], index: 0, kind: input, shape index: {}]   ;;  %s106_s1 = inlined_call_operand.vmem [shape: f32[2,3], index: 1, kind: output, shape index: {}]  }
   0x2   :  { %v3_v1 = vsub.s32 2, %v2_v0 }
   0x4   :  { %4 = vset.pattern.permute.xlu0 %v3_v1 }
   0x5   :  { %v20_v2 = vld [vmem:[%s105_s0] sm:$0x3] }
   0x6   :  { %21 = vst [vmem:[#allocation1] sm:$0x3] %v20_v2 }
   0xd   :  { %v38_v3 = vld [vmem:[#allocation1] sm:$0x3] }
   0xe   :  { %39 = vst [vmem:[#allocation0] sm:$0x3] %v38_v3 }
  0x15   :  { %v40_v4 = vld [vmem:[#allocation0] sm:$0xff] }
  0x16   :  { %41 = vperm.xlu0 %4, %v40_v4  }
  0x95   :  { %v42_v5 = vpop.permute.xlu0 %41 }
  0x96   :  { %43 = vst [vmem:[#allocation2] sm:$0xff] %v42_v5 }
  0x9d   :  { %v47_v6 = vld [vmem:[#allocation2] sm:$0x3] }
  0x9e   :  { %49 = vst [vmem:[#allocation3] sm:$0x3] %v47_v6 }
  0xa5   :  { %v65_v7 = vld [vmem:[#allocation3] sm:$0x3] }
  0xa6   :  { %66 = vst [vmem:[%s106_s1] sm:$0x3] %v65_v7 }

// kernel: model_forward.1
= control target key start
LH: loop header
LB: loop body
LE: loop exit
PB: predicated region body
PF: predicated region fallthrough
CT: control target
= control target key end

     0   :  { %s3735_s0 = inlined_call_operand.vmem [shape: f32[2,64,3], index: 0, kind: input, shape index: {}]   ;;  %s3736_s1 = inlined_call_operand.vmem [shape: f32[2,64,3], index: 1, kind: input, shape index: {}]   ;;  %s3737_s2 = inlined_call_operand.vmem [shape: f32[2,1,128], index: 2, kind: input, shape index: {}]   ;;  %s3738_s3 = inlined_call_operand.vmem [shape: f32[3,128], index: 3, kind: input, shape index: {}]   ;;  %s3739_s4 = inlined_call_operand.vmem [shape: bf16[128,512], index: 4, kind: input, shape index: {}]   ;;  %s3740_s5 = inlined_call_operand.vmem [shape: f32[1,512], index: 5, kind: input, shape index: {}]   ;;  %s3741_s6 = inlined_call_operand.hbm [shape: f32[2,64,512], index: 6, kind: output, shape index: {0}]   ;;  %s3742_s7 = inlined_call_operand.hbm [shape: f32[2,64,512], index: 7, kind: output, shape index: {1}]   ;;  %s3743_s8 = inlined_call_operand.vmem [shape: f32[2,3,3], index: 8, kind: output, shape index: {2}]   ;;  %s3744_s9 = inlined_call_operand.vmem [shape: f32[2,1,3], index: 9, kind: output, shape index: {3}]   ;;  %s3745_s10 = inlined_call_operand.vmem [shape: f32[2,1,3], index: 10, kind: output, shape index: {4}]  }
   0x1   :  { %3747 = sst [smem:[#allocation8_spill]] %s3735_s0 }
   0x2   :  { %3748 = sst [smem:[#allocation9_spill]] %s3736_s1 }
   0x3   :  { %3749 = sst [smem:[#allocation10_spill]] %s3737_s2 }
   0x4   :  { %3750 = sst [smem:[#allocation11_spill]] %s3738_s3 }
   0x5   :  { %3751 = sst [smem:[#allocation12_spill]] %s3739_s4 }
   0x6   :  { %16 = vsyncpa [#allocation3], 0 }
   0x7   :  { %18 = vsyncpa [#allocation3 + $0x1], 0 }
   0x8   :  { %19 = vsyncpa [#allocation5], 0 }
   0x9   :  { %21 = vsyncpa [#allocation5 + $0x1], 0  ;;  %s2733_s13 = smov 0   ;;  %s2735_s14 = smov 0  }
   0xa   :  { %s2737_s15 = smov 0   ;;  %s2739_s16 = smov 0  }
   0xb LB: > { %s2754_s17 = sadd.s32 4294967295, %s2666_s16   ;;  %s2205_s18 = sadd.s32 4294967294, %s2666_s16   ;;  %s2666_s16 = sphi %s2739_s16, %s3777_s16   ;;  %s2662_s15 = sphi %s2737_s15, %s3776_s15   ;;  %s2658_s14 = sphi %s2735_s14, %s3775_s14   ;;  %s2654_s13 = sphi %s2733_s13, %s3774_s13  }
   0xc   : > { %s2758_s19 = sadd.s32 1, %s2666_s16   ;;  %s175_s20 = sadd.s32 1, %s2662_s15 }
   0xd   : > { %s172_s21 = ssub.s32 %s2666_s16, %s2758_s19  ;;  %p185_p0 = scmp.ne.s32.totalorder %s2662_s15, %s2658_s14 }
   0xe   : > { %p173_p1 = scmp.eq.s32.totalorder %s172_s21, 0  ;;  %p186_p2 = scmp.eq.s32.totalorder %s2754_s17, 1 }
   0xf   : > { %p191_p3 = scmp.ne.s32.totalorder %s2658_s14, %s2654_s13  ;;  %p192_p4 = scmp.eq.s32.totalorder %s2205_s18, 1 }
  0x10   : > { %s2769_s22 = scalar_select %p173_p1, %s2662_s15, %s175_s20  }
  0x11   : > { %p2771_p5 = por %p186_p2, %p185_p0  ;;  %p2775_p6 = por %p192_p4, %p191_p3 }
  0x12   : > { %p2208_p7 = scmp.ge.s32.totalorder %s2666_s16, 1  ;;  %p345_p8 = scmp.lt.s32.totalorder %s2666_s16, 3 }
  0x14   : > { %p346_p9 = pnand %p2208_p7, %p345_p8 }
  0x15   : > { %p406_p10 = scmp.lt.s32.totalorder (!%p346_p9), %s2754_s17, 1  ;;  %vm448_vm0 = vcmask (!%p346_p9), 23552   ;;  %s3754_s0 = sld [smem:[#allocation8_spill]] (!%p346_p9)  ;;  %vm1616_vm1 = vcmask (!%p346_p9), 523264   ;;  %vm1971_vm2 = vcmask (!%p346_p9), 16384   ;;  %vm2672_vm3 = vmmov (!%p346_p9), 0  }
  0x16   : > { %349 = sbr.rel (%p346_p9) target bundleno = 1860 (0x744), region = 44  ;;  %s3755_s1 = sld [smem:[#allocation9_spill]] (!%p346_p9) }
  0x17   : > { %s3756_s4 = sld [smem:[#allocation12_spill]] (!%p346_p9)  ;;  %s3757_s3 = sld [smem:[#allocation11_spill]] (!%p346_p9) }
  0x18   : > { %s3758_s2 = sld [smem:[#allocation10_spill]] (!%p346_p9)  ;;  %s3746_s28 = sshll.u32 (!%p346_p9), %s2754_s17, 12 }
  0x1d   : > { %s2783_s25 = scalar_select %p406_p10, %s2754_s17, 1 }
  0x1f   : > { %s2266_s26 = sshll.u32 %s2783_s25, 6  ;;  %s428_s27 = scalar_lea.vmem %s3745_s10, %s2783_s25 }
  0x20   : > { %s410_s29 = scalar_lea.vmem %s3754_s0, %s2266_s26  ;;  %s2792_s12 = scalar_lea.vmem %s3755_s1, %s2266_s26 }
  0x21   : > { %v430_v0 = vld [vmem:[%s410_s29] sm:$0xff]  ;;  %v431_v1 = vld [vmem:[%s410_s29 + $0x8] sm:$0xff]  ;;  %v432_v2 = vld [vmem:[%s410_s29 + $0x10] sm:$0xff]  ;;  %s3220_s26 = sand.u32 1, %s2658_s14  }
  0x22   : > { %v433_v3 = vld [vmem:[%s410_s29 + $0x18] sm:$0xff]  ;;  %v449_v4 = vsel %vm448_vm0, %v430_v0, 0.0  ;;  %v450_v5 = vsel %vm448_vm0, %v431_v1, 0.0  ;;  %v452_v6 = vsel %vm448_vm0, %v432_v2, 0.0  ;;  %v434_v7 = vld [vmem:[%s410_s29 + $0x20] sm:$0xff]  ;;  %v2802_v11 = vld [vmem:[%s2792_s12 + $0x8] sm:$0xff] }
  0x23   : > { %v451_v8 = vadd.f32 %v450_v5, %v449_v4  ;;  %v2798_v9 = vld [vmem:[%s2792_s12] sm:$0xff]  ;;  %v454_v10 = vsel %vm448_vm0, %v433_v3, 0.0  ;;  %v2805_v12 = vld [vmem:[%s2792_s12 + $0x10] sm:$0xff]  ;;  %v2808_v13 = vld [vmem:[%s2792_s12 + $0x18] sm:$0xff]  ;;  %v524_v19 = vsel %vm448_vm0, %v2802_v11, 0.0  ;;  %v456_v21 = vsel %vm448_vm0, %v434_v7, 0.0 }
  0x24   : > { %v523_v14 = vsel %vm448_vm0, %v2798_v9, 0.0  ;;  %v435_v15 = vld [vmem:[%s410_s29 + $0x28] sm:$0xff]  ;;  %v436_v16 = vld [vmem:[%s410_s29 + $0x30] sm:$0xff]  ;;  %v2813_v18 = vld [vmem:[%s2792_s12 + $0x20] sm:$0xff]  ;;  %v526_v20 = vsel %vm448_vm0, %v2805_v12, 0.0  ;;  %v528_v26 = vsel %vm448_vm0, %v2808_v13, 0.0 }
  0x25   : > { %v453_v17 = vadd.f32 %v452_v6, %v451_v8  ;;  %v2821_v22 = vld [vmem:[%s2792_s12 + $0x28] sm:$0xff]  ;;  %v525_v23 = vadd.f32 %v524_v19, %v523_v14  ;;  %v437_v24 = vld [vmem:[%s410_s29 + $0x38] sm:$0xff]  ;;  %v458_v27 = vsel %vm448_vm0, %v435_v15, 0.0  ;;  %v2827_v28 = vld [vmem:[%s2792_s12 + $0x30] sm:$0xff]  ;;  %v530_v31 = vsel %vm448_vm0, %v2813_v18, 0.0  ;;  %s2209_s29 = sshll.u32 %s3220_s26, 8 }
  0x26   : > { %v460_v32 = vsel %vm448_vm0, %v436_v16, 0.0  ;;  %v532_v35 = vsel %vm448_vm0, %v2821_v22, 0.0  ;;  %v462_v36 = vsel %vm448_vm0, %v437_v24, 0.0  ;;  %v445_v37 = vld [vmem:[%s2792_s12 + $0x38] sm:$0xff]  ;;  %v534_v40 = vsel %vm448_vm0, %v2827_v28, 0.0  ;;  %s3253_s30 = scalar_lea.vmem [#allocation2], %s2209_s29 }
  0x27   : > { %v455_v25 = vadd.f32 %v454_v10, %v453_v17  ;;  %v527_v29 = vadd.f32 %v526_v20, %v525_v23  ;;  %v536_v43 = vsel %vm448_vm0, %v445_v37, 0.0  ;;  %s3427_s11 = scalar_lea.vmem [#allocation4], %s2209_s29  ;;  %s2003_s29 = sshll.u32 %s3253_s30, 4  ;;  %s3648_s29 = int_to_ptr.vmem [resolvable:$true] %s2003_s29 }
  0x29   : > { %v457_v30 = vadd.f32 %v456_v21, %v455_v25  ;;  %v529_v33 = vadd.f32 %v528_v26, %v527_v29 }
  0x2b   : > { %v459_v34 = vadd.f32 %v458_v27, %v457_v30  ;;  %v531_v38 = vadd.f32 %v530_v31, %v529_v33 }
  0x2d   : > { %v461_v39 = vadd.f32 %v460_v32, %v459_v34  ;;  %v533_v41 = vadd.f32 %v532_v35, %v531_v38 }
  0x2f   : > { %v463_v42 = vadd.f32 %v462_v36, %v461_v39  ;;  %v535_v44 = vadd.f32 %v534_v40, %v533_v41 }
  0x31   : > { %v464_v45 = vrot.slane %v463_v42, 4  ;;  %v537_v46 = vadd.f32 %v536_v43, %v535_v44 }
  0x33   : > { %v465_v47 = vadd.f32 %v464_v45, %v463_v42  ;;  %v538_v48 = vrot.slane %v537_v46, 4 }
  0x35   : > { %v466_v49 = vrot.slane %v465_v47, 2  ;;  %v539_v50 = vadd.f32 %v538_v48, %v537_v46 }
  0x37   : > { %v467_v51 = vadd.f32 %v466_v49, %v465_v47  ;;  %v540_v52 = vrot.slane %v539_v50, 2 }
  0x39   : > { %v468_v53 = vrot.slane %v467_v51, 1  ;;  %v541_v54 = vadd.f32 %v540_v52, %v539_v50 }
  0x3b   : > { %v469_v55 = vadd.f32 %v468_v53, %v467_v51  ;;  %v542_v57 = vrot.slane %v541_v54, 1 }
  0x3d   : > { %v2839_v56 = vmul.f32 0.015625, %v469_v55  ;;  %v543_v8 = vadd.f32 %v542_v57, %v541_v54 }
  0x3f   : > { %v2842_v58 = vsub.f32 %v430_v0, %v2839_v56  ;;  %v2845_v59 = vsub.f32 %v431_v1, %v2839_v56  ;;  %v2848_v60 = vsub.f32 %v432_v2, %v2839_v56  ;;  %v2851_v61 = vsub.f32 %v433_v3, %v2839_v56 }
  0x40   : > { %v2854_v62 = vsub.f32 %v434_v7, %v2839_v56  ;;  %v2857_v63 = vsub.f32 %v435_v15, %v2839_v56  ;;  %v2860_v4 = vsub.f32 %v436_v16, %v2839_v56  ;;  %v2863_v0 = vsub.f32 %v437_v24, %v2839_v56 }
  0x41   : > { %v480_v1 = vand.u32 2147483647, %v2842_v58  ;;  %v481_v2 = vand.u32 2147483647, %v2845_v59  ;;  %v482_v5 = vand.u32 2147483647, %v2848_v60 }
  0x42   : > { %v483_v3 = vand.u32 2147483647, %v2851_v61  ;;  %v484_v6 = vand.u32 2147483647, %v2854_v62  ;;  %v485_v7 = vand.u32 2147483647, %v2857_v63 }
  0x43   : > { %v486_v10 = vand.u32 2147483647, %v2860_v4  ;;  %v487_v14 = vand.u32 2147483647, %v2863_v0  ;;  %v488_v15 = vsel %vm448_vm0, %v480_v1, -inf  ;;  %v489_v16 = vsel %vm448_vm0, %v481_v2, -inf }
  0x44   : > { %v490_v17 = vsel %vm448_vm0, %v482_v5, -inf  ;;  %v491_v19 = vsel %vm448_vm0, %v483_v3, -inf  ;;  %v492_v20 = vsel %vm448_vm0, %v484_v6, -inf  ;;  %v494_v21 = vsel %vm448_vm0, %v485_v7, -inf }
  0x45   : > { %v493_v23 = vmax.f32 %v488_v15, %v492_v20  ;;  %v495_v24 = vmax.f32 %v489_v16, %v494_v21  ;;  %v496_v25 = vsel %vm448_vm0, %v486_v10, -inf  ;;  %v498_v26 = vsel %vm448_vm0, %v487_v14, -inf }
  0x46   : > { %v497_v27 = vmax.f32 %v490_v17, %v496_v25  ;;  %v499_v29 = vmax.f32 %v491_v19, %v498_v26  ;;  %v544_v30 = vmul.f32 0.015625, %v543_v8  ;;  %v2668_v2 = vmov 1   ;;  %v2480_v26 = vld [vmem:[%s3756_s4 + $0x4] ss:$16 sps:$4 sm:$0xff]  }
  0x47   : > { %v500_v31 = vmax.f32 %v493_v23, %v495_v24  ;;  %2445 = vset.pattern.permute.xlu0 %v2668_v2  ;;  %v2669_v5 = vmov 0   ;;  %1156 = vmatprep.subr.bf16.mxu0 %v2480_v26 }
  0x48   : > { %v501_v32 = vmax.f32 %v497_v27, %v499_v29  ;;  %v2882_v33 = vsub.f32 %v2798_v9, %v544_v30  ;;  %v2885_v34 = vsub.f32 %v2802_v11, %v544_v30  ;;  %v2888_v35 = vsub.f32 %v2805_v12, %v544_v30  ;;  %2444 = vset.pattern.permute.xlu1 %v2669_v5  ;;  %v2482_v27 = vld [vmem:[%s3756_s4 + $0xc] ss:$16 sps:$4 sm:$0xff]   ;;  %v2484_v29 = vld [vmem:[%s3756_s4] ss:$16 sps:$4 sm:$0xff]  }
  0x49   : > { %v2891_v36 = vsub.f32 %v2808_v13, %v544_v30  ;;  %v2894_v38 = vsub.f32 %v2813_v18, %v544_v30  ;;  %v2897_v39 = vsub.f32 %v2821_v22, %v544_v30  ;;  %v2900_v40 = vsub.f32 %v2827_v28, %v544_v30  ;;  %1188 = vmatprep.mubr.bf16.mxu0 %v2669_v5 }
  0x4a   : > { %v502_v9 = vmax.f32 %v500_v31, %v501_v32  ;;  %v2902_v41 = vsub.f32 %v445_v37, %v544_v30  ;;  %v553_v11 = vand.u32 2147483647, %v2882_v33  ;;  %v554_v12 = vand.u32 2147483647, %v2885_v34  ;;  %1301 = vmatprep.mubr.bf16.mxu1 %v2669_v5  ;;  %v2485_v30 = vld [vmem:[%s3756_s4 + $0x8] ss:$16 sps:$4 sm:$0xff]   ;;  %1269 = vmatprep.subr.bf16.mxu1 %v2482_v27 }
  0x4b   : > { %v555_v42 = vand.u32 2147483647, %v2888_v35  ;;  %v556_v13 = vand.u32 2147483647, %v2891_v36  ;;  %v557_v18 = vand.u32 2147483647, %v2894_v38  ;;  %1157 = vmatpush1.bf16.msra.mxu0 %v2484_v29  ;;  %1270 = vmatpush1.bf16.msra.mxu1 %v2485_v30 }
  0x4c   : > { %503 = vmax.xlane.f32.xlu0 %v502_v9  ;;  %v558_v22 = vand.u32 2147483647, %v2897_v39  ;;  %v559_v43 = vand.u32 2147483647, %v2900_v40  ;;  %v560_v28 = vand.u32 2147483647, %v2902_v41 }
  0x4d   : > { %v561_v37 = vsel %vm448_vm0, %v553_v11, -inf  ;;  %v562_v44 = vsel %vm448_vm0, %v554_v12, -inf  ;;  %v563_v45 = vsel %vm448_vm0, %v555_v42, -inf  ;;  %v564_v46 = vsel %vm448_vm0, %v556_v13, -inf  ;;  %v2486_v9 = vld [vmem:[%s3756_s4 + $0x24] ss:$16 sps:$4 sm:$0xff]  }
  0x4e   : > { %v565_v47 = vsel %vm448_vm0, %v557_v18, -inf  ;;  %v567_v48 = vsel %vm448_vm0, %v558_v22, -inf  ;;  %v569_v49 = vsel %vm448_vm0, %v559_v43, -inf  ;;  %v571_v50 = vsel %vm448_vm0, %v560_v28, -inf  ;;  %v2488_v11 = vld [vmem:[%s3756_s4 + $0x2c] ss:$16 sps:$4 sm:$0xff]   ;;  %1158 = vmatprep.subr.bf16.mxu0 %v2486_v9 }
  0x4f   : > { %v566_v51 = vmax.f32 %v561_v37, %v565_v47  ;;  %v568_v52 = vmax.f32 %v562_v44, %v567_v48  ;;  %v570_v53 = vmax.f32 %v563_v45, %v569_v49  ;;  %v572_v54 = vmax.f32 %v564_v46, %v571_v50  ;;  %v2490_v12 = vld [vmem:[%s3756_s4 + $0x20] ss:$16 sps:$4 sm:$0xff]   ;;  %v2491_v42 = vld [vmem:[%s3756_s4 + $0x28] ss:$16 sps:$4 sm:$0xff]   ;;  %1271 = vmatprep.subr.bf16.mxu1 %v2488_v11  ;;  %v2492_v22 = vld [vmem:[%s3756_s4 + $0x44] ss:$16 sps:$4 sm:$0xff]  }
  0x50   : > { %1159 = vmatpush1.bf16.msra.mxu0 %v2490_v12  ;;  %1272 = vmatpush1.bf16.msra.mxu1 %v2491_v42  ;;  %v2494_v43 = vld [vmem:[%s3756_s4 + $0x4c] ss:$16 sps:$4 sm:$0xff]   ;;  %v2496_v37 = vld [vmem:[%s3756_s4 + $0x40] ss:$16 sps:$4 sm:$0xff]   ;;  %v2497_v44 = vld [vmem:[%s3756_s4 + $0x48] ss:$16 sps:$4 sm:$0xff]  }
  0x51   : > { %v573_v55 = vmax.f32 %v566_v51, %v568_v52  ;;  %v574_v57 = vmax.f32 %v570_v53, %v572_v54  ;;  %1160 = vmatprep.subr.bf16.mxu0 %v2492_v22  ;;  %1273 = vmatprep.subr.bf16.mxu1 %v2494_v43  ;;  %v2498_v45 = vld [vmem:[%s3756_s4 + $0x64] ss:$16 sps:$4 sm:$0xff]   ;;  %v2500_v46 = vld [vmem:[%s3756_s4 + $0x6c] ss:$16 sps:$4 sm:$0xff]   ;;  %v2670_v47 = vmov 2  }
  0x52   : > { %v2502_v48 = vld [vmem:[%s3756_s4 + $0x60] ss:$16 sps:$4 sm:$0xff]   ;;  %v2503_v49 = vld [vmem:[%s3756_s4 + $0x68] ss:$16 sps:$4 sm:$0xff]   ;;  %v2504_v50 = vld [vmem:[%s3756_s4 + $0x84] ss:$16 sps:$4 sm:$0xff]  }
  0x53   : > { %v575_v1 = vmax.f32 %v573_v55, %v574_v57  ;;  %v2506_v51 = vld [vmem:[%s3756_s4 + $0x8c] ss:$16 sps:$4 sm:$0xff]   ;;  %v2508_v53 = vld [vmem:[%s3756_s4 + $0x80] ss:$16 sps:$4 sm:$0xff]   ;;  %v2509_v54 = vld [vmem:[%s3756_s4 + $0x88] ss:$16 sps:$4 sm:$0xff]  }
  0x54   : > { %1161 = vmatpush1.bf16.msra.mxu0 %v2496_v37  ;;  %1274 = vmatpush1.bf16.msra.mxu1 %v2497_v44  ;;  %v2510_v55 = vld [vmem:[%s3756_s4 + $0xa4] ss:$16 sps:$4 sm:$0xff]   ;;  %v2512_v57 = vld [vmem:[%s3756_s4 + $0xac] ss:$16 sps:$4 sm:$0xff]  }
  0x55   : > { %576 = vmax.xlane.f32.xlu0 %v575_v1  ;;  %1162 = vmatprep.subr.bf16.mxu0 %v2498_v45  ;;  %v2514_v1 = vld [vmem:[%s3756_s4 + $0xa0] ss:$16 sps:$4 sm:$0xff]  }
  0x56   : > { %1275 = vmatprep.subr.bf16.mxu1 %v2500_v46 }
  0x58   : > { %1163 = vmatpush1.bf16.msra.mxu0 %v2502_v48  ;;  %1276 = vmatpush1.bf16.msra.mxu1 %v2503_v49 }
  0x59   : > { %1164 = vmatprep.subr.bf16.mxu0 %v2504_v50  ;;  %1277 = vmatprep.subr.bf16.mxu1 %v2506_v51 }
  0x5c   : > { %1165 = vmatpush1.bf16.msra.mxu0 %v2508_v53  ;;  %1278 = vmatpush1.bf16.msra.mxu1 %v2509_v54 }
  0x5d   : > { %1166 = vmatprep.subr.bf16.mxu0 %v2510_v55  ;;  %1279 = vmatprep.subr.bf16.mxu1 %v2512_v57 }
  0x60   : > { %1167 = vmatpush1.bf16.msra.mxu0 %v2514_v1 }
  0xd9   : > { %v504_v3 = vpop.xlane.xlu0 %503 }
  0xda   : > { %v505_v6 = vrot.slane %v504_v3, 4 }
  0xdc   : > { %v506_v7 = vmax.f32 %v504_v3, %v505_v6  ;;  %v2515_v3 = vld [vmem:[%s3756_s4 + $0xa8] ss:$16 sps:$4 sm:$0xff]  }
  0xdd   : > { %1280 = vmatpush1.bf16.msra.mxu1 %v2515_v3 }
  0xde   : > { %v507_v8 = vrot.slane %v506_v7, 2 }
  0xe0   : > { %v508_v10 = vmax.f32 %v506_v7, %v507_v8  ;;  %v2516_v8 = vld [vmem:[%s3756_s4 + $0xc4] ss:$16 sps:$4 sm:$0xff]  }
  0xe1   : > { %1168 = vmatprep.subr.bf16.mxu0 %v2516_v8 }
  0xe2   : > { %v509_v14 = vrot.slane %v508_v10, 1  ;;  %v577_v15 = vpop.xlane.xlu0 %576 }
  0xe3   : > { %v578_v16 = vrot.slane %v577_v15, 4 }
  0xe4   : > { %v510_v17 = vmax.f32 %v508_v10, %v509_v14  ;;  %v2518_v10 = vld [vmem:[%s3756_s4 + $0xcc] ss:$16 sps:$4 sm:$0xff]  }
  0xe5   : > { %v579_v19 = vmax.f32 %v577_v15, %v578_v16  ;;  %v2520_v15 = vld [vmem:[%s3756_s4 + $0xc0] ss:$16 sps:$4 sm:$0xff]   ;;  %1281 = vmatprep.subr.bf16.mxu1 %v2518_v10 }
  0xe6   : > { %2388 = vpush %v510_v17  ;;  %v2521_v17 = vld [vmem:[%s3756_s4 + $0xc8] ss:$16 sps:$4 sm:$0xff]   ;;  %1169 = vmatpush1.bf16.msra.mxu0 %v2520_v15 }
  0xe7   : > { %v580_v20 = vrot.slane %v579_v19, 2  ;;  %1282 = vmatpush1.bf16.msra.mxu1 %v2521_v17 }
  0xe9   : > { %v581_v21 = vmax.f32 %v579_v19, %v580_v20  ;;  %v2524_v19 = vld [vmem:[%s3756_s4 + $0xec] ss:$16 sps:$4 sm:$0xff]   ;;  %v2526_v20 = vld [vmem:[%s3756_s4 + $0xe0] ss:$16 sps:$4 sm:$0xff]  }
  0xea   : > { %1283 = vmatprep.subr.bf16.mxu1 %v2524_v19 }
  0xeb   : > { %v582_v23 = vrot.slane %v581_v21, 1 }
  0xed   : > { %v583_v24 = vmax.f32 %v581_v21, %v582_v23 }
  0xef   : > { %2390 = vpush %v583_v24  ;;  %v2527_v24 = vld [vmem:[%s3756_s4 + $0xe8] ss:$16 sps:$4 sm:$0xff]  }
  0xf0   : > { %1284 = vmatpush1.bf16.msra.mxu1 %v2527_v24 }
 0x117   : > { %s2389_s18 = spop %2388 }
 0x118   : > { %s512_s20 = sadd.f32 1e-08, %s2389_s18 }
 0x11a   : > { %v513_v25 = vstv %s512_s20  ;;  %s425_s20 = scalar_lea.vmem %s3744_s9, %s2783_s25 }
 0x11b   : > { %2528 = vrcp.f32 %v513_v25  ;;  %1972 = vst.msk [vmem:[%s425_s20] sm:$0x1] %vm1971_vm2, %v2839_v56  ;;  %s3646_s20 = scalar_lea.hbm %s3741_s6, %s3746_s28 }
 0x120   : > { %s2391_s18 = spop %2390 }
 0x121   : > { %s585_s0 = sadd.f32 1e-08, %s2391_s18 }
 0x123   : > { %v586_v28 = vstv %s585_s0  ;;  %s418_s0 = scalar_lea.vmem %s3758_s2, %s2783_s25 }
 0x124   : > { %2530 = vrcp.f32 %v586_v28  ;;  %v3138_v49 = vld [vmem:[%s418_s0] ss:$0 sm:$0xff]  ;;  %s2572_s0 = scalar_lea.vmem %s3648_s29, 4096 }
 0x125   : > { %v2936_v31 = vpop.eup %2528  ;;  %p2573_p11 = scmp.ne.s32.totalorder %s3648_s29, %s2572_s0 }
 0x126   : > { %v515_v32 = vmul.f32 %v2936_v31, %v2842_v58  ;;  %v2954_v13 = vmul.f32 %v2936_v31, %v2854_v62  ;;  %v516_v18 = vmul.f32 %v2936_v31, %v2845_v59  ;;  %v2994_v52 = vmul.f32 %v2936_v31, %v2863_v0 }
 0x127   : > { %v3019_v7 = vmul.f32 %v2936_v31, %v2860_v4  ;;  %v517_v16 = vmul.f32 %v2936_v31, %v2848_v60  ;;  %v518_v21 = vmul.f32 %v2936_v31, %v2851_v61  ;;  %p2574_p12 = pnand %p2573_p11, %p2771_p5 }
 0x128   : > { %649 = vperm.xlu0 %2445, %v515_v32   ;;  %598 = vperm.xlu1 %2444, %v515_v32  }
 0x129   : > { %p2575_p13 = pneg %p2574_p12 }
 0x12c   : > { %665 = vperm.xlu0 %2445, %v2954_v13   ;;  %603 = vperm.xlu1 %2444, %v516_v18  }
 0x12e   : > { %v2531_v6 = vpop.eup %2530 }
 0x12f   : > { %v3030_v14 = vmul.f32 %v2531_v6, %v2885_v34  ;;  %v2522_v34 = vld [vmem:[%s3756_s4 + $0xe4] ss:$16 sps:$4 sm:$0xff]   ;;  %v588_v23 = vmul.f32 %v2531_v6, %v2882_v33  ;;  %v591_v25 = vmul.f32 %v2531_v6, %v2891_v36  ;;  %v590_v33 = vmul.f32 %v2531_v6, %v2888_v35 }
 0x130   : > { %2453 = vset.pattern.permute.xlu0 %v2670_v47  ;;  %2446 = vset.pattern.permute.xlu1 %v2668_v2  ;;  %v3066_v26 = vmul.f32 %v2531_v6, %v2897_v39  ;;  %v592_v36 = vmul.f32 %v2531_v6, %v2894_v38  ;;  %v3075_v35 = vmul.f32 %v2531_v6, %v2902_v41 }
 0x131   : > { %717 = vperm.xlu0 %2453, %v2954_v13   ;;  %653 = vperm.xlu1 %2446, %v516_v18   ;;  %v520_v39 = vmul.f32 %v2936_v31, %v2857_v63  ;;  %v3082_v38 = vmul.f32 %v2531_v6, %v2900_v40  ;;  %v636_v40 = vlaneseq  ;;  %v447_v31 = vld [vmem:[%s3757_s3] sm:$0x7] }
 0x132   : > { %1170 = vmatprep.subr.bf16.mxu0 %v2522_v34 }
 0x133   : > { %1171 = vmatpush1.bf16.msra.mxu0 %v2526_v20  ;;  %v3104_v41 = vshrl.u32 %v636_v40, 7 }
 0x135   : > { %2456 = vset.pattern.permute.xlu0 %v2669_v5  ;;  %2447 = vset.pattern.permute.xlu1 %v2670_v47  ;;  %v638_v29 = vsub.s32 0, %v3104_v41  ;;  %v682_v30 = vsub.s32 1, %v3104_v41 }
 0x136   : > { %633 = vperm.xlu0 %2456, %v2994_v52   ;;  %701 = vperm.xlu1 %2447, %v515_v32  }
 0x137   : > { %v3114_v9 = vrot.slane %v447_v31, %v638_v29  ;;  %v3118_v11 = vrot.slane %v447_v31, %v682_v30 }
 0x13a   : > { %2458 = vset.pattern.permute.xlu0 %v2670_v47  ;;  %705 = vperm.xlu1 %2447, %v516_v18  }
 0x13b   : > { %725 = vperm.xlu0 %2458, %v3019_v7  }
 0x13e   : > { %2448 = vset.pattern.permute.xlu1 %v2669_v5 }
 0x13f   : > { %608 = vperm.xlu1 %2448, %v517_v16   ;;  %2461 = vset.pattern.permute.xlu0 %v2669_v5 }
 0x140   : > { %781 = vperm.xlu0 %2461, %v3030_v14  }
 0x143   : > { %613 = vperm.xlu1 %2448, %v518_v21  }
 0x144   : > { %2463 = vset.pattern.permute.xlu0 %v2670_v47 }
 0x145   : > { %871 = vperm.xlu0 %2463, %v588_v23  }
 0x147   : > { %2449 = vset.pattern.permute.xlu1 %v2668_v2 }
 0x148   : > { %657 = vperm.xlu1 %2449, %v517_v16  }
 0x149   : > { %2466 = vset.pattern.permute.xlu0 %v2669_v5 }
 0x14a   : > { %791 = vperm.xlu0 %2466, %v591_v25  }
 0x14c   : > { %661 = vperm.xlu1 %2449, %v518_v21  }
 0x14e   : > { %2468 = vset.pattern.permute.xlu0 %v2670_v47 }
 0x14f   : > { %879 = vperm.xlu0 %2468, %v590_v33  }
 0x150   : > { %2450 = vset.pattern.permute.xlu1 %v2670_v47 }
 0x151   : > { %709 = vperm.xlu1 %2450, %v517_v16  }
 0x153   : > { %2471 = vset.pattern.permute.xlu0 %v2669_v5 }
 0x154   : > { %801 = vperm.xlu0 %2471, %v3066_v26  }
 0x155   : > { %713 = vperm.xlu1 %2450, %v518_v21  }
 0x158   : > { %2473 = vset.pattern.permute.xlu0 %v2670_v47 }
 0x159   : > { %2451 = vset.pattern.permute.xlu1 %v2669_v5  ;;  %887 = vperm.xlu0 %2473, %v592_v36  }
 0x15a   : > { %618 = vperm.xlu1 %2451, %v2954_v13   ;;  %v734_v13 = vsub.s32 2, %v3104_v41 }
 0x15c   : > { %v3127_v43 = vrot.slane %v447_v31, %v734_v13 }
 0x15d   : > { %2476 = vset.pattern.permute.xlu0 %v2669_v5 }
 0x15e   : > { %623 = vperm.xlu1 %2451, %v520_v39   ;;  %811 = vperm.xlu0 %2476, %v3075_v35  }
 0x162   : > { %2452 = vset.pattern.permute.xlu1 %v2668_v2  ;;  %2478 = vset.pattern.permute.xlu0 %v2670_v47 }
 0x163   : > { %669 = vperm.xlu1 %2452, %v520_v39   ;;  %895 = vperm.xlu0 %2478, %v3082_v38  }
 0x167   : > { %2454 = vset.pattern.permute.xlu1 %v2670_v47 }
 0x168   : > { %721 = vperm.xlu1 %2454, %v520_v39  }
 0x16c   : > { %2455 = vset.pattern.permute.xlu1 %v2669_v5 }
 0x16d   : > { %628 = vperm.xlu1 %2455, %v3019_v7  }
 0x171   : > { %2457 = vset.pattern.permute.xlu1 %v2668_v2 }
 0x172   : > { %673 = vperm.xlu1 %2457, %v3019_v7  }
 0x176   : > { %677 = vperm.xlu1 %2457, %v2994_v52  }
 0x17a   : > { %2459 = vset.pattern.permute.xlu1 %v2670_v47 }
 0x17b   : > { %729 = vperm.xlu1 %2459, %v2994_v52  }
 0x17f   : > { %2460 = vset.pattern.permute.xlu1 %v2669_v5 }
 0x180   : > { %776 = vperm.xlu1 %2460, %v588_v23  }
 0x184   : > { %2462 = vset.pattern.permute.xlu1 %v2668_v2 }
 0x185   : > { %823 = vperm.xlu1 %2462, %v588_v23  }
 0x189   : > { %827 = vperm.xlu1 %2462, %v3030_v14  }
 0x18d   : > { %2464 = vset.pattern.permute.xlu1 %v2670_v47 }
 0x18e   : > { %875 = vperm.xlu1 %2464, %v3030_v14  }
 0x192   : > { %2465 = vset.pattern.permute.xlu1 %v2669_v5 }
 0x193   : > { %786 = vperm.xlu1 %2465, %v590_v33  }
 0x197   : > { %2467 = vset.pattern.permute.xlu1 %v2668_v2 }
 0x198   : > { %831 = vperm.xlu1 %2467, %v590_v33  }
 0x19c   : > { %835 = vperm.xlu1 %2467, %v591_v25  }
 0x1a0   : > { %2469 = vset.pattern.permute.xlu1 %v2670_v47 }
 0x1a1   : > { %883 = vperm.xlu1 %2469, %v591_v25  }
 0x1a5   : > { %2470 = vset.pattern.permute.xlu1 %v2669_v5 }
 0x1a6   : > { %796 = vperm.xlu1 %2470, %v592_v36  }
 0x1a7   : > { %v599_v27 = vpop.permute.xlu1 %598  ;;  %v650_v12 = vpop.permute.xlu0 %649 }
 0x1a8   : > { %v640_v18 = vmul.f32 %v3114_v9, %v599_v27  ;;  %v684_v22 = vmul.f32 %v3118_v11, %v650_v12 }
 0x1aa   : > { %2472 = vset.pattern.permute.xlu1 %v2668_v2  ;;  %v692_v37 = vadd.f32 %v684_v22, %v640_v18 }
 0x1ab   : > { %v604_v32 = vpop.permute.xlu1 %603  ;;  %839 = vperm.xlu1 %2472, %v592_v36   ;;  %v666_v36 = vpop.permute.xlu0 %665 }
 0x1ac   : > { %v641_v46 = vmul.f32 %v3114_v9, %v604_v32  ;;  %v688_v31 = vmul.f32 %v3118_v11, %v666_v36 }
 0x1af   : > { %843 = vperm.xlu1 %2472, %v3066_v26  }
 0x1b0   : > { %v654_v42 = vpop.permute.xlu1 %653  ;;  %v718_v32 = vpop.permute.xlu0 %717 }
 0x1b1   : > { %v685_v44 = vmul.f32 %v3118_v11, %v654_v42  ;;  %v740_v18 = vmul.f32 %v3127_v43, %v718_v32 }
 0x1b3   : > { %2474 = vset.pattern.permute.xlu1 %v2670_v47  ;;  %v693_v51 = vadd.f32 %v685_v44, %v641_v46 }
 0x1b4   : > { %891 = vperm.xlu1 %2474, %v3066_v26  }
 0x1b5   : > { %v702_v28 = vpop.permute.xlu1 %701 }
 0x1b6   : > { %v736_v45 = vmul.f32 %v3127_v43, %v702_v28 }
 0x1b8   : > { %v744_v48 = vadd.f32 %v736_v45, %v692_v37  ;;  %2475 = vset.pattern.permute.xlu1 %v2669_v5 }
 0x1b9   : > { %v706_v50 = vpop.permute.xlu1 %705  ;;  %806 = vperm.xlu1 %2475, %v3082_v38  }
 0x1ba   : > { %v737_v52 = vmul.f32 %v3127_v43, %v706_v50  ;;  %v758_v53 = vadd.f32 %v3138_v49, %v744_v48 }
 0x1bc   : > { %v745_v54 = vadd.f32 %v737_v52, %v693_v51  ;;  %v766_v1 = vmax.f32 %v758_v53, 0.0  ;;  %v634_v53 = vpop.permute.xlu0 %633 }
 0x1bd   : > { %2477 = vset.pattern.permute.xlu1 %v2668_v2 }
 0x1be   : > { %v759_v55 = vadd.f32 %v3138_v49, %v745_v54  ;;  %v609_v57 = vpop.permute.xlu1 %608  ;;  %847 = vperm.xlu1 %2477, %v3082_v38  }
 0x1bf   : > { %v642_v14 = vmul.f32 %v3114_v9, %v609_v57 }
 0x1c0   : > { %v767_v3 = vmax.f32 %v759_v55, 0.0 }
 0x1c2   : > { %v614_v6 = vpop.permute.xlu1 %613  ;;  %851 = vperm.xlu1 %2477, %v3075_v35   ;;  %v934_v7 = vpack.c.bf16 %v767_v3, %v766_v1 }
 0x1c3   : > { %v643_v19 = vmul.f32 %v3114_v9, %v614_v6 }
 0x1c4   : > { %1189 = vmatmul.mubr.bf16.vlgmr.msra.gmra.mrb[0].mxu0 %v934_v7  ;;  %1302 = vmatmul.mubr.bf16.vlgmr.msra.gmra.mrb[0].mxu1 %v934_v7  ;;  %v726_v7 = vpop.permute.xlu0 %725 }
 0x1c5   : > { %1198 = vmatprep.mubr.bf16.mxu0 %v2669_v5  ;;  %1311 = vmatprep.mubr.bf16.mxu1 %v2669_v5 }
 0x1c6   : > { %2479 = vset.pattern.permute.xlu1 %v2670_v47 }
 0x1c7   : > { %v658_v2 = vpop.permute.xlu1 %657  ;;  %899 = vperm.xlu1 %2479, %v3075_v35  }
 0x1c8   : > { %v686_v10 = vmul.f32 %v3118_v11, %v658_v2 }
 0x1ca   : > { %v694_v16 = vadd.f32 %v686_v10, %v642_v14  ;;  %v742_v10 = vmul.f32 %v3127_v43, %v726_v7 }
 0x1cb   : > { %v662_v8 = vpop.permute.xlu1 %661 }
 0x1cc   : > { %v687_v17 = vmul.f32 %v3118_v11, %v662_v8 }
 0x1ce   : > { %v695_v23 = vadd.f32 %v687_v17, %v643_v19 }
 0x1d0   : > { %v710_v15 = vpop.permute.xlu1 %709 }
 0x1d1   : > { %v738_v34 = vmul.f32 %v3127_v43, %v710_v15  ;;  %v647_v15 = vmul.f32 %v3114_v9, %v634_v53 }
 0x1d3   : > { %v746_v20 = vadd.f32 %v738_v34, %v694_v16 }
 0x1d4   : > { %v714_v21 = vpop.permute.xlu1 %713 }
 0x1d5   : > { %v739_v47 = vmul.f32 %v3127_v43, %v714_v21  ;;  %v760_v24 = vadd.f32 %v3138_v49, %v746_v20 }
 0x1d7   : > { %v747_v25 = vadd.f32 %v739_v47, %v695_v23  ;;  %v768_v35 = vmax.f32 %v760_v24, 0.0 }
 0x1d9   : > { %v761_v33 = vadd.f32 %v3138_v49, %v747_v25  ;;  %v619_v26 = vpop.permute.xlu1 %618 }
 0x1da   : > { %v644_v27 = vmul.f32 %v3114_v9, %v619_v26 }
 0x1db   : > { %v769_v39 = vmax.f32 %v761_v33, 0.0  ;;  %v782_v33 = vpop.permute.xlu0 %781 }
 0x1dc   : > { %v696_v12 = vadd.f32 %v688_v31, %v644_v27 }
 0x1dd   : > { %v624_v38 = vpop.permute.xlu1 %623  ;;  %v935_v40 = vpack.c.bf16 %v769_v39, %v768_v35 }
 0x1de   : > { %v748_v28 = vadd.f32 %v740_v18, %v696_v12  ;;  %v645_v37 = vmul.f32 %v3114_v9, %v624_v38  ;;  %v815_v12 = vmul.f32 %v782_v33, %v3114_v9 }
 0x1df   : > { %1199 = vmatmul.mubr.bf16.gmra.mrb[4].mxu0 %v935_v40  ;;  %1312 = vmatmul.mubr.bf16.gmra.mrb[4].mxu1 %v935_v40  ;;  %v872_v27 = vpop.permute.xlu0 %871 }
 0x1e0   : > { %1208 = vmatprep.mubr.bf16.mxu0 %v2669_v5  ;;  %1321 = vmatprep.mubr.bf16.mxu1 %v2669_v5  ;;  %v762_v50 = vadd.f32 %v3138_v49, %v748_v28  ;;  %v902_v31 = vmul.f32 %v872_v27, %v3127_v43 }
 0x1e2   : > { %v670_v42 = vpop.permute.xlu1 %669  ;;  %v770_v55 = vmax.f32 %v762_v50, 0.0 }
 0x1e3   : > { %v689_v22 = vmul.f32 %v3118_v11, %v670_v42 }
 0x1e5   : > { %v697_v45 = vadd.f32 %v689_v22, %v645_v37 }
 0x1e7   : > { %v722_v44 = vpop.permute.xlu1 %721 }
 0x1e8   : > { %v741_v46 = vmul.f32 %v3127_v43, %v722_v44 }
 0x1ea   : > { %v749_v48 = vadd.f32 %v741_v46, %v697_v45 }
 0x1ec   : > { %v763_v51 = vadd.f32 %v3138_v49, %v749_v48  ;;  %v629_v52 = vpop.permute.xlu1 %628 }
 0x1ed   : > { %v646_v6 = vmul.f32 %v3114_v9, %v629_v52 }
 0x1ee   : > { %v771_v54 = vmax.f32 %v763_v51, 0.0  ;;  %v792_v51 = vpop.permute.xlu0 %791 }
 0x1f0   : > { %v936_v57 = vpack.c.bf16 %v771_v54, %v770_v55 }
 0x1f1   : > { %v674_v1 = vpop.permute.xlu1 %673 }
 0x1f2   : > { %v690_v3 = vmul.f32 %v3118_v11, %v674_v1  ;;  %1209 = vmatmul.mubr.bf16.gmra.mrb[8].mxu0 %v936_v57  ;;  %1322 = vmatmul.mubr.bf16.gmra.mrb[8].mxu1 %v936_v57 }
 0x1f3   : > { %1218 = vmatprep.mubr.bf16.mxu0 %v2669_v5  ;;  %1331 = vmatprep.mubr.bf16.mxu1 %v2669_v5 }
 0x1f4   : > { %v698_v2 = vadd.f32 %v690_v3, %v646_v6  ;;  %v880_v3 = vpop.permute.xlu0 %879 }
 0x1f5   : > { %v678_v8 = vpop.permute.xlu1 %677  ;;  %v904_v6 = vmul.f32 %v880_v3, %v3127_v43 }
 0x1f6   : > { %v691_v14 = vmul.f32 %v3118_v11, %v678_v8  ;;  %v750_v16 = vadd.f32 %v742_v10, %v698_v2  ;;  %v817_v2 = vmul.f32 %v792_v51, %v3114_v9 }
 0x1f8   : > { %v699_v34 = vadd.f32 %v691_v14, %v647_v15  ;;  %v764_v21 = vadd.f32 %v3138_v49, %v750_v16 }
 0x1fa   : > { %v730_v17 = vpop.permute.xlu1 %729  ;;  %v772_v25 = vmax.f32 %v764_v21, 0.0 }
 0x1fb   : > { %v743_v19 = vmul.f32 %v3127_v43, %v730_v17 }
 0x1fd   : > { %v751_v20 = vadd.f32 %v743_v19, %v699_v34 }
 0x1ff   : > { %v765_v23 = vadd.f32 %v3138_v49, %v751_v20  ;;  %v777_v47 = vpop.permute.xlu1 %776 }
 0x200   : > { %v814_v39 = vmul.f32 %v777_v47, %v3114_v9 }
 0x201   : > { %v773_v24 = vmax.f32 %v765_v23, 0.0  ;;  %v802_v23 = vpop.permute.xlu0 %801 }
 0x203   : > { %v937_v26 = vpack.c.bf16 %v773_v24, %v772_v25 }
 0x204   : > { %v824_v36 = vpop.permute.xlu1 %823 }
 0x205   : > { %v854_v35 = vmul.f32 %v824_v36, %v3118_v11  ;;  %1219 = vmatmul.mubr.bf16.gmra.mrb[12].mxu0 %v937_v26  ;;  %1332 = vmatmul.mubr.bf16.gmra.mrb[12].mxu1 %v937_v26 }
 0x206   : > { %1228 = vmatprep.mubr.bf16.mxu0 %v2669_v5  ;;  %1341 = vmatprep.mubr.bf16.mxu1 %v2669_v5 }
 0x207   : > { %v862_v38 = vadd.f32 %v854_v35, %v814_v39  ;;  %v888_v35 = vpop.permute.xlu0 %887 }
 0x208   : > { %v828_v40 = vpop.permute.xlu1 %827  ;;  %v906_v39 = vmul.f32 %v888_v35, %v3127_v43 }
 0x209   : > { %v855_v32 = vmul.f32 %v828_v40, %v3118_v11  ;;  %v910_v42 = vadd.f32 %v902_v31, %v862_v38  ;;  %v819_v40 = vmul.f32 %v802_v23, %v3114_v9 }
 0x20b   : > { %v863_v22 = vadd.f32 %v855_v32, %v815_v12  ;;  %v918_v44 = vadd.f32 %v3138_v49, %v910_v42 }
 0x20d   : > { %v876_v18 = vpop.permute.xlu1 %875  ;;  %v926_v50 = vmax.f32 %v918_v44, 0.0 }
 0x20e   : > { %v903_v28 = vmul.f32 %v876_v18, %v3127_v43 }
 0x210   : > { %v911_v37 = vadd.f32 %v903_v28, %v863_v22 }
 0x212   : > { %v919_v45 = vadd.f32 %v3138_v49, %v911_v37  ;;  %v787_v46 = vpop.permute.xlu1 %786  ;;  %v812_v37 = vpop.permute.xlu0 %811 }
 0x213   : > { %v816_v55 = vmul.f32 %v787_v46, %v3114_v9 }
 0x214   : > { %v927_v48 = vmax.f32 %v919_v45, 0.0 }
 0x216   : > { %v938_v52 = vpack.c.bf16 %v927_v48, %v926_v50 }
 0x217   : > { %v832_v53 = vpop.permute.xlu1 %831 }
 0x218   : > { %v856_v54 = vmul.f32 %v832_v53, %v3118_v11  ;;  %1229 = vmatmul.mubr.bf16.gmra.mrb[16].mxu0 %v938_v52  ;;  %1342 = vmatmul.mubr.bf16.gmra.mrb[16].mxu1 %v938_v52  ;;  %v896_v52 = vpop.permute.xlu0 %895 }
 0x219   : > { %1238 = vmatprep.mubr.bf16.mxu0 %v2669_v5  ;;  %1351 = vmatprep.mubr.bf16.mxu1 %v2669_v5 }
 0x21a   : > { %v864_v57 = vadd.f32 %v856_v54, %v816_v55  ;;  %v908_v55 = vmul.f32 %v896_v52, %v3127_v43 }
 0x21b   : > { %v836_v1 = vpop.permute.xlu1 %835 }
 0x21c   : > { %v857_v7 = vmul.f32 %v836_v1, %v3118_v11  ;;  %v912_v8 = vadd.f32 %v904_v6, %v864_v57  ;;  %v821_v1 = vmul.f32 %v812_v37, %v3114_v9 }
 0x21e   : > { %v865_v14 = vadd.f32 %v857_v7, %v817_v2  ;;  %v920_v17 = vadd.f32 %v3138_v49, %v912_v8 }
 0x220   : > { %v884_v10 = vpop.permute.xlu1 %883  ;;  %v928_v21 = vmax.f32 %v920_v17, 0.0 }
 0x221   : > { %v905_v15 = vmul.f32 %v884_v10, %v3127_v43 }
 0x223   : > { %v913_v16 = vadd.f32 %v905_v15, %v865_v14 }
 0x225   : > { %v921_v34 = vadd.f32 %v3138_v49, %v913_v16  ;;  %v797_v19 = vpop.permute.xlu1 %796 }
 0x226   : > { %v818_v33 = vmul.f32 %v797_v19, %v3114_v9 }
 0x227   : > { %v929_v20 = vmax.f32 %v921_v34, 0.0 }
 0x229   : > { %v939_v47 = vpack.c.bf16 %v929_v20, %v928_v21 }
 0x22a   : > { %v840_v24 = vpop.permute.xlu1 %839 }
 0x22b   : > { %v858_v25 = vmul.f32 %v840_v24, %v3118_v11  ;;  %1239 = vmatmul.mubr.bf16.gmra.mrb[20].mxu0 %v939_v47  ;;  %1352 = vmatmul.mubr.bf16.gmra.mrb[20].mxu1 %v939_v47 }
 0x22c   : > { %1248 = vmatprep.mubr.bf16.mxu0 %v2669_v5  ;;  %1361 = vmatprep.mubr.bf16.mxu1 %v2669_v5 }
 0x22d   : > { %v866_v26 = vadd.f32 %v858_v25, %v818_v33 }
 0x22e   : > { %v844_v36 = vpop.permute.xlu1 %843 }
 0x22f   : > { %v859_v38 = vmul.f32 %v844_v36, %v3118_v11  ;;  %v914_v27 = vadd.f32 %v906_v39, %v866_v26 }
 0x231   : > { %v867_v32 = vadd.f32 %v859_v38, %v819_v40  ;;  %v922_v18 = vadd.f32 %v3138_v49, %v914_v27 }
 0x233   : > { %v892_v31 = vpop.permute.xlu1 %891  ;;  %v930_v45 = vmax.f32 %v922_v18, 0.0 }
 0x234   : > { %v907_v12 = vmul.f32 %v892_v31, %v3127_v43 }
 0x236   : > { %v915_v42 = vadd.f32 %v907_v12, %v867_v32 }
 0x238   : > { %v923_v22 = vadd.f32 %v3138_v49, %v915_v42  ;;  %v807_v28 = vpop.permute.xlu1 %806 }
 0x239   : > { %v820_v51 = vmul.f32 %v807_v28, %v3114_v9  ;;  %v974_v9 = vld [vmem:[%s3740_s5] sm:$0xf] }
 0x23a   : > { %v931_v44 = vmax.f32 %v923_v22, 0.0  ;;  %v3237_v17 = vrot.slane %v974_v9, %v682_v30 }
 0x23c   : > { %v940_v46 = vpack.c.bf16 %v931_v44, %v930_v45 }
 0x23d   : > { %v848_v48 = vpop.permute.xlu1 %847 }
 0x23e   : > { %v860_v50 = vmul.f32 %v848_v48, %v3118_v11  ;;  %1249 = vmatmul.mubr.bf16.gmra.mrb[24].mxu0 %v940_v46  ;;  %1362 = vmatmul.mubr.bf16.gmra.mrb[24].mxu1 %v940_v46 }
 0x23f   : > { %1258 = vmatprep.mubr.bf16.mxu0 %v2669_v5  ;;  %1371 = vmatprep.mubr.bf16.mxu1 %v2669_v5 }
 0x240   : > { %v868_v53 = vadd.f32 %v860_v50, %v820_v51 }
 0x241   : > { %v852_v54 = vpop.permute.xlu1 %851 }
 0x242   : > { %v861_v57 = vmul.f32 %v852_v54, %v3118_v11  ;;  %v916_v3 = vadd.f32 %v908_v55, %v868_v53  ;;  %v990_v11 = vsub.s32 3, %v3104_v41 }
 0x244   : > { %v869_v7 = vadd.f32 %v861_v57, %v821_v1  ;;  %v924_v10 = vadd.f32 %v3138_v49, %v916_v3  ;;  %v3239_v34 = vrot.slane %v974_v9, %v990_v11 }
 0x246   : > { %v900_v6 = vpop.permute.xlu1 %899  ;;  %v932_v15 = vmax.f32 %v924_v10, 0.0 }
 0x247   : > { %v909_v2 = vmul.f32 %v900_v6, %v3127_v43  ;;  %v3229_v43 = vrot.slane %v974_v9, %v638_v29 }
 0x249   : > { %v917_v8 = vadd.f32 %v909_v2, %v869_v7 }
 0x24b   : > { %v925_v5 = vadd.f32 %v3138_v49, %v917_v8  ;;  %v3233_v49 = vrot.slane %v974_v9, %v734_v13 }
 0x24d   : > { %v933_v14 = vmax.f32 %v925_v5, 0.0 }
 0x24f   : > { %v941_v16 = vpack.c.bf16 %v933_v14, %v932_v15 }
 0x251   : > { %1259 = vmatmul.mubr.bf16.gmra.mrb[28].mxu0 %v941_v16  ;;  %1372 = vmatmul.mubr.bf16.gmra.mrb[28].mxu1 %v941_v16 }
 0x297   : > { %v1190_v19 = vpop.f32.mrb[0].mxu0  ;;  %v1303_v20 = vpop.f32.mrb[0].mxu1 }
 0x298   : > { %v3242_v21 = vadd.f32 %v1190_v19, %v3229_v43  ;;  %v3245_v23 = vadd.f32 %v1303_v20, %v3233_v49  ;;  %v1192_v29 = vpop.f32.mrb[1].mxu0  ;;  %v1305_v47 = vpop.f32.mrb[1].mxu1 }
 0x299   : > { %v1193_v24 = vadd.f32 %v1192_v29, %v3237_v17  ;;  %v3249_v13 = vadd.f32 %v1305_v47, %v3239_v34  ;;  %v1194_v41 = vpop.f32.mrb[2].mxu0  ;;  %v1307_v30 = vpop.f32.mrb[2].mxu1 }
 0x29a   : > { %1382 = vst [vmem:[%s3253_s30] sm:$0xff] %v3242_v21  ;;  %1384 = vst [vmem:[%s3253_s30 + $0x10] sm:$0xff] %v3245_v23  ;;  %v3260_v25 = vadd.f32 %v1194_v41, %v3229_v43  ;;  %v3263_v33 = vadd.f32 %v1307_v30, %v3233_v49  ;;  %v1196_v26 = vpop.f32.mrb[3].mxu0  ;;  %v1309_v36 = vpop.f32.mrb[3].mxu1 }
 0x29b   : > { %1383 = vst [vmem:[%s3253_s30 + $0x8] sm:$0xff] %v1193_v24  ;;  %1385 = vst [vmem:[%s3253_s30 + $0x18] sm:$0xff] %v3249_v13  ;;  %v1197_v35 = vadd.f32 %v1196_v26, %v3237_v17  ;;  %v3270_v39 = vadd.f32 %v1309_v36, %v3239_v34 }
 0x29c   : > { %1386 = vst [vmem:[%s3253_s30 + $0x20] sm:$0xff] %v3260_v25  ;;  %v1446_v38 = vpack.c.bf16 %v3260_v25, %v3242_v21  ;;  %1388 = vst [vmem:[%s3253_s30 + $0x30] sm:$0xff] %v3263_v33 }
 0x29d   : > { %1387 = vst [vmem:[%s3253_s30 + $0x28] sm:$0xff] %v1197_v35  ;;  %v1447_v27 = vpack.c.bf16 %v1197_v35, %v1193_v24  ;;  %1389 = vst [vmem:[%s3253_s30 + $0x38] sm:$0xff] %v3270_v39 }
 0x29f   : > { %1510 = vmatprep.mubr.bf16.mxu0 %v1447_v27 }
 0x2b2   : > { %v1200_v32 = vpop.f32.mrb[4].mxu0  ;;  %v1313_v12 = vpop.f32.mrb[4].mxu1 }
 0x2b3   : > { %v3286_v42 = vadd.f32 %v1200_v32, %v3229_v43  ;;  %v3289_v18 = vadd.f32 %v1313_v12, %v3233_v49  ;;  %v1202_v22 = vpop.f32.mrb[5].mxu0  ;;  %v1315_v28 = vpop.f32.mrb[5].mxu1 }
 0x2b4   : > { %v3292_v37 = vadd.f32 %v1202_v22, %v3237_v17  ;;  %v1316_v44 = vadd.f32 %v1315_v28, %v3239_v34  ;;  %v1204_v45 = vpop.f32.mrb[6].mxu0  ;;  %v1317_v46 = vpop.f32.mrb[6].mxu1 }
 0x2b5   : > { %1390 = vst [vmem:[%s3253_s30 + $0x40] sm:$0xff] %v3286_v42  ;;  %1392 = vst [vmem:[%s3253_s30 + $0x50] sm:$0xff] %v3289_v18  ;;  %v3300_v48 = vadd.f32 %v1204_v45, %v3229_v43  ;;  %v3303_v50 = vadd.f32 %v1317_v46, %v3233_v49  ;;  %v1206_v51 = vpop.f32.mrb[7].mxu0  ;;  %v1319_v52 = vpop.f32.mrb[7].mxu1 }
 0x2b6   : > { %1391 = vst [vmem:[%s3253_s30 + $0x48] sm:$0xff] %v3292_v37  ;;  %1393 = vst [vmem:[%s3253_s30 + $0x58] sm:$0xff] %v1316_v44  ;;  %v3309_v53 = vadd.f32 %v1206_v51, %v3237_v17  ;;  %v1320_v54 = vadd.f32 %v1319_v52, %v3239_v34 }
 0x2b7   : > { %1394 = vst [vmem:[%s3253_s30 + $0x60] sm:$0xff] %v3300_v48  ;;  %1396 = vst [vmem:[%s3253_s30 + $0x70] sm:$0xff] %v3303_v50 }
 0x2b8   : > { %1395 = vst [vmem:[%s3253_s30 + $0x68] sm:$0xff] %v3309_v53  ;;  %1397 = vst [vmem:[%s3253_s30 + $0x78] sm:$0xff] %v1320_v54  ;;  %v1453_v3 = vpack.c.bf16 %v1320_v54, %v1316_v44 }
 0x2ba   : > { %1583 = vmatprep.mubr.bf16.mxu1 %v1453_v3 }
 0x2c5   : > { %v1210_v6 = vpop.f32.mrb[8].mxu0  ;;  %v1323_v7 = vpop.f32.mrb[8].mxu1 }
 0x2c6   : > { %v3326_v2 = vadd.f32 %v1210_v6, %v3229_v43  ;;  %v3329_v8 = vadd.f32 %v1323_v7, %v3233_v49  ;;  %v1212_v10 = vpop.f32.mrb[9].mxu0  ;;  %v1325_v5 = vpop.f32.mrb[9].mxu1 }
 0x2c7   : > { %v3332_v14 = vadd.f32 %v1212_v10, %v3237_v17  ;;  %v3335_v15 = vadd.f32 %v1325_v5, %v3239_v34  ;;  %v1214_v16 = vpop.f32.mrb[10].mxu0  ;;  %v1327_v9 = vpop.f32.mrb[10].mxu1 }
 0x2c8   : > { %1398 = vst [vmem:[%s3253_s30 + $0x80] sm:$0xff] %v3326_v2  ;;  %1400 = vst [vmem:[%s3253_s30 + $0x90] sm:$0xff] %v3329_v8  ;;  %v3342_v11 = vadd.f32 %v1214_v16, %v3229_v43  ;;  %v3345_v19 = vadd.f32 %v1327_v9, %v3233_v49  ;;  %v1216_v20 = vpop.f32.mrb[11].mxu0  ;;  %v1329_v29 = vpop.f32.mrb[11].mxu1 }
 0x2c9   : > { %1399 = vst [vmem:[%s3253_s30 + $0x88] sm:$0xff] %v3332_v14  ;;  %1401 = vst [vmem:[%s3253_s30 + $0x98] sm:$0xff] %v3335_v15  ;;  %v3352_v47 = vadd.f32 %v1216_v20, %v3237_v17  ;;  %v3355_v24 = vadd.f32 %v1329_v29, %v3239_v34 }
 0x2ca   : > { %1402 = vst [vmem:[%s3253_s30 + $0xa0] sm:$0xff] %v3342_v11  ;;  %1404 = vst [vmem:[%s3253_s30 + $0xb0] sm:$0xff] %v3345_v19  ;;  %v3763_v21 = vpack.c.bf16 %v3345_v19, %v3329_v8 }
 0x2cb   : > { %1403 = vst [vmem:[%s3253_s30 + $0xa8] sm:$0xff] %v3352_v47  ;;  %1405 = vst [vmem:[%s3253_s30 + $0xb8] sm:$0xff] %v3355_v24  ;;  %v3764_v25 = vpack.c.bf16 %v3352_v47, %v3332_v14 }
 0x2d8   : > { %v1220_v35 = vpop.f32.mrb[12].mxu0  ;;  %v1333_v27 = vpop.f32.mrb[12].mxu1 }
 0x2d9   : > { %v3374_v32 = vadd.f32 %v1220_v35, %v3229_v43  ;;  %v3377_v12 = vadd.f32 %v1333_v27, %v3233_v49  ;;  %v1222_v22 = vpop.f32.mrb[13].mxu0  ;;  %v1335_v28 = vpop.f32.mrb[13].mxu1 }
 0x2da   : > { %v3380_v44 = vadd.f32 %v1222_v22, %v3237_v17  ;;  %v3383_v45 = vadd.f32 %v1335_v28, %v3239_v34  ;;  %v1224_v46 = vpop.f32.mrb[14].mxu0  ;;  %v1337_v51 = vpop.f32.mrb[14].mxu1 }
 0x2db   : > { %1406 = vst [vmem:[%s3253_s30 + $0xc0] sm:$0xff] %v3374_v32  ;;  %1408 = vst [vmem:[%s3253_s30 + $0xd0] sm:$0xff] %v3377_v12  ;;  %v3390_v52 = vadd.f32 %v1224_v46, %v3229_v43  ;;  %v3393_v54 = vadd.f32 %v1337_v51, %v3233_v49  ;;  %v1226_v3 = vpop.f32.mrb[15].mxu0  ;;  %v1339_v6 = vpop.f32.mrb[15].mxu1 }
 0x2dc   : > { %1407 = vst [vmem:[%s3253_s30 + $0xc8] sm:$0xff] %v3380_v44  ;;  %1409 = vst [vmem:[%s3253_s30 + $0xd8] sm:$0xff] %v3383_v45  ;;  %v3400_v7 = vadd.f32 %v1226_v3, %v3237_v17  ;;  %v3403_v10 = vadd.f32 %v1339_v6, %v3239_v34 }
 0x2dd   : > { %1410 = vst [vmem:[%s3253_s30 + $0xe0] sm:$0xff] %v3390_v52  ;;  %1412 = vst [vmem:[%s3253_s30 + $0xf0] sm:$0xff] %v3393_v54 }
 0x2de   : > { %1411 = vst [vmem:[%s3253_s30 + $0xe8] sm:$0xff] %v3400_v7  ;;  %1413 = vst [vmem:[%s3253_s30 + $0xf8] sm:$0xff] %v3403_v10 }
 0x2eb   : > { %v1230_v29 = vpop.f32.mrb[16].mxu0  ;;  %v1343_v35 = vpop.f32.mrb[16].mxu1 }
 0x2ec   : > { %v1231_v27 = vadd.f32 %v1230_v29, %v3229_v43  ;;  %v1344_v22 = vadd.f32 %v1343_v35, %v3233_v49  ;;  %v1232_v28 = vpop.f32.mrb[17].mxu0  ;;  %v1345_v46 = vpop.f32.mrb[17].mxu1 }
 0x2ed   : > { %v1233_v51 = vadd.f32 %v1232_v28, %v3237_v17  ;;  %v1346_v3 = vadd.f32 %v1345_v46, %v3239_v34  ;;  %v1234_v6 = vpop.f32.mrb[18].mxu0  ;;  %v1347_v40 = vpop.f32.mrb[18].mxu1 }
 0x2ee   : > { %1414 = vst [vmem:[%s3427_s11] sm:$0xff] %v1231_v27  ;;  %1416 = vst [vmem:[%s3427_s11 + $0x10] sm:$0xff] %v1344_v22  ;;  %v1235_v29 = vadd.f32 %v1234_v6, %v3229_v43  ;;  %v1348_v35 = vadd.f32 %v1347_v40, %v3233_v49  ;;  %v1236_v28 = vpop.f32.mrb[19].mxu0  ;;  %v1349_v46 = vpop.f32.mrb[19].mxu1 }
 0x2ef   : > { %1415 = vst [vmem:[%s3427_s11 + $0x8] sm:$0xff] %v1233_v51  ;;  %1417 = vst [vmem:[%s3427_s11 + $0x18] sm:$0xff] %v1346_v3  ;;  %v1237_v31 = vadd.f32 %v1236_v28, %v3237_v17  ;;  %v1350_v5 = vadd.f32 %v1349_v46, %v3239_v34 }
 0x2f0   : > { %1418 = vst [vmem:[%s3427_s11 + $0x20] sm:$0xff] %v1235_v29  ;;  %v1462_v9 = vpack.c.bf16 %v1235_v29, %v1231_v27  ;;  %1420 = vst [vmem:[%s3427_s11 + $0x30] sm:$0xff] %v1348_v35  ;;  %v3439_v16 = vpack.c.bf16 %v1348_v35, %v1344_v22 }
 0x2f1   : > { %1419 = vst [vmem:[%s3427_s11 + $0x28] sm:$0xff] %v1237_v31  ;;  %v1463_v41 = vpack.c.bf16 %v1237_v31, %v1233_v51  ;;  %1421 = vst [vmem:[%s3427_s11 + $0x38] sm:$0xff] %v1350_v5  ;;  %v3443_v6 = vpack.c.bf16 %v1350_v5, %v1346_v3 }
 0x2f3   : > { %1478 = vmatprep.subr.bf16.mxu0 %v1463_v41  ;;  %2370 = vmatprep.subr.bf16.mxu1 %v3443_v6 }
 0x2f4   : > { %1479 = vmatpush1.bf16.xpose.msra.mxu0 %v1462_v9  ;;  %2374 = vmatpush1.bf16.xpose.msra.mxu1 %v3439_v16 }
 0x2fe   : > { %v1240_v40 = vpop.f32.mrb[20].mxu0  ;;  %v1353_v28 = vpop.f32.mrb[20].mxu1 }
 0x2ff   : > { %v1241_v27 = vadd.f32 %v1240_v40, %v3229_v43  ;;  %v1354_v22 = vadd.f32 %v1353_v28, %v3233_v49  ;;  %v1242_v31 = vpop.f32.mrb[21].mxu0  ;;  %v1355_v51 = vpop.f32.mrb[21].mxu1 }
 0x300   : > { %v1243_v5 = vadd.f32 %v1242_v31, %v3237_v17  ;;  %v1356_v41 = vadd.f32 %v1355_v51, %v3239_v34  ;;  %v1244_v3 = vpop.f32.mrb[22].mxu0  ;;  %v1357_v9 = vpop.f32.mrb[22].mxu1 }
 0x301   : > { %1422 = vst [vmem:[%s3427_s11 + $0x40] sm:$0xff] %v1241_v27  ;;  %1424 = vst [vmem:[%s3427_s11 + $0x50] sm:$0xff] %v1354_v22  ;;  %v1245_v29 = vadd.f32 %v1244_v3, %v3229_v43  ;;  %v1358_v35 = vadd.f32 %v1357_v9, %v3233_v49  ;;  %v1246_v46 = vpop.f32.mrb[23].mxu0  ;;  %v1359_v40 = vpop.f32.mrb[23].mxu1 }
 0x302   : > { %1423 = vst [vmem:[%s3427_s11 + $0x48] sm:$0xff] %v1243_v5  ;;  %1425 = vst [vmem:[%s3427_s11 + $0x58] sm:$0xff] %v1356_v41  ;;  %v1247_v28 = vadd.f32 %v1246_v46, %v3237_v17  ;;  %v1360_v31 = vadd.f32 %v1359_v40, %v3239_v34 }
 0x303   : > { %1426 = vst [vmem:[%s3427_s11 + $0x60] sm:$0xff] %v1245_v29  ;;  %v1466_v51 = vpack.c.bf16 %v1245_v29, %v1241_v27  ;;  %1428 = vst [vmem:[%s3427_s11 + $0x70] sm:$0xff] %v1358_v35  ;;  %v3461_v20 = vpack.c.bf16 %v1358_v35, %v1354_v22 }
 0x304   : > { %1427 = vst [vmem:[%s3427_s11 + $0x68] sm:$0xff] %v1247_v28  ;;  %v1467_v26 = vpack.c.bf16 %v1247_v28, %v1243_v5  ;;  %1429 = vst [vmem:[%s3427_s11 + $0x78] sm:$0xff] %v1360_v31  ;;  %v3465_v3 = vpack.c.bf16 %v1360_v31, %v1356_v41 }
 0x306   : > { %1480 = vmatprep.subr.bf16.mxu0 %v1467_v26  ;;  %2371 = vmatprep.subr.bf16.mxu1 %v3465_v3 }
 0x307   : > { %1481 = vmatpush1.bf16.xpose.msra.mxu0 %v1466_v51  ;;  %2375 = vmatpush1.bf16.xpose.msra.mxu1 %v3461_v20 }
 0x311   : > { %v1250_v9 = vpop.f32.mrb[24].mxu0  ;;  %v1363_v46 = vpop.f32.mrb[24].mxu1 }
 0x312   : > { %v1251_v27 = vadd.f32 %v1250_v9, %v3229_v43  ;;  %v1364_v22 = vadd.f32 %v1363_v46, %v3233_v49  ;;  %v1252_v5 = vpop.f32.mrb[25].mxu0  ;;  %v1365_v29 = vpop.f32.mrb[25].mxu1 }
 0x313   : > { %v1253_v41 = vadd.f32 %v1252_v5, %v3237_v17  ;;  %v1366_v26 = vadd.f32 %v1365_v29, %v3239_v34  ;;  %v1254_v35 = vpop.f32.mrb[26].mxu0  ;;  %v1367_v40 = vpop.f32.mrb[26].mxu1 }
 0x314   : > { %1430 = vst [vmem:[%s3427_s11 + $0x80] sm:$0xff] %v1251_v27  ;;  %1432 = vst [vmem:[%s3427_s11 + $0x90] sm:$0xff] %v1364_v22  ;;  %v1255_v28 = vadd.f32 %v1254_v35, %v3229_v43  ;;  %v1368_v31 = vadd.f32 %v1367_v40, %v3233_v49  ;;  %v1256_v51 = vpop.f32.mrb[27].mxu0  ;;  %v1369_v9 = vpop.f32.mrb[27].mxu1 }
 0x315   : > { %1431 = vst [vmem:[%s3427_s11 + $0x88] sm:$0xff] %v1253_v41  ;;  %1433 = vst [vmem:[%s3427_s11 + $0x98] sm:$0xff] %v1366_v26  ;;  %v1257_v46 = vadd.f32 %v1256_v51, %v3237_v17  ;;  %v1370_v5 = vadd.f32 %v1369_v9, %v3239_v34 }
 0x316   : > { %1434 = vst [vmem:[%s3427_s11 + $0xa0] sm:$0xff] %v1255_v28  ;;  %v1470_v29 = vpack.c.bf16 %v1255_v28, %v1251_v27  ;;  %1436 = vst [vmem:[%s3427_s11 + $0xb0] sm:$0xff] %v1368_v31  ;;  %v1472_v30 = vpack.c.bf16 %v1368_v31, %v1364_v22 }
 0x317   : > { %1435 = vst [vmem:[%s3427_s11 + $0xa8] sm:$0xff] %v1257_v46  ;;  %v1471_v55 = vpack.c.bf16 %v1257_v46, %v1253_v41  ;;  %1437 = vst [vmem:[%s3427_s11 + $0xb8] sm:$0xff] %v1370_v5  ;;  %v1473_v36 = vpack.c.bf16 %v1370_v5, %v1366_v26 }
 0x319   : > { %1482 = vmatprep.subr.bf16.mxu0 %v1471_v55  ;;  %2372 = vmatprep.subr.bf16.mxu1 %v1473_v36 }
 0x31a   : > { %1483 = vmatpush1.bf16.xpose.msra.mxu0 %v1470_v29  ;;  %2376 = vmatpush1.bf16.xpose.msra.mxu1 %v1472_v30 }
 0x324   : > { %v1260_v35 = vpop.f32.mrb[28].mxu0  ;;  %v1373_v40 = vpop.f32.mrb[28].mxu1 }
 0x325   : > { %v1261_v51 = vadd.f32 %v1260_v35, %v3229_v43  ;;  %v1374_v27 = vadd.f32 %v1373_v40, %v3233_v49  ;;  %v1262_v28 = vpop.f32.mrb[29].mxu0  ;;  %v1375_v22 = vpop.f32.mrb[29].mxu1 }
 0x326   : > { %v1263_v41 = vadd.f32 %v1262_v28, %v3237_v17  ;;  %v1376_v26 = vadd.f32 %v1375_v22, %v3239_v34  ;;  %v1264_v55 = vpop.f32.mrb[30].mxu0  ;;  %v1377_v31 = vpop.f32.mrb[30].mxu1 }
 0x327   : > { %1438 = vst [vmem:[%s3427_s11 + $0xc0] sm:$0xff] %v1261_v51  ;;  %1440 = vst [vmem:[%s3427_s11 + $0xd0] sm:$0xff] %v1374_v27  ;;  %v1265_v9 = vadd.f32 %v1264_v55, %v3229_v43  ;;  %v1378_v46 = vadd.f32 %v1377_v31, %v3233_v49  ;;  %v1266_v5 = vpop.f32.mrb[31].mxu0  ;;  %v1379_v29 = vpop.f32.mrb[31].mxu1  ;;  %v3759_v43 = vpack.c.bf16 %v3303_v50, %v3289_v18 }
 0x328   : > { %1439 = vst [vmem:[%s3427_s11 + $0xc8] sm:$0xff] %v1263_v41  ;;  %1441 = vst [vmem:[%s3427_s11 + $0xd8] sm:$0xff] %v1376_v26  ;;  %v1267_v35 = vadd.f32 %v1266_v5, %v3237_v17  ;;  %v1380_v40 = vadd.f32 %v1379_v29, %v3239_v34  ;;  %v3760_v49 = vpack.c.bf16 %v3309_v53, %v3292_v37 }
 0x329   : > { %1442 = vst [vmem:[%s3427_s11 + $0xe0] sm:$0xff] %v1265_v9  ;;  %v1474_v28 = vpack.c.bf16 %v1265_v9, %v1261_v51  ;;  %1444 = vst [vmem:[%s3427_s11 + $0xf0] sm:$0xff] %v1378_v46  ;;  %v1476_v22 = vpack.c.bf16 %v1378_v46, %v1374_v27  ;;  %v3761_v17 = vpack.c.bf16 %v3355_v24, %v3335_v15 }
 0x32a   : > { %1443 = vst [vmem:[%s3427_s11 + $0xe8] sm:$0xff] %v1267_v35  ;;  %v1475_v1 = vpack.c.bf16 %v1267_v35, %v1263_v41  ;;  %1445 = vst [vmem:[%s3427_s11 + $0xf8] sm:$0xff] %v1380_v40  ;;  %v1477_v57 = vpack.c.bf16 %v1380_v40, %v1376_v26  ;;  %v3762_v34 = vpack.c.bf16 %v3300_v48, %v3286_v42 }
 0x32b   : > { %v3766_v18 = vpack.c.bf16 %v3342_v11, %v3326_v2  ;;  %v3767_v42 = vpack.c.bf16 %v3393_v54, %v3377_v12  ;;  %v3768_v37 = vpack.c.bf16 %v3400_v7, %v3380_v44  ;;  %v3769_v48 = vpack.c.bf16 %v3390_v52, %v3374_v32 }
 0x32c   : > { %1484 = vmatprep.subr.bf16.mxu0 %v1475_v1  ;;  %2373 = vmatprep.subr.bf16.mxu1 %v1477_v57  ;;  %v3770_v50 = vpack.c.bf16 %v3270_v39, %v3249_v13  ;;  %v3771_v53 = vpack.c.bf16 %v3263_v33, %v3245_v23 }
 0x32d   : > { %1485 = vmatpush1.bf16.xpose.msra.mxu0 %v1474_v28  ;;  %2377 = vmatpush1.bf16.xpose.msra.mxu1 %v1476_v22 }
 0x32e   : > { %1543 = vmatprep.subr.bf16.mxu0 %v3443_v6 }
 0x334   : > { %1511 = vmatmul.mubr.bf16.vlgmr.msra.gmra.mrb[32].mxu0 %v1446_v38  ;;  %1584 = vmatmul.mubr.bf16.vlgmr.msra.gmra.mrb[32].mxu1 %v3759_v43  ;;  %v3765_v38 = vpack.c.bf16 %v3403_v10, %v3383_v45 }
 0x335   : > { %1518 = vmatprep.mubr.bf16.mxu0 %v3760_v49  ;;  %1544 = vmatpush1.bf16.xpose.msra.mxu0 %v3439_v16 }
 0x336   : > { %1591 = vmatprep.mubr.bf16.mxu1 %v3761_v17  ;;  %1545 = vmatprep.subr.bf16.mxu0 %v3465_v3 }
 0x33c   : > { %1519 = vmatmul.mubr.bf16.gmra.mrb[36].mxu0 %v3762_v34  ;;  %1592 = vmatmul.mubr.bf16.gmra.mrb[36].mxu1 %v3763_v21 }
 0x33d   : > { %1526 = vmatprep.mubr.bf16.mxu0 %v3764_v25  ;;  %1546 = vmatpush1.bf16.xpose.msra.mxu0 %v3461_v20 }
 0x33e   : > { %1599 = vmatprep.mubr.bf16.mxu1 %v3765_v38  ;;  %1547 = vmatprep.subr.bf16.mxu0 %v1473_v36 }
 0x344   : > { %1527 = vmatmul.mubr.bf16.gmra.mrb[40].mxu0 %v3766_v18  ;;  %1600 = vmatmul.mubr.bf16.gmra.mrb[40].mxu1 %v3767_v42  ;;  %v2564_v42 = vld [vmem:[%s2792_s12] sm:$0xff] }
 0x345   : > { %1534 = vmatprep.mubr.bf16.mxu0 %v3768_v37  ;;  %1548 = vmatpush1.bf16.xpose.msra.mxu0 %v1472_v30  ;;  %v2565_v37 = vld [vmem:[%s2792_s12 + $0x8] sm:$0xff] }
 0x346   : > { %1549 = vmatprep.subr.bf16.mxu0 %v1477_v57 }
 0x34c   : > { %1535 = vmatmul.mubr.bf16.gmra.mrb[44].mxu0 %v3769_v48  ;;  %v2342_v48 = vpack.c.bf16 %v2565_v37, %v2564_v42 }
 0x34d   : > { %1550 = vmatpush1.bf16.xpose.msra.mxu0 %v1476_v22  ;;  %1575 = vmatprep.mubr.bf16.mxu0 %v3770_v50 }
 0x34e   : > { %2343 = vmatprep.subr.bf16.mxu1 %v2342_v48 }
 0x34f   : > { %2345 = vmatpush3.bf16.msra.mxu1 %v2342_v48 }
 0x354   : > { %1576 = vmatmul.mubr.bf16.vlgmr.msra.gmra.mrb[32].mxu0 %v3771_v53 }
 0x407   : > { %v1585_v1 = vpop.f32.mrb[32].mxu1 }
 0x408   : > { %v1587_v2 = vpop.f32.mrb[33].mxu1 }
 0x409   : > { %v1588_v8 = vpop.f32.mrb[34].mxu1 }
 0x40a   : > { %v1590_v14 = vpop.f32.mrb[35].mxu1 }
 0x40f   : > { %v1520_v15 = vpop.f32.mrb[36].mxu0  ;;  %v1593_v11 = vpop.f32.mrb[36].mxu1 }
 0x410   : > { %v1586_v57 = vadd.f32 %v1585_v1, %v1520_v15  ;;  %v1522_v19 = vpop.f32.mrb[37].mxu0  ;;  %v1595_v47 = vpop.f32.mrb[37].mxu1 }
 0x411   : > { %v1523_v24 = vpop.f32.mrb[38].mxu0  ;;  %v1596_v30 = vpop.f32.mrb[38].mxu1 }
 0x412   : > { %v1589_v36 = vadd.f32 %v1588_v8, %v1523_v24  ;;  %v1525_v32 = vpop.f32.mrb[39].mxu0  ;;  %v1598_v12 = vpop.f32.mrb[39].mxu1  ;;  %v1610_v35 = vmul.f32 0.044194173, %v1586_v57 }
 0x414   : > { %v1611_v9 = vmul.f32 0.044194173, %v1589_v36  ;;  %v1623_v49 = vsel %vm1616_vm1, %v1610_v35, -inf }
 0x416   : > { %v1626_v22 = vsel %vm1616_vm1, %v1611_v9, -inf }
 0x417   : > { %v1528_v13 = vpop.f32.mrb[40].mxu0  ;;  %v1601_v39 = vpop.f32.mrb[40].mxu1 }
 0x418   : > { %v1594_v44 = vadd.f32 %v1593_v11, %v1528_v13  ;;  %v1530_v45 = vpop.f32.mrb[41].mxu0  ;;  %v1603_v23 = vpop.f32.mrb[41].mxu1 }
 0x419   : > { %v1531_v33 = vpop.f32.mrb[42].mxu0  ;;  %v1604_v52 = vpop.f32.mrb[42].mxu1 }
 0x41a   : > { %v1597_v54 = vadd.f32 %v1596_v30, %v1531_v33  ;;  %v1533_v7 = vpop.f32.mrb[43].mxu0  ;;  %v1606_v10 = vpop.f32.mrb[43].mxu1  ;;  %v1612_v43 = vmul.f32 0.044194173, %v1594_v44 }
 0x41c   : > { %v1613_v28 = vmul.f32 0.044194173, %v1597_v54  ;;  %v1629_v25 = vsel %vm1616_vm1, %v1612_v43, -inf }
 0x41e   : > { %v1632_v34 = vsel %vm1616_vm1, %v1613_v28, -inf }
 0x41f   : > { %v1536_v16 = vpop.f32.mrb[44].mxu0 }
 0x420   : > { %v1602_v20 = vadd.f32 %v1601_v39, %v1536_v16  ;;  %v1538_v6 = vpop.f32.mrb[45].mxu0 }
 0x421   : > { %v1539_v3 = vpop.f32.mrb[46].mxu0 }
 0x422   : > { %v1605_v51 = vadd.f32 %v1604_v52, %v1539_v3  ;;  %v1541_v27 = vpop.f32.mrb[47].mxu0  ;;  %v1614_v21 = vmul.f32 0.044194173, %v1602_v20 }
 0x424   : > { %v1615_v17 = vmul.f32 0.044194173, %v1605_v51  ;;  %v1635_v18 = vsel %vm1616_vm1, %v1614_v21, -inf }
 0x426   : > { %v1638_v38 = vsel %vm1616_vm1, %v1615_v17, -inf }
 0x427   : > { %v1577_v41 = vpop.f32.mrb[32].mxu0 }
 0x428   : > { %v1608_v26 = vmul.f32 0.044194173, %v1577_v41  ;;  %v1579_v55 = vpop.f32.mrb[33].mxu0 }
 0x429   : > { %v1580_v31 = vpop.f32.mrb[34].mxu0 }
 0x42a   : > { %v1609_v46 = vmul.f32 0.044194173, %v1580_v31  ;;  %v1582_v5 = vpop.f32.mrb[35].mxu0  ;;  %v1617_v29 = vsel %vm1616_vm1, %v1608_v26, -inf }
 0x42b   : > { %1618 = vmax.xlane.f32.xlu1 %v1617_v29 }
 0x42c   : > { %v1620_v40 = vsel %vm1616_vm1, %v1609_v46, -inf }
 0x42d   : > { %1621 = vmax.xlane.f32.xlu0 %v1620_v40  ;;  %v2567_v40 = vld [vmem:[%s2792_s12 + $0x18] sm:$0xff] }
 0x42f   : > { %1627 = vmax.xlane.f32.xlu1 %v1626_v22  ;;  %v2568_v22 = vld [vmem:[%s2792_s12 + $0x20] sm:$0xff] }
 0x431   : > { %1624 = vmax.xlane.f32.xlu0 %v1623_v49 }
 0x433   : > { %1633 = vmax.xlane.f32.xlu1 %v1632_v34  ;;  %v2571_v34 = vld [vmem:[%s2792_s12 + $0x38] sm:$0xff] }
 0x435   : > { %1630 = vmax.xlane.f32.xlu0 %v1629_v25 }
 0x437   : > { %1639 = vmax.xlane.f32.xlu1 %v1638_v38 }
 0x439   : > { %1636 = vmax.xlane.f32.xlu0 %v1635_v18 }
 0x4b8   : > { %v1619_v50 = vpop.xlane.xlu1 %1618 }
 0x4b9   : > { %v1641_v53 = vsub.f32 %v1608_v26, %v1619_v50 }
 0x4ba   : > { %v1622_v1 = vpop.xlane.xlu0 %1621 }
 0x4bb   : > { %v1649_v2 = vmul.f32 1.442695, %v1641_v53  ;;  %v1642_v8 = vsub.f32 %v1609_v46, %v1622_v1 }
 0x4bc   : > { %v1628_v14 = vpop.xlane.xlu1 %1627 }
 0x4bd   : > { %2532 = vpow2.f32 %v1649_v2  ;;  %v1651_v15 = vmul.f32 1.442695, %v1642_v8  ;;  %v1644_v11 = vsub.f32 %v1611_v9, %v1628_v14 }
 0x4be   : > { %v1625_v57 = vpop.xlane.xlu0 %1624 }
 0x4bf   : > { %2534 = vpow2.f32 %v1651_v15  ;;  %v1655_v19 = vmul.f32 1.442695, %v1644_v11  ;;  %v1643_v47 = vsub.f32 %v1610_v35, %v1625_v57  ;;  %v2566_v35 = vld [vmem:[%s2792_s12 + $0x10] sm:$0xff] }
 0x4c0   : > { %v1634_v24 = vpop.xlane.xlu1 %1633 }
 0x4c1   : > { %2536 = vpow2.f32 %v1655_v19  ;;  %v1653_v30 = vmul.f32 1.442695, %v1643_v47  ;;  %v1646_v36 = vsub.f32 %v1613_v28, %v1634_v24  ;;  %v2346_v28 = vpack.c.bf16 %v2567_v40, %v2566_v35 }
 0x4c2   : > { %v1631_v32 = vpop.xlane.xlu0 %1630  ;;  %v2671_v47 = vmov 0.0|0.0   ;;  %v2673_v24 = vmov 0.0  }
 0x4c3   : > { %2538 = vpow2.f32 %v1653_v30  ;;  %v1659_v12 = vmul.f32 1.442695, %v1646_v36  ;;  %v1645_v13 = vsub.f32 %v1612_v43, %v1631_v32  ;;  %2347 = vmatprep.subr.bf16.mxu1 %v2346_v28  ;;  %v2569_v43 = vld [vmem:[%s2792_s12 + $0x28] sm:$0xff] }
 0x4c4   : > { %v1640_v39 = vpop.xlane.xlu1 %1639  ;;  %2349 = vmatpush3.bf16.msra.mxu1 %v2346_v28  ;;  %v2350_v49 = vpack.c.bf16 %v2569_v43, %v2568_v22 }
 0x4c5   : > { %2540 = vpow2.f32 %v1659_v12  ;;  %v1657_v44 = vmul.f32 1.442695, %v1645_v13  ;;  %v1648_v45 = vsub.f32 %v1615_v17, %v1640_v39  ;;  %v2570_v17 = vld [vmem:[%s2792_s12 + $0x30] sm:$0xff] }
 0x4c6   : > { %v1637_v23 = vpop.xlane.xlu0 %1636  ;;  %2351 = vmatprep.subr.bf16.mxu1 %v2350_v49 }
 0x4c7   : > { %v3557_v33 = vpop.eup %2532  ;;  %2542 = vpow2.f32 %v1657_v44  ;;  %v1663_v52 = vmul.f32 1.442695, %v1648_v45  ;;  %v1647_v54 = vsub.f32 %v1614_v21, %v1637_v23  ;;  %v2354_v21 = vpack.c.bf16 %v2571_v34, %v2570_v17 }
 0x4c8   : > { %v1665_v7 = vsel %vm1616_vm1, %v3557_v33, 0.0  ;;  %2353 = vmatpush3.bf16.msra.mxu1 %v2350_v49 }
 0x4c9   : > { %v3561_v10 = vpop.eup %2534  ;;  %2544 = vpow2.f32 %v1663_v52  ;;  %v1661_v16 = vmul.f32 1.442695, %v1647_v54  ;;  %1666 = vadd.xlane.f32.xlu0 %v1665_v7  ;;  %2355 = vmatprep.subr.bf16.mxu1 %v2354_v21 }
 0x4ca   : > { %v1668_v20 = vsel %vm1616_vm1, %v3561_v10, 0.0 }
 0x4cb   : > { %v3565_v6 = vpop.eup %2536  ;;  %2546 = vpow2.f32 %v1661_v16  ;;  %1669 = vadd.xlane.f32.xlu1 %v1668_v20 }
 0x4cc   : > { %v1674_v51 = vsel %vm1616_vm1, %v3565_v6, 0.0  ;;  %2357 = vmatpush3.bf16.msra.mxu1 %v2354_v21 }
 0x4cd   : > { %v3567_v3 = vpop.eup %2538  ;;  %2358 = vmatprep.subr.bf16.mxu1 %v2671_v47 }
 0x4ce   : > { %v1671_v27 = vsel %vm1616_vm1, %v3567_v3, 0.0 }
 0x4cf   : > { %v3573_v41 = vpop.eup %2540  ;;  %1675 = vadd.xlane.f32.xlu1 %v1674_v51  ;;  %1672 = vadd.xlane.f32.xlu0 %v1671_v27 }
 0x4d0   : > { %v1680_v55 = vsel %vm1616_vm1, %v3573_v41, 0.0 }
 0x4d1   : > { %v3575_v26 = vpop.eup %2542 }
 0x4d2   : > { %v1677_v31 = vsel %vm1616_vm1, %v3575_v26, 0.0 }
 0x4d3   : > { %v3581_v9 = vpop.eup %2544  ;;  %1681 = vadd.xlane.f32.xlu1 %v1680_v55  ;;  %1678 = vadd.xlane.f32.xlu0 %v1677_v31 }
 0x4d4   : > { %v1686_v5 = vsel %vm1616_vm1, %v3581_v9, 0.0 }
 0x4d5   : > { %v3583_v46 = vpop.eup %2546 }
 0x4d6   : > { %v1683_v29 = vsel %vm1616_vm1, %v3583_v46, 0.0 }
 0x4d7   : > { %1687 = vadd.xlane.f32.xlu1 %v1686_v5  ;;  %1684 = vadd.xlane.f32.xlu0 %v1683_v29 }
 0x504   : > { %1864 = vxpose.xlu0.b32.start [1/8] (short) (narrow) %v2842_v58, 8 }
 0x508   : > { %1865 = vxpose.xlu0.b32.cont [2/8] (short) (narrow) %v2845_v59, 8 }
 0x50c   : > { %1866 = vxpose.xlu0.b32.cont [3/8] (short) (narrow) %v2848_v60, 8 }
 0x510   : > { %1867 = vxpose.xlu0.b32.cont [4/8] (short) (narrow) %v2851_v61, 8 }
 0x514   : > { %1868 = vxpose.xlu0.b32.cont [5/8] (short) (narrow) %v2854_v62, 8 }
 0x518   : > { %1869 = vxpose.xlu0.b32.cont [6/8] (short) (narrow) %v2857_v63, 8 }
 0x51c   : > { %1870 = vxpose.xlu0.b32.cont [7/8] (short) (narrow) %v2860_v4, 8 }
 0x520   : > { %1871 = vxpose.xlu0.b32.end [8/8] (short) (narrow) %v2863_v0, 8 }
 0x556   : > { %v1667_v25 = vpop.xlane.xlu0 %1666 }
 0x557   : > { %2548 = vrcp.f32 %v1667_v25 }
 0x558   : > { %v1670_v38 = vpop.xlane.xlu1 %1669 }
 0x559   : > { %2550 = vrcp.f32 %v1670_v38 }
 0x55c   : > { %v1676_v18 = vpop.xlane.xlu1 %1675  ;;  %v1673_v58 = vpop.xlane.xlu0 %1672 }
 0x55d   : > { %2552 = vrcp.f32 %v1676_v18 }
 0x55e   : > { %2554 = vrcp.f32 %v1673_v58 }
 0x560   : > { %v1682_v59 = vpop.xlane.xlu1 %1681  ;;  %v1679_v60 = vpop.xlane.xlu0 %1678 }
 0x561   : > { %v2549_v42 = vpop.eup %2548  ;;  %2556 = vrcp.f32 %v1682_v59 }
 0x562   : > { %2558 = vrcp.f32 %v1679_v60  ;;  %v1690_v61 = vmul.f32 %v2549_v42, %v3557_v33 }
 0x563   : > { %v2551_v62 = vpop.eup %2550 }
 0x564   : > { %v1692_v63 = vmul.f32 %v2551_v62, %v3561_v10  ;;  %v1688_v4 = vpop.xlane.xlu1 %1687  ;;  %2311 = vmatprep.mubr.msk.f32.mxu1 %vm1616_vm1, %v1690_v61  ;;  %v1685_v0 = vpop.xlane.xlu0 %1684 }
 0x565   : > { %2560 = vrcp.f32 %v1688_v4 }
 0x566   : > { %2562 = vrcp.f32 %v1685_v0  ;;  %2312 = vmatmul.mubr.msk.f32.vlgmr.msra.gmra.mrb[44].mxu1 %vm1616_vm1, %v1692_v63 }
 0x567   : > { %v2553_v37 = vpop.eup %2552 }
 0x568   : > { %v2555_v48 = vpop.eup %2554  ;;  %v1696_v50 = vmul.f32 %v2553_v37, %v3565_v6 }
 0x569   : > { %v1694_v53 = vmul.f32 %v2555_v48, %v3567_v3 }
 0x56b   : > { %v2557_v1 = vpop.eup %2556  ;;  %2314 = vmatprep.mubr.msk.f32.mxu1 %vm1616_vm1, %v1694_v53 }
 0x56c   : > { %v2559_v2 = vpop.eup %2558  ;;  %2315 = vmatmul.mubr.msk.f32.gmra.mrb[46].mxu1 %vm1616_vm1, %v1696_v50  ;;  %v1700_v8 = vmul.f32 %v2557_v1, %v3573_v41 }
 0x56d   : > { %v1698_v14 = vmul.f32 %v2559_v2, %v3575_v26 }
 0x56f   : > { %v2561_v15 = vpop.eup %2560  ;;  %2317 = vmatprep.mubr.msk.f32.mxu1 %vm1616_vm1, %v1698_v14 }
 0x570   : > { %v2563_v11 = vpop.eup %2562  ;;  %2318 = vmatmul.mubr.msk.f32.gmra.mrb[48].mxu1 %vm1616_vm1, %v1700_v8  ;;  %v1704_v57 = vmul.f32 %v2561_v15, %v3581_v9 }
 0x571   : > { %v1702_v19 = vmul.f32 %v2563_v11, %v3583_v46 }
 0x573   : > { %2320 = vmatprep.mubr.msk.f32.mxu1 %vm1616_vm1, %v1702_v19 }
 0x574   : > { %2321 = vmatmul.mubr.msk.f32.gmra.mrb[50].mxu1 %vm1616_vm1, %v1704_v57 }
 0x575   : > { %2339 = vmatprep.mubr.msk.f32.mxu1 %vm2672_vm3, %v2673_v24 }
 0x584   : > { %v1880_v59 = vpop.trf.xlu0 }
 0x639   : > { %v2313_v30 = vpop.f32.mrb[44].mxu1 }
 0x63a   : > { %v1835_v36 = vsel %vm448_vm0, %v2313_v30, 0.0  ;;  %v1795_v32 = vpop.f32.mrb[45].mxu1 }
 0x63b   : > { %v1834_v12 = vsel %vm448_vm0, %v1795_v32, 0.0 }
 0x63c   : > { %v1836_v13 = vadd.f32 %v1835_v36, %v1834_v12 }
 0x63f   : > { %v2316_v39 = vpop.f32.mrb[46].mxu1 }
 0x640   : > { %v1805_v44 = vpop.f32.mrb[47].mxu1  ;;  %v1839_v33 = vsel %vm448_vm0, %v2316_v39, 0.0 }
 0x641   : > { %v1837_v45 = vsel %vm448_vm0, %v1805_v44, 0.0 }
 0x642   : > { %v1838_v23 = vadd.f32 %v1837_v45, %v1836_v13 }
 0x643   : > { %v2319_v56 = vpop.f32.mrb[48].mxu1 }
 0x644   : > { %v1815_v52 = vpop.f32.mrb[49].mxu1  ;;  %v1840_v54 = vadd.f32 %v1839_v33, %v1838_v23  ;;  %v1843_v16 = vsel %vm448_vm0, %v2319_v56, 0.0 }
 0x645   : > { %v1841_v7 = vsel %vm448_vm0, %v1815_v52, 0.0 }
 0x646   : > { %v1842_v10 = vadd.f32 %v1841_v7, %v1840_v54 }
 0x647   : > { %v2322_v20 = vpop.f32.mrb[50].mxu1 }
 0x648   : > { %v1825_v6 = vpop.f32.mrb[51].mxu1  ;;  %v1844_v3 = vadd.f32 %v1843_v16, %v1842_v10  ;;  %v1847_v41 = vsel %vm448_vm0, %v2322_v20, 0.0 }
 0x649   : > { %v1845_v51 = vsel %vm448_vm0, %v1825_v6, 0.0 }
 0x64a   : > { %v1846_v27 = vadd.f32 %v1845_v51, %v1844_v3 }
 0x64c   : > { %v1848_v26 = vadd.f32 %v1847_v41, %v1846_v27 }
 0x64e   : > { %v1849_v55 = vrot.slane %v1848_v26, 4 }
 0x650   : > { %v1850_v31 = vadd.f32 %v1849_v55, %v1848_v26 }
 0x652   : > { %v1851_v9 = vrot.slane %v1850_v31, 2 }
 0x654   : > { %v1852_v46 = vadd.f32 %v1851_v9, %v1850_v31 }
 0x656   : > { %v1853_v5 = vrot.slane %v1852_v46, 1 }
 0x658   : > { %v1854_v29 = vadd.f32 %v1853_v5, %v1852_v46 }
 0x65a   : > { %v1855_v35 = vmul.f32 0.015625, %v1854_v29 }
 0x65c   : > { %v1862_v40 = vsub.f32 %v1825_v6, %v1855_v35  ;;  %v1863_v28 = vsub.f32 %v2322_v20, %v1855_v35  ;;  %1973 = vst.msk [vmem:[%s428_s27] sm:$0x1] %vm1971_vm2, %v1855_v35  ;;  %v1856_v22 = vsub.f32 %v1795_v32, %v1855_v35  ;;  %v1857_v43 = vsub.f32 %v2313_v30, %v1855_v35  ;;  %s2674_s27 = smov [#allocation2]  }
 0x65d   : > { %v1858_v49 = vsub.f32 %v1805_v44, %v1855_v35  ;;  %v1859_v17 = vsub.f32 %v2316_v39, %v1855_v35  ;;  %v1860_v34 = vsub.f32 %v1815_v52, %v1855_v35  ;;  %v1861_v21 = vsub.f32 %v2319_v56, %v1855_v35  ;;  %s2576_s1 = sshll.u32 %s2674_s27, 4  ;;  %s2577_s1 = int_to_ptr.vmem [resolvable:$false] %s2576_s1 }
 0x65e   : > { %v2368_v25 = vpack.c.bf16 %v1863_v28, %v1862_v40  ;;  %v2359_v38 = vpack.c.bf16 %v1857_v43, %v1856_v22  ;;  %s2578_s30 = scalar_lea.vmem %s2577_s1, 8192  ;;  %p2579_p0 = scmp.lt.s32.totalorder %s3648_s29, %s2577_s1 }
 0x65f   : > { %v2362_v18 = vpack.c.bf16 %v1859_v17, %v1858_v49  ;;  %v2365_v58 = vpack.c.bf16 %v1861_v21, %v1860_v34  ;;  %p2580_p1 = scmp.lt.s32.totalorder %s2578_s30, %s2572_s0 }
 0x660   : > { %2360 = vmatpush3.bf16.msra.mxu1 %v2359_v38 }
 0x661   : > { %2361 = vmatprep.subr.bf16.mxu1 %v2671_v47  ;;  %p2581_p2 = por %p2580_p1, %p2579_p0 }
 0x663   : > { %p2582_p3 = pnand %p2581_p2, %p2575_p13 }
 0x664   : > { %2363 = vmatpush3.bf16.msra.mxu1 %v2362_v18 }
 0x665   : > { %2364 = vmatprep.subr.bf16.mxu1 %v2671_v47 }
 0x668   : > { %2366 = vmatpush3.bf16.msra.mxu1 %v2365_v58 }
 0x669   : > { %2367 = vmatprep.subr.bf16.mxu1 %v2671_v47 }
 0x66c   : > { %2369 = vmatpush3.bf16.msra.mxu1 %v2368_v25 }
 0x66f   : > { %2340 = vmatmul.mubr.msk.f32.vlgmr.msra.gmra.mrb[52].mxu1 %vm1616_vm1, %v1880_v59 }
 0x670   : > { %2585 = shalt.err (!%p2582_p3)
}
 0x671   : > { %s2586_s12 = scalar_lea.hbm %s3646_s20, 4096  ;;  %s2590_s27 = scalar_lea.hbm %s3741_s6, 8192 }
 0x672   : > { %p2587_p4 = scmp.ne.s32.totalorder %s3646_s20, %s2586_s12  ;;  %p2591_p9 = scmp.lt.u32.totalorder %s3646_s20, %s3741_s6 }
 0x673   : > { %p2592_p10 = scmp.lt.u32.totalorder %s2590_s27, %s2586_s12  ;;  %p2594_p12 = scmp.lt.u32.totalorder %s2586_s12, %s3646_s20 }
 0x674   : > { %p2588_p7 = pnand %p2587_p4, %p2771_p5 }
 0x675   : > { %p2593_p11 = por %p2592_p10, %p2591_p9 }
 0x676   : > { %p2589_p8 = pneg %p2588_p7 }
 0x677   : > { %p2595_p13 = por %p2594_p12, %p2593_p11 }
 0x679   : > { %p2596_p0 = pnand %p2595_p13, %p2589_p8 }
 0x67b   : > { %2599 = shalt.err (!%p2596_p0)
}
 0x67c   : > { %s2675_s0 = smov 512   ;;  %s2676_s28 = smov 32  }
 0x67d   : > { %s3772_s21 = scalar_lea.sflag [#allocation3], %s3220_s26  ;;  %s3773_s30 = sshll.u32 %s2754_s17, 12 }
 0x67e   : > { %2392 = dma.vmem_to_hbm [thread:$0]  (%p2771_p5), %s3648_s29, 4096, %s3646_s20, %s3772_s21, %s2675_s0, %s2675_s0, %s2676_s28  }
 0x67f   : > { %s3682_s27 = scalar_lea.hbm %s3742_s7, %s3773_s30  ;;  %s2019_s1 = sshll.u32 %s3427_s11, 4  ;;  %s3685_s1 = int_to_ptr.vmem [resolvable:$true] %s2019_s1 }
 0x680   : > { %s1980_s2 = scalar_lea.sflag [#allocation5], %s3220_s26  ;;  %s2600_s3 = scalar_lea.vmem %s3685_s1, 4096 }
 0x681   : > { %p2601_p1 = scmp.ne.s32.totalorder %s3685_s1, %s2600_s3  ;;  %s2677_s4 = smov [#allocation4]  }
 0x682   : > { %s2604_s29 = sshll.u32 %s2677_s4, 4  ;;  %s2605_s29 = int_to_ptr.vmem [resolvable:$false] %s2604_s29 }
 0x683   : > { %p2602_p2 = pnand %p2601_p1, %p2771_p5  ;;  %s2606_s17 = scalar_lea.vmem %s2605_s29, 8192 }
 0x684   : > { %p2607_p4 = scmp.lt.s32.totalorder %s3685_s1, %s2605_s29  ;;  %p2608_p7 = scmp.lt.s32.totalorder %s2606_s17, %s2600_s3 }
 0x685   : > { %p2603_p3 = pneg %p2602_p2 }
 0x686   : > { %p2609_p8 = por %p2608_p7, %p2607_p4 }
 0x688   : > { %p2610_p9 = pnand %p2609_p8, %p2603_p3 }
 0x68a   : > { %2613 = shalt.err (!%p2610_p9)
}
 0x68b   : > { %s2614_s11 = scalar_lea.hbm %s3682_s27, 4096  ;;  %s2618_s4 = scalar_lea.hbm %s3742_s7, 8192 }
 0x68c   : > { %p2615_p10 = scmp.ne.s32.totalorder %s3682_s27, %s2614_s11  ;;  %p2619_p13 = scmp.lt.u32.totalorder %s3682_s27, %s3742_s7 }
 0x68d   : > { %p2620_p0 = scmp.lt.u32.totalorder %s2618_s4, %s2614_s11  ;;  %p2622_p2 = scmp.lt.u32.totalorder %s2614_s11, %s3682_s27 }
 0x68e   : > { %p2616_p11 = pnand %p2615_p10, %p2771_p5 }
 0x68f   : > { %p2621_p1 = por %p2620_p0, %p2619_p13 }
 0x690   : > { %p2617_p12 = pneg %p2616_p11 }
 0x691   : > { %p2623_p3 = por %p2622_p2, %p2621_p1 }
 0x693   : > { %p2624_p4 = pnand %p2623_p3, %p2617_p12 }
 0x695   : > { %2627 = shalt.err (!%p2624_p4)
}
 0x696   : > { %2393 = dma.vmem_to_hbm [thread:$0]  (%p2771_p5), %s3685_s1, 4096, %s3682_s27, %s1980_s2, %s2675_s0, %s2675_s0, %s2676_s28   ;;  %vm1969_vm4 = vcmask 18432  }
 0x697   : > { %s2215_s3 = sshll.u32 %s2783_s25, 2 }
 0x698   : > { %s422_s17 = scalar_lea.vmem %s3743_s8, %s2215_s3 }
 0x742   : > { %v1965_v60 = vpop.f32.mrb[52].mxu1 }
 0x743   : > { %1970 = vst.msk [vmem:[%s422_s17] sm:$0x7] %vm1969_vm4, %v1965_v60  ;;  %v2341_v42 = vpop.f32.mrb[53].mxu1 }
 0x744 PF: > { %p2403_p7 = scmp.ge.s32.totalorder %s2666_s16, 2  ;;  %s2043_s23 = sand.u32 1, %s2654_s13  }
 0x745   : > { %s2044_s26 = scalar_lea.sflag [#allocation3], %s2043_s23 }
 0x746   : > { %p2397_p8 = pnand %p2403_p7, %p2775_p6 }
 0x748   : > { %2645 = dma.done.wait (!%p2397_p8), %s2044_s26, 4096  }
 0x749   : > { %2647 = vsyncadd (!%p2397_p8), %s2044_s26, 4294963200  ;;  %s2053_s2 = scalar_lea.sflag [#allocation5], %s2043_s23 }
 0x74a   : > { %2649 = dma.done.wait (!%p2397_p8), %s2053_s2, 4096  }
 0x74b   : > { %2651 = vsyncadd (!%p2397_p8), %s2053_s2, 4294963200  ;;  %p24_p5 = scmp.ge.s32.totalorder %s2758_s19, 4   ;;  %s3774_s13 = smov %s2658_s14 }
 0x74c   : > { %s3775_s14 = smov %s2662_s15  ;;  %s3776_s15 = smov %s2769_s22 }
 0x74d   : > { %s3777_s16 = smov %s2758_s19  ;;  %26 = sbr.rel (!%p24_p5) target bundleno = 11 (0xb), region = 138 }
 0x754   :  { %2077 = vsyncpa [#allocation3], 1 }
 0x755   :  { %2079 = vsyncpa [#allocation3 + $0x1], 1 }
 0x756   :  { %2080 = vsyncpa [#allocation5], 1 }
 0x757   :  { %2082 = vsyncpa [#allocation5 + $0x1], 1 }

// kernel: custom-call.16
= control target key start
LH: loop header
LB: loop body
LE: loop exit
PB: predicated region body
PF: predicated region fallthrough
CT: control target
= control target key end

     0   :  { %s653_s9 = smov 0   ;;  %s655_s10 = smov 0   ;;  %s799_s0 = inlined_call_operand.vmem [shape: f32[2,3,3], index: 0, kind: input, shape index: {}]   ;;  %s800_s1 = inlined_call_operand.vmem [shape: f32[2,3,3], index: 1, kind: output, shape index: {0}]   ;;  %s801_s2 = inlined_call_operand.vmem [shape: f32[2,3], index: 2, kind: output, shape index: {1}]  }
   0x1   :  { %s657_s11 = smov 0   ;;  %s659_s12 = smov 0  }
   0x2   :  { %s661_s13 = smov 0  }
   0x3 LB: > { %s28_s14 = sadd.s32 1, %s626_s12  ;;  %s508_s15 = sadd.s32 4294967295, %s630_s13   ;;  %s630_s13 = sphi %s661_s13, %s9_s13   ;;  %s626_s12 = sphi %s659_s12, %s808_s12   ;;  %s622_s11 = sphi %s657_s11, %s807_s11   ;;  %s618_s10 = sphi %s655_s10, %s806_s10   ;;  %s614_s9 = sphi %s653_s9, %s805_s9  }
   0x4   : > { %p30_p0 = scmp.ge.s32.totalorder %s28_s14, 2  ;;  %s33_s16 = ssub.s32 0, %s626_s12 }
   0x5   : > { %s510_s17 = smin.u32 %s626_s12, %s33_s16  ;;  %p57_p1 = scmp.ne.s32.totalorder %s618_s10, %s614_s9 }
   0x6   : > { %s810_s14 = smov (%p30_p0, %s28_s14), 0  ;;  %s35_s18 = sshrl.u32 %s510_s17, 3 }
   0x7   : > { %s39_s19 = ssub.s32 0, %s810_s14  ;;  %p58_p2 = scmp.eq.s32.totalorder %s508_s15, 1 }
   0x8   : > { %s511_s20 = smin.u32 %s39_s19, %s810_s14  ;;  %s47_s24 = sadd.s32 1, %s618_s10 }
   0x9   : > { %s41_s21 = sshrl.u32 %s511_s20, 3  ;;  %p688_p3 = por %p58_p2, %p57_p1 }
   0xa   : > { %s44_s23 = ssub.s32 %s35_s18, %s41_s21  ;;  %p513_p5 = scmp.ge.s32.totalorder %s630_s13, 2 }
   0xb   : > { %p45_p4 = scmp.eq.s32.totalorder %s44_s23, 0  ;;  %s82_s26 = sand.u32 (!%p513_p5), 1, %s630_s13  }
   0xc   : > { %80 = sbr.rel (%p513_p5) target bundleno = 19 (0x13), region = 16  ;;  %s515_s27 = sshll.u32 (!%p513_p5), %s626_s12, 2 }
   0xd   : > { %s694_s25 = scalar_select %p45_p4, %s618_s10, %s47_s24  }
   0xe   : > { %s514_s28 = sshll.u32 (!%p513_p5), %s82_s26, 2  ;;  %s88_s3 = scalar_lea.vmem (!%p513_p5), %s799_s0, %s515_s27 }
   0xf   : > { %v104_v0 = vld [vmem:[%s88_s3] sm:$0xf] (!%p513_p5)  ;;  %s84_s4 = scalar_lea.vmem (!%p513_p5), [#allocation1], %s514_s28 }
  0x10   : > { %105 = vst [vmem:[%s84_s4] sm:$0xf] (!%p513_p5), %v104_v0 }
  0x13 PF: > { %p516_p6 = scmp.ge.s32.totalorder %s630_s13, 1  ;;  %p121_p7 = scmp.lt.s32.totalorder %s630_s13, 3 }
  0x15   : > { %p122_p8 = pnand %p516_p6, %p121_p7 }
  0x17   : > { %125 = sbr.rel (%p122_p8) target bundleno = 346 (0x15a), region = 50 }
  0x1e   : > { %s132_s5 = sand.u32 1, %s508_s15   ;;  %s142_s6 = sand.u32 1, %s614_s9   ;;  %v636_v2 = vmov 0.0  }
  0x1f   : > { %s517_s7 = sshll.u32 %s132_s5, 2  ;;  %s705_s8 = sshll.u32 %s142_s6, 1 }
  0x20   : > { %s134_s16 = scalar_lea.vmem [#allocation1], %s517_s7  ;;  %s155_s17 = sand.u32 7, %s622_s11  }
  0x21   : > { %v147_v1 = vld [vmem:[%s134_s16] sm:$0xf]  ;;  %s708_s18 = scalar_lea.vmem [#allocation4], %s155_s17  ;;  %s711_s19 = scalar_lea.vmem [#allocation3], %s517_s7 }
  0x22   : > { %148 = vst [vmem:[#allocation0] sm:$0xf] %v147_v1  ;;  %159 = vst [vmem:[%s708_s18] sm:$0x1] %v636_v2  ;;  %s144_s15 = scalar_lea.vmem [#allocation5], %s705_s8  ;;  %s714_s20 = smov 0  }
  0x29   : > { %v157_v3 = vld [vmem:[#allocation0] sm:$0xff] }
  0x2a   : > { %158 = vst [vmem:[#allocation2] sm:$0xff] %v157_v3 }
  0x2b LB: >> { %v167_v4 = vlaneseq  ;;  %v723_v6 = vstv %s634_s20  ;;  %s194_s9 = scalar_lea.vmem [#allocation2], %s634_s20  ;;  %s230_s21 = smov [#allocation2]  ;;  %v637_v60 = vmov 1.0   ;;  %v265_v61 = vld [vmem:[%s708_s18] ss:$0 sm:$0xff]  ;;  %s634_s20 = sphi %s714_s20, %s165_s20  }
  0x2c   : >> { %s252_s23 = scalar_lea.vmem [#allocation6], %s634_s20  ;;  %s268_s24 = smov [#allocation2] }
  0x2d   : >> { %v720_v5 = vshrl.u32 %v167_v4, 7  ;;  %v246_v49 = vand.u32 127, %v167_v4  ;;  %s269_s26 = smov [#allocation6] }
  0x2f   : >> { %vm171_vm0 = vcmp.gt.s32.totalorder %v720_v5, %v723_v6  ;;  %vm172_vm1 = vcmp.lt.s32.totalorder %v720_v5, 3  ;;  %v233_v5 = vmov %v720_v5  ;;  %vm738_vm12 = vcmp.eq.s32.totalorder %v246_v49, %v723_v6 }
  0x30   : >> { %vm173_vm2 = vmand %vm171_vm0, %vm172_vm1  ;;  %vm237_vm9 = vcmp.gt.s32.totalorder %v233_v5, %v723_v6  ;;  %vm238_vm10 = vcmp.lt.s32.totalorder %v233_v5, 3  ;;  %v272_v5 = vmov %v720_v5  ;;  %vm298_vm15 = vcmp.gt.s32.totalorder %v246_v49, %v723_v6 }
  0x31   : >> { %v166_v7 = vld [vmem:[#allocation2] sm:$0xff]  ;;  %v195_v16 = vld [vmem:[%s194_s9] ss:$0 sm:$0xff]  ;;  %vm239_vm11 = vmand %vm237_vm9, %vm238_vm10  ;;  %vm277_vm13 = vcmp.lt.s32.totalorder %v272_v5, 3  ;;  %v289_v5 = vmov %v720_v5 }
  0x32   : >> { %v174_v8 = vsel %vm173_vm2, %v166_v7, 0.0  ;;  %v196_v17 = vand.u32 2147483647, %v195_v16  ;;  %vm221_vm8 = vcmp.lt.f32.partialorder %v195_v16, 0.0  ;;  %v234_v46 = vld [vmem:[%s230_s21] sm:$0xff]  ;;  %vm306_vm14 = vcmp.ge.s32.totalorder %v289_v5, %v723_v6 }
  0x33   : >> { %v175_v9 = vmul.f32 %v174_v8, %v174_v8  ;;  %v240_v50 = vsel %vm239_vm11, %v234_v46, 0.0  ;;  %v275_v0 = vld [vmem:[%s268_s24] sm:$0xff]  ;;  %s285_s24 = smov %s268_s24  ;;  %vm307_vm0 = vmand %vm738_vm12, %vm306_vm14 }
  0x34   : >> { %v197_v22 = vmax.f32 %v196_v17, 0.0  ;;  %s310_s27 = scalar_lea.vmem %s285_s24, %s634_s20  ;;  %s165_s20 = sadd.s32 1, %s634_s20  }
  0x35   : >> { %v176_v10 = vrot.slane %v175_v9, 4  ;;  %p162_p9 = scmp.ge.s32.totalorder %s165_s20, 3  }
  0x36   : > { %s523_s28 = sshll.u32 (%p162_p9), %s622_s11, 2 }
  0x37   : >> { %v177_v11 = vadd.f32 %v176_v10, %v175_v9  ;;  %s341_s3 = scalar_lea.vmem (%p162_p9), %s800_s1, %s523_s28 }
  0x39   : >> { %v178_v12 = vrot.slane %v177_v11, 2 }
  0x3b   : >> { %v179_v13 = vadd.f32 %v178_v12, %v177_v11 }
  0x3d   : >> { %v180_v14 = vrot.slane %v179_v13, 1 }
  0x3f   : >> { %v181_v15 = vadd.f32 %v180_v14, %v179_v13  ;;  %v296_v14 = vld [vmem:[%s285_s24] sm:$0xff] }
  0x41   : >> { %578 = vrsqrt.f32 %v181_v15  ;;  %vm184_vm3 = vcmp.eq.f32.partialorder %v181_v15, inf  ;;  %v187_v19 = vand.u32 2147483648, %v181_v15  ;;  %vm186_vm4 = vcmp.eq.f32.partialorder %v181_v15, 0.0 }
  0x4b   : >> { %v579_v18 = vpop.eup %578 }
  0x4c   : >> { %v183_v20 = vmul.f32 %v579_v18, %v181_v15 }
  0x4e   : >> { %v185_v21 = vsel %vm184_vm3, %v181_v15, %v183_v20 }
  0x4f   : >> { %v188_v23 = vsel %vm186_vm4, %v187_v19, %v185_v21 }
  0x50   : >> { %v198_v24 = vand.u32 2147483647, %v188_v23 }
  0x52   : >> { %v199_v25 = vmax.f32 %v197_v22, %v198_v24 }
  0x54   : >> { %580 = vrcp.f32 %v199_v25  ;;  %vm211_vm7 = vcmp.eq.f32.partialorder %v199_v25, 0.0 }
  0x5e   : >> { %v581_v26 = vpop.eup %580 }
  0x5f   : >> { %v201_v27 = vmul.f32 %v581_v26, %v196_v17  ;;  %v204_v28 = vmul.f32 0.0, %v581_v26  ;;  %v208_v29 = vmul.f32 %v581_v26, %v198_v24 }
  0x61   : >> { %v202_v30 = vmul.f32 %v201_v27, %v201_v27  ;;  %v205_v31 = vmul.f32 %v204_v28, %v204_v28  ;;  %v209_v32 = vmul.f32 %v208_v29, %v208_v29 }
  0x63   : >> { %v206_v33 = vadd.f32 %v205_v31, %v202_v30 }
  0x65   : >> { %v210_v34 = vadd.f32 %v209_v32, %v206_v33 }
  0x67   : >> { %582 = vrsqrt.f32 %v210_v34  ;;  %vm214_vm5 = vcmp.eq.f32.partialorder %v210_v34, inf  ;;  %v217_v36 = vand.u32 2147483648, %v210_v34  ;;  %vm216_vm6 = vcmp.eq.f32.partialorder %v210_v34, 0.0 }
  0x71   : >> { %v583_v35 = vpop.eup %582 }
  0x72   : >> { %v213_v37 = vmul.f32 %v583_v35, %v210_v34 }
  0x74   : >> { %v215_v38 = vsel %vm214_vm5, %v210_v34, %v213_v37 }
  0x75   : >> { %v218_v39 = vsel %vm216_vm6, %v217_v36, %v215_v38 }
  0x76   : >> { %v219_v40 = vmul.f32 %v218_v39, %v199_v25 }
  0x78   : >> { %v220_v41 = vsel %vm211_vm7, 0.0, %v219_v40 }
  0x79   : >> { %v222_v42 = vxor.u32 2147483648, %v220_v41 }
  0x7b   : >> { %v223_v43 = vsel %vm221_vm8, %v220_v41, %v222_v42 }
  0x7c   : >> { %v731_v44 = vsel %vm186_vm4, %v195_v16, %v223_v43  ;;  %584 = vrcp.f32 %v223_v43  ;;  %v224_v47 = vsub.f32 %v223_v43, %v195_v16 }
  0x7d   : >> { %v229_v45 = vsub.f32 %v195_v16, %v731_v44 }
  0x7f   : >> { %586 = vrcp.f32 %v229_v45 }
  0x86   : >> { %v585_v48 = vpop.eup %584 }
  0x87   : >> { %v226_v51 = vmul.f32 %v585_v48, %v224_v47 }
  0x89   : >> { %v587_v52 = vpop.eup %586  ;;  %v228_v56 = vsel %vm186_vm4, 0.0, %v226_v51 }
  0x8a   : >> { %v242_v53 = vmul.f32 %v587_v52, %v240_v50  ;;  %v258_v58 = vsel %vm738_vm12, %v228_v56, 0.0 }
  0x8c   : >> { %v243_v55 = vsel %vm186_vm4, 0.0, %v242_v53 }
  0x8d   : >> { %v248_v57 = vsel %vm738_vm12, %v243_v55, 0.0 }
  0x8e   : >> { %249 = vadd.xlane.f32.xlu0 %v248_v57 }
  0x92   : >> { %259 = vadd.xlane.f32.xlu0 %v258_v58 }
 0x11b   : >> { %v250_v59 = vpop.xlane.xlu0 %249 }
 0x11c   : >> { %251 = vst [vmem:[#allocation6] sm:$0xff] %v250_v59 }
 0x11d   : >> { %253 = vst [vmem:[%s252_s23] sm:$0x1] %v637_v60 }
 0x11f   : >> { %v260_v62 = vpop.xlane.xlu0 %259 }
 0x120   : >> { %v266_v63 = vsel %vm738_vm12, %v260_v62, %v265_v61 }
 0x121   : >> { %267 = vst [vmem:[%s708_s18] sm:$0x1] %v266_v63 }
 0x124   : >> { %v274_v1 = vld [vmem:[%s269_s26] sm:$0xff]  ;;  %s286_s26 = smov %s269_s26 }
 0x125   : >> { %v276_v2 = vmul.f32 %v275_v0, %v274_v1  ;;  %v294_v13 = vld [vmem:[%s286_s26] sm:$0xff] }
 0x127   : >> { %v278_v3 = vsel %vm277_vm13, %v276_v2, 0.0 }
 0x128   : >> { %v279_v4 = vrot.slane %v278_v3, 4  ;;  %v327_v6 = vld [vmem:[#allocation4] sm:$0x3] (%p162_p9) }
 0x129   : > { %329 = vst [vmem:[%s144_s15] sm:$0x3] (%p162_p9), %v327_v6 }
 0x12a   : >> { %v280_v7 = vadd.f32 %v279_v4, %v278_v3 }
 0x12c   : >> { %v281_v8 = vrot.slane %v280_v7, 2 }
 0x12e   : >> { %v282_v9 = vadd.f32 %v281_v8, %v280_v7 }
 0x130   : >> { %v283_v10 = vrot.slane %v282_v9, 1 }
 0x132   : >> { %v284_v11 = vadd.f32 %v283_v10, %v282_v9 }
 0x134   : >> { %v290_v12 = vmul.f32 %v284_v11, %v260_v62 }
 0x136   : >> { %v295_v15 = vmul.f32 %v294_v13, %v290_v12 }
 0x138   : >> { %v299_v16 = vsub.f32 %v296_v14, %v295_v15 }
 0x13a   : >> { %v300_v17 = vsel %vm298_vm15, %v299_v16, %v296_v14 }
 0x13b   : >> { %v308_v18 = vsel %vm307_vm0, %v294_v13, %v300_v17 }
 0x13c   : >> { %309 = vst [vmem:[%s285_s24] sm:$0xff] %v308_v18 }
 0x13f   : > { %164 = sbr.rel (!%p162_p9) target bundleno = 43 (0x2b), region = 167 }
 0x143   : >> { %v311_v19 = vld [vmem:[%s310_s27] ss:$0 sm:$0xff] }
 0x144   : >> { %v316_v20 = vsel %vm738_vm12, %v731_v44, %v311_v19 }
 0x145   : >> { %317 = vst [vmem:[%s310_s27] sm:$0x1] %v316_v20 }
 0x146   : > { %p376_p10 = scmp.lt.s32.totalorder (%p688_p3), %s622_s11, 0  ;;  %s377_s4 = ssub.s32 (%p688_p3), 0, %s622_s11  ;;  %v399_v22 = vld [vmem:[%s144_s15] sm:$0x3] (%p688_p3) }
 0x147   : > { %s524_s5 = smin.u32 (%p688_p3), %s622_s11, %s377_s4 }
 0x148   : > { %s379_s6 = sshrl.u32 (%p688_p3), %s524_s5, 3 }
 0x149   : > { %s380_s7 = ssub.s32 (%p688_p3), 0, %s379_s6 }
 0x14c   : > { %v321_v5 = vld [vmem:[#allocation2] sm:$0xf] }
 0x14d   : > { %323 = vst [vmem:[%s711_s19] sm:$0xf] %v321_v5 }
 0x14f   : > { %375 = sbr.rel (!%p688_p3) target bundleno = 346 (0x15a), region = 91 }
 0x154   : > { %v357_v21 = vld [vmem:[%s711_s19] sm:$0xf] }
 0x155   : > { %358 = vst [vmem:[%s341_s3] sm:$0xf] %v357_v21 }
 0x156   : > { %s812_s7 = smov (!%p376_p10, %s380_s7), %s379_s6 }
 0x157   : > { %s525_s16 = sshll.u32 %s812_s7, 1 }
 0x158   : > { %s383_s19 = scalar_lea.vmem %s801_s2, %s525_s16 }
 0x159   : > { %400 = vst [vmem:[%s383_s19] sm:$0x3] %v399_v22 }
 0x15a PF: > { %s9_s13 = sadd.s32 1, %s630_s13   ;;  %s805_s9 = smov %s618_s10 }
 0x15b   : > { %p6_p11 = scmp.ge.s32.totalorder %s9_s13, 4   ;;  %s806_s10 = smov %s694_s25 }
 0x15c   : > { %s807_s11 = smov %s626_s12  ;;  %s808_s12 = smov %s810_s14 }
 0x15d   :  { %8 = sbr.rel (!%p6_p11) target bundleno = 3 (0x3), region = 178 }

// kernel: sub.13
= control target key start
LH: loop header
LB: loop body
LE: loop exit
PB: predicated region body
PF: predicated region fallthrough
CT: control target
= control target key end

     0   :  { %3 = vsyncpa [#allocation1], 0  ;;  %s80_s0 = inlined_call_operand.vmem [shape: f32[2,3], index: 0, kind: input, shape index: {}]   ;;  %s81_s1 = inlined_call_operand.vmem [shape: f32[2,3], index: 1, kind: input, shape index: {}]   ;;  %s82_s2 = inlined_call_operand.hbm [shape: f32[2,3], index: 2, kind: output, shape index: {}]  }
   0x1   :  { %v4_v0 = vld [vmem:[%s80_s0] sm:$0x3] }
   0x2   :  { %v5_v1 = vld [vmem:[%s81_s1] sm:$0x3]  ;;  %s46_s1 = smov [#allocation0]  }
   0x3   :  { %v8_v2 = vsub.f32 %v4_v0, %v5_v1  ;;  %s15_s12 = sshll.u32 %s46_s1, 4  ;;  %s16_s12 = int_to_ptr.vmem [resolvable:$true] %s15_s12 }
   0x4   :  { %s22_s13 = scalar_lea.vmem %s16_s12, 32  ;;  %p27_p1 = scmp.lt.s32.totalorder %s16_s12, %s16_s12 }
   0x5   :  { %10 = vst [vmem:[#allocation0] sm:$0x3] %v8_v2  ;;  %p23_p0 = scmp.ne.s32.totalorder %s16_s12, %s22_s13  ;;  %p28_p2 = scmp.lt.s32.totalorder %s22_s13, %s22_s13 }
   0x7   :  { %p29_p3 = por %p28_p2, %p27_p1 }
   0x9   :  { %p30_p4 = pnand %p29_p3, %p23_p0 }
   0xb   :  { %33 = shalt.err (!%p30_p4)
}
   0xc   :  { %s34_s16 = scalar_lea.hbm %s82_s2, 32 }
   0xd   :  { %p35_p5 = scmp.ne.s32.totalorder %s82_s2, %s34_s16  ;;  %p38_p6 = scmp.lt.u32.totalorder %s34_s16, %s82_s2 }
   0xf   :  { %p40_p7 = pnand %p38_p6, %p35_p5 }
  0x11   :  { %43 = shalt.err (!%p40_p7)
}
  0x12   :  { %18 = dma.vmem_to_hbm [thread:$0]  %s16_s12, 32, %s82_s2, [#allocation1]  }
  0x13   :  { %44 = dma.done.wait [#allocation1], 32  }
  0x14   :  { %45 = vsyncadd [#allocation1], 4294967264 }
  0x15   :  { %20 = vsyncpa [#allocation1], 1 }

</bundles_post_ra>
